<compile_context>
chip_gen: v7x
topology: tpu7x:2x2x1
jax: 0.10.0
libtpu: 0.0.40
codegen_flags: <defaults>
</compile_context>

<pallas_src>
import functools
import math

import jax
import jax.numpy as jnp
from jax.experimental import pallas as pl
from jax.experimental.pallas import tpu as pltpu


def _round_up(x, m):
    return (x + m - 1) // m * m


# ----------------------------------------------------------------------------
# Fused kernel: N x (MHA-over-heads + res + LN + FC + res + LN) + classifier.
# Works on lane-packed rows of D = G*F features (G tokens per row).
# ----------------------------------------------------------------------------
def encoder_classifier_kernel(n_layers,
                              x_ref,
                              repq_ref, repk_ref, pool_ref, sumh_ref, lnpool_ref,
                              wqkv_ref, bqkv_ref, wfc2_ref, bfc2_ref,
                              g1_ref, b1_ref, wfc_ref, bfc_ref, g2_ref, b2_ref,
                              wc_ref, bc_ref,
                              logits_ref):
    x = x_ref[0].astype(jnp.float32)              # [R, D]  (R packed rows)
    d = x.shape[-1]

    repq = repq_ref[...]                          # [D, G*H*F]  Q -> per-h2 replication
    repk = repk_ref[...]                          # [D, G*H*F]  K/V -> per-h1 replication
    pool = pool_ref[...]                          # [GHF, GHF]  hd-blockwise sum+broadcast
    sumh = sumh_ref[...]                          # [GHF, D]    sum over h2
    lnpool = lnpool_ref[...]                      # [D, D]      per-token mean broadcast

    def seg_layer_norm(v, gamma, beta):
        # Single-pass segmented LayerNorm: per-token mean / mean-of-squares via
        # 0/1-matrix MXU matmuls (keeps the XLU free), var = E[x^2] - E[x]^2.
        mu = jnp.dot(v, lnpool, preferred_element_type=jnp.float32)
        mu2 = jnp.dot(v * v, lnpool, preferred_element_type=jnp.float32)
        var = mu2 - mu * mu
        return (v - mu) * jax.lax.rsqrt(var + 1e-5) * gamma + beta

    # NOTE: for very large N*F one would move this loop onto a third grid axis
    # ("arbitrary") with per-layer weight index_maps so weights stream instead
    # of staying fully VMEM-resident; not needed at these sizes.
    for n in range(n_layers):
        wqkv = wqkv_ref[n].astype(jnp.float32)
        # ---- fused (packed, block-diagonal) Q/K/V projection ----
        qkv = jnp.dot(x, wqkv, preferred_element_type=jnp.float32) \
            + bqkv_ref[n].astype(jnp.float32)
        q = qkv[:, 0 * d:1 * d]
        k = qkv[:, 1 * d:2 * d]
        v = qkv[:, 2 * d:3 * d]

        # ---- per-token attention over heads, fully batched on the MXU ----
        # q_rep[., g,h2,h1,d] = Q[., g,h1,d]; k_rep/v_rep[., g,h2,h1,d] = K/V[., g,h2,d]
        q_rep = jnp.dot(q, repq, preferred_element_type=jnp.float32)   # [R, GHF]
        k_rep = jnp.dot(k, repk, preferred_element_type=jnp.float32)
        v_rep = jnp.dot(v, repk, preferred_element_type=jnp.float32)
        s = jnp.dot(q_rep * k_rep, pool, preferred_element_type=jnp.float32)
        # Per-row max (constant within every softmax group, so mathematically
        # identical to per-group max subtraction; keeps exp <= 1).
        e = jnp.exp(s - jnp.max(s, axis=-1, keepdims=True))
        denom = jnp.dot(e, sumh, preferred_element_type=jnp.float32)   # [R, D]
        numer = jnp.dot(e * v_rep, sumh, preferred_element_type=jnp.float32)
        att = numer * pl.reciprocal(denom, approx=True)                # EUP slot

        # ---- per-head fc2 as one block-diagonal [D, D] matmul ----
        att = jnp.dot(att, wfc2_ref[n].astype(jnp.float32),
                      preferred_element_type=jnp.float32) + bfc2_ref[n].astype(jnp.float32)

        # ---- residual + norm1, fc + residual + norm2 ----
        x1 = seg_layer_norm(att + x, g1_ref[n], b1_ref[n])
        y = jnp.dot(x1, wfc_ref[n].astype(jnp.float32),
                    preferred_element_type=jnp.float32) + bfc_ref[n].astype(jnp.float32)
        x = seg_layer_norm(y + x1, g2_ref[n], b2_ref[n])

    # ---- fused classifier on the CLS token (packed row 0, lanes [0:F)) ----
    # Only the logits are written back to HBM (CLS-only writeback); wc is zero
    # outside the first F rows so no lane slicing is needed.
    @pl.when(pl.program_id(1) == 0)
    def _():
        logits = jnp.dot(x, wc_ref[...], preferred_element_type=jnp.float32) \
            + bc_ref[...]
        logits_ref[0] = logits[0:1, :].astype(logits_ref.dtype)


def _device_vmem_bytes():
    try:
        return int(pltpu.get_tpu_info().vmem_capacity_bytes)
    except Exception:
        return 64 * 2 ** 20          # conservative: v7x per-TensorCore VMEM


def _pick_tile_rows(sp, d, ghf, weight_bytes, vmem_phys):
    # Rough per-packed-row live f32 footprint: ~6-7 GHF-wide slabs + a handful
    # of D-wide slabs, plus double-buffered in/out tiles (with margin).
    per_row = (8 * ghf + 24 * d) * 4
    budget = max(1 << 20, int(0.6 * vmem_phys) - 2 * weight_bytes)
    rows = min(512, max(8, budget // per_row))
    rows = max(8, (rows // 8) * 8)
    if sp <= rows:
        return sp                    # full-extent block is always layout-legal
    return rows


def encoder_classifier(x, packed, num_head, num_feature):
    """x: [B, S, F] float32 embeddings (+ positional encoding). Returns [B, C]."""
    del num_head, num_feature
    b, s, f = x.shape
    g = packed['group']
    d = g * f
    n_layers = packed['wqkv'].shape[0]
    c_pad = packed['wc'].shape[1]

    # Pack G tokens per lane-row: [B, S, F] -> [B, Sp, G*F].  Padded tokens are
    # zero, produce finite values through the stack and are never read back.
    s_pack = _round_up(s, g)
    if s_pack != s:
        x = jnp.pad(x, ((0, 0), (0, s_pack - s), (0, 0)))
    sp = s_pack // g
    xp = x.reshape(b, sp, d)

    consts = (packed['repq'], packed['repk'], packed['pool'], packed['sumh'],
              packed['lnpool'],
              packed['wqkv'], packed['bqkv'], packed['wfc2'], packed['bfc2'],
              packed['g1'], packed['b1'], packed['wfc'], packed['bfc'],
              packed['g2'], packed['b2'],
              packed['wc'], packed['bc'])
    weight_bytes = sum(int(w.size) * w.dtype.itemsize for w in consts)

    vmem_phys = _device_vmem_bytes()
    ghf = packed['repq'].shape[1]
    tile_r = _pick_tile_rows(sp, d, ghf, weight_bytes, vmem_phys)
    sp_pad = _round_up(sp, tile_r)
    if sp_pad != sp:
        xp = jnp.pad(xp, ((0, 0), (0, sp_pad - sp), (0, 0)))
    n_jt = sp_pad // tile_r

    # Clamp the scoped VMEM request below the physical capacity (v7x: 64 MiB).
    vmem_limit = int(min(0.85 * vmem_phys, 100 * 2 ** 20))
    vmem_limit = int(min(max(vmem_limit, 2 * weight_bytes + (8 << 20)),
                         0.95 * vmem_phys))

    def const_spec(shape):
        zeros = (0,) * len(shape)
        # NOTE: these constant-index blocks are still double-buffered by the
        # pipeline; pl.Buffered(1) would halve that, but the stack is tiny here.
        return pl.BlockSpec(shape, lambda i, j, _z=zeros: _z)

    out = pl.pallas_call(
        functools.partial(encoder_classifier_kernel, n_layers),
        out_shape=jax.ShapeDtypeStruct((b, 1, c_pad), jnp.float32),
        grid=(b, n_jt),
        in_specs=[pl.BlockSpec((1, tile_r, d), lambda i, j: (i, j, 0))]
                 + [const_spec(w.shape) for w in consts],
        out_specs=pl.BlockSpec((1, 1, c_pad), lambda i, j: (i, 0, 0)),
        compiler_params=pltpu.CompilerParams(
            dimension_semantics=("parallel", "arbitrary"),
            vmem_limit_bytes=vmem_limit),
    )(xp, *consts)
    return out[:, 0, :packed['num_classes']]


# ----------------------------------------------------------------------------
# Parameter construction (raw per-layer weights + packed kernel operands)
# ----------------------------------------------------------------------------
def make_positional_encoding(max_len, d_model):
    position = jnp.arange(max_len, dtype=jnp.float32)[:, None]
    div_term = jnp.exp(jnp.arange(0, d_model, 2, dtype=jnp.float32)
                       * (-math.log(10000.0) / d_model))
    pe = jnp.zeros((max_len, d_model), jnp.float32)
    pe = pe.at[:, 0::2].set(jnp.sin(position * div_term))
    pe = pe.at[:, 1::2].set(jnp.cos(position * div_term))
    return pe


def _build_packed(layers, wc, bc, num_feature, num_head, param_dtype=jnp.float32):
    """Host-side construction of the packed / block-diagonal kernel operands."""
    f = num_feature
    h = num_head
    hd = f // h
    g = 128 // f if (f < 128 and 128 % f == 0) else 1   # tokens packed per lane-row
    d = g * f

    eye_g = jnp.eye(g, dtype=jnp.float32)
    eye_h = jnp.eye(h, dtype=jnp.float32)
    eye_f = jnp.eye(f, dtype=jnp.float32)
    eye_hd = jnp.eye(hd, dtype=jnp.float32)

    # Constant 0/1 matrices (layer-invariant).  Sizes scale with (G*H*F)^2 —
    # appropriate for this module's small head-mixing attention.
    repq = jnp.kron(eye_g, jnp.kron(jnp.ones((1, h), jnp.float32), eye_f))       # [D, GHF]
    repk = jnp.kron(eye_g, jnp.kron(eye_h,
                                    jnp.kron(jnp.ones((1, h), jnp.float32), eye_hd)))
    pool = jnp.kron(jnp.eye(g * h * h, dtype=jnp.float32),
                    jnp.ones((hd, hd), jnp.float32))                              # [GHF, GHF]
    sumh = jnp.kron(eye_g, jnp.kron(jnp.ones((h, 1), jnp.float32), eye_f))        # [GHF, D]
    lnpool = jnp.kron(eye_g, jnp.ones((f, f), jnp.float32) / f)                   # [D, D]

    def pk(w):                      # per-token weight [F, Fo] -> block-diag [D, G*Fo]
        return jnp.kron(eye_g, w)

    def pb(bias):                   # per-token bias [1, Fo] -> [1, G*Fo]
        return jnp.tile(bias, (1, g))

    wqkv, bqkv, wfc2, bfc2, wfc, bfc = [], [], [], [], [], []
    g1, b1, g2, b2 = [], [], [], []
    for lp in layers:
        wqkv.append(jnp.concatenate([pk(lp['wq']), pk(lp['wk']), pk(lp['wv'])], axis=1))
        bqkv.append(jnp.concatenate([pb(lp['bq']), pb(lp['bk']), pb(lp['bv'])], axis=1))
        wfc2.append(jnp.kron(eye_g, jnp.kron(eye_h, lp['wfc2'])))   # per-head fc2
        bfc2.append(jnp.tile(lp['bfc2'], (1, g * h)))
        wfc.append(pk(lp['wfc']))
        bfc.append(pb(lp['bfc']))
        g1.append(jnp.ones((1, d), jnp.float32))
        b1.append(jnp.zeros((1, d), jnp.float32))
        g2.append(jnp.ones((1, d), jnp.float32))
        b2.append(jnp.zeros((1, d), jnp.float32))

    c = wc.shape[1]
    c_pad = _round_up(c, 128)               # lane-dense logits output (full vst)
    wc_p = jnp.zeros((d, c_pad), jnp.float32).at[:f, :c].set(wc)
    bc_p = jnp.zeros((1, c_pad), jnp.float32).at[:, :c].set(bc)

    # param_dtype=jnp.bfloat16 halves weight VMEM/HBM traffic on v6e/v7x; the
    # kernel casts to f32 at use and accumulates matmuls in f32.
    stack = lambda xs: jnp.stack(xs, 0).astype(param_dtype)
    return {
        'group': g, 'num_classes': c,
        'repq': repq, 'repk': repk, 'pool': pool, 'sumh': sumh, 'lnpool': lnpool,
        'wqkv': stack(wqkv), 'bqkv': stack(bqkv),
        'wfc2': stack(wfc2), 'bfc2': stack(bfc2),
        'g1': stack(g1), 'b1': stack(b1),
        'wfc': stack(wfc), 'bfc': stack(bfc),
        'g2': stack(g2), 'b2': stack(b2),
        'wc': wc_p, 'bc': bc_p,
    }


def init_params(key, vocab_size, n_layers, num_feature, num_head, num_classes,
                max_len=512, param_dtype=jnp.float32):
    assert num_feature % num_head == 0
    hd = num_feature // num_head

    def lin(kk, fin, fout):
        kw, kb = jax.random.split(kk)
        scale = 1.0 / math.sqrt(fin)
        w = jax.random.uniform(kw, (fin, fout), jnp.float32, -scale, scale)
        b = jax.random.uniform(kb, (1, fout), jnp.float32, -scale, scale)
        return w, b

    keys = jax.random.split(key, n_layers + 2)
    # TODO(synk): load_my_w2v reads a GoogleNews word2vec checkpoint from disk;
    # replaced by the module's own fallback init (randn * 0.25), deterministic.
    params = {
        'emb': jax.random.normal(keys[0], (vocab_size, num_feature), jnp.float32) * 0.25,
        'pe': make_positional_encoding(max_len, num_feature),
    }
    layers = []
    for n in range(n_layers):
        lk = jax.random.split(keys[1 + n], 5)
        wq, bq = lin(lk[0], num_feature, num_feature)
        wk, bk = lin(lk[1], num_feature, num_feature)
        wv, bv = lin(lk[2], num_feature, num_feature)
        wfc2, bfc2 = lin(lk[3], hd, hd)
        wfc, bfc = lin(lk[4], num_feature, num_feature)
        layers.append(dict(wq=wq, bq=bq, wk=wk, bk=bk, wv=wv, bv=bv,
                           wfc2=wfc2, bfc2=bfc2, wfc=wfc, bfc=bfc))
    wc, bc = lin(keys[-1], num_feature, num_classes)
    params['layers'] = layers           # raw weights (used by the JAX reference)
    params['wc'] = wc
    params['bc'] = bc
    params['packed'] = _build_packed(layers, wc, bc, num_feature, num_head, param_dtype)
    return params


# ----------------------------------------------------------------------------
# Full forward pass (embedding gather in plain JAX, hot path = one Pallas call)
# ----------------------------------------------------------------------------
def imdb_transformer_forward(params, texts, lengths, num_head, num_feature):
    del lengths                                   # unused by the reference forward
    b, s = texts.shape
    emb = jnp.take(params['emb'], texts, axis=0) + params['pe'][None, :s, :]
    # TODO(synk): nn.Dropout(p=0.1) in PositionalEncoding is identity in eval mode.
    return encoder_classifier(emb.astype(jnp.float32), params['packed'],
                              num_head, num_feature)


# ----------------------------------------------------------------------------
# Pure-JAX reference (mirrors the PyTorch module), used to validate the kernel.
# ----------------------------------------------------------------------------
def reference_forward(params, texts, num_head, num_feature):
    prec = jax.lax.Precision.HIGHEST
    hd = num_feature // num_head
    b, s = texts.shape
    x = jnp.take(params['emb'], texts, axis=0) + params['pe'][None, :s, :]

    def ln(v):
        mu = jnp.mean(v, -1, keepdims=True)
        var = jnp.mean((v - mu) ** 2, -1, keepdims=True)
        return (v - mu) * jax.lax.rsqrt(var + 1e-5)

    for lp in params['layers']:
        q = jnp.dot(x, lp['wq'], precision=prec) + lp['bq']
        k = jnp.dot(x, lp['wk'], precision=prec) + lp['bk']
        v = jnp.dot(x, lp['wv'], precision=prec) + lp['bv']
        q = q.reshape(b, s, num_head, hd)
        k = k.reshape(b, s, num_head, hd)
        v = v.reshape(b, s, num_head, hd)
        score = jnp.einsum('bshd,bsgd->bshg', q, k, precision=prec)
        w = jax.nn.softmax(score, axis=-1)
        att = jnp.einsum('bshg,bsgd->bshd', w, v, precision=prec)
        att = jnp.dot(att, lp['wfc2'], precision=prec) + lp['bfc2']
        att = att.reshape(b, s, num_feature)
        x1 = ln(att + x)
        y = jnp.dot(x1, lp['wfc'], precision=prec) + lp['bfc']
        x = ln(y + x1)
    cls = x[:, 0, :]
    return jnp.dot(cls, params['wc'], precision=prec) + params['bc']


if __name__ == "__main__":
    VOCAB, N, NUM_FEATURE, NUM_HEAD, NUM_CLASSES = 100, 2, 32, 4, 2
    B, S = 2, 8

    key = jax.random.PRNGKey(0)
    kp, kt = jax.random.split(key)
    params = init_params(kp, VOCAB, N, NUM_FEATURE, NUM_HEAD, NUM_CLASSES)

    texts = jax.random.randint(kt, (B, S), 0, VOCAB, dtype=jnp.int32)
    lengths = jnp.full((B,), S, dtype=jnp.int32)

    out = jax.block_until_ready(
        imdb_transformer_forward(params, texts, lengths, NUM_HEAD, NUM_FEATURE))
    assert out.shape == (B, NUM_CLASSES), out.shape

    ref = jax.block_until_ready(
        reference_forward(params, texts, NUM_HEAD, NUM_FEATURE))
    assert jnp.allclose(out, ref, atol=5e-2, rtol=5e-2), (out, ref)

    print("KERNEL_OK")
</pallas_src>

<mosaic_0001>
module attributes {stable_mosaic.version = 11 : i64} {
  func.func @encoder_classifier_kernel(%arg0: i32, %arg1: i32, %arg2: memref<1x2x128xf32, #tpu.memory_space<vmem>>, %arg3: memref<128x512xf32, #tpu.memory_space<vmem>>, %arg4: memref<128x512xf32, #tpu.memory_space<vmem>>, %arg5: memref<512x512xf32, #tpu.memory_space<vmem>>, %arg6: memref<512x128xf32, #tpu.memory_space<vmem>>, %arg7: memref<128x128xf32, #tpu.memory_space<vmem>>, %arg8: memref<2x128x384xf32, #tpu.memory_space<vmem>>, %arg9: memref<2x1x384xf32, #tpu.memory_space<vmem>>, %arg10: memref<2x128x128xf32, #tpu.memory_space<vmem>>, %arg11: memref<2x1x128xf32, #tpu.memory_space<vmem>>, %arg12: memref<2x1x128xf32, #tpu.memory_space<vmem>>, %arg13: memref<2x1x128xf32, #tpu.memory_space<vmem>>, %arg14: memref<2x128x128xf32, #tpu.memory_space<vmem>>, %arg15: memref<2x1x128xf32, #tpu.memory_space<vmem>>, %arg16: memref<2x1x128xf32, #tpu.memory_space<vmem>>, %arg17: memref<2x1x128xf32, #tpu.memory_space<vmem>>, %arg18: memref<128x128xf32, #tpu.memory_space<vmem>>, %arg19: memref<1x128xf32, #tpu.memory_space<vmem>>, %arg20: memref<1x1x128xf32, #tpu.memory_space<vmem>>) attributes {dimension_semantics = [#tpu.dimension_semantics<parallel>, #tpu.dimension_semantics<arbitrary>], iteration_bounds = array<i64: 2, 1>, scalar_prefetch = 0 : i64, scratch_operands = 0 : i64, tpu.core_type = #tpu.core_type<tc>, window_params = [{transform_indices = @transform_0, window_bounds = array<i64: 1, 2, 128>}, {pipeline_mode = #tpu.pipeline_mode<synchronous>, transform_indices = @transform_1, window_bounds = array<i64: 128, 512>}, {pipeline_mode = #tpu.pipeline_mode<synchronous>, transform_indices = @transform_2, window_bounds = array<i64: 128, 512>}, {pipeline_mode = #tpu.pipeline_mode<synchronous>, transform_indices = @transform_3, window_bounds = array<i64: 512, 512>}, {pipeline_mode = #tpu.pipeline_mode<synchronous>, transform_indices = @transform_4, window_bounds = array<i64: 512, 128>}, {pipeline_mode = #tpu.pipeline_mode<synchronous>, transform_indices = @transform_5, window_bounds = array<i64: 128, 128>}, {pipeline_mode = #tpu.pipeline_mode<synchronous>, transform_indices = @transform_6, window_bounds = array<i64: 2, 128, 384>}, {pipeline_mode = #tpu.pipeline_mode<synchronous>, transform_indices = @transform_7, window_bounds = array<i64: 2, 1, 384>}, {pipeline_mode = #tpu.pipeline_mode<synchronous>, transform_indices = @transform_8, window_bounds = array<i64: 2, 128, 128>}, {pipeline_mode = #tpu.pipeline_mode<synchronous>, transform_indices = @transform_9, window_bounds = array<i64: 2, 1, 128>}, {pipeline_mode = #tpu.pipeline_mode<synchronous>, transform_indices = @transform_10, window_bounds = array<i64: 2, 1, 128>}, {pipeline_mode = #tpu.pipeline_mode<synchronous>, transform_indices = @transform_11, window_bounds = array<i64: 2, 1, 128>}, {pipeline_mode = #tpu.pipeline_mode<synchronous>, transform_indices = @transform_12, window_bounds = array<i64: 2, 128, 128>}, {pipeline_mode = #tpu.pipeline_mode<synchronous>, transform_indices = @transform_13, window_bounds = array<i64: 2, 1, 128>}, {pipeline_mode = #tpu.pipeline_mode<synchronous>, transform_indices = @transform_14, window_bounds = array<i64: 2, 1, 128>}, {pipeline_mode = #tpu.pipeline_mode<synchronous>, transform_indices = @transform_15, window_bounds = array<i64: 2, 1, 128>}, {pipeline_mode = #tpu.pipeline_mode<synchronous>, transform_indices = @transform_16, window_bounds = array<i64: 128, 128>}, {pipeline_mode = #tpu.pipeline_mode<synchronous>, transform_indices = @transform_17, window_bounds = array<i64: 1, 128>}, {transform_indices = @transform_18, window_bounds = array<i64: 1, 1, 128>}]} {
    %c0 = arith.constant 0 : index
    %c0_0 = arith.constant 0 : index
    %c0_1 = arith.constant 0 : index
    %0 = vector.load %arg2[%c0, %c0_0, %c0_1] : memref<1x2x128xf32, #tpu.memory_space<vmem>>, vector<1x2x128xf32>
    %1 = vector.shape_cast %0 : vector<1x2x128xf32> to vector<2x128xf32>
    %c0_2 = arith.constant 0 : index
    %c0_3 = arith.constant 0 : index
    %2 = vector.load %arg3[%c0_2, %c0_3] : memref<128x512xf32, #tpu.memory_space<vmem>>, vector<128x512xf32>
    %c0_4 = arith.constant 0 : index
    %c0_5 = arith.constant 0 : index
    %3 = vector.load %arg4[%c0_4, %c0_5] : memref<128x512xf32, #tpu.memory_space<vmem>>, vector<128x512xf32>
    %c0_6 = arith.constant 0 : index
    %c0_7 = arith.constant 0 : index
    %4 = vector.load %arg5[%c0_6, %c0_7] : memref<512x512xf32, #tpu.memory_space<vmem>>, vector<512x512xf32>
    %c0_8 = arith.constant 0 : index
    %c0_9 = arith.constant 0 : index
    %5 = vector.load %arg6[%c0_8, %c0_9] : memref<512x128xf32, #tpu.memory_space<vmem>>, vector<512x128xf32>
    %c0_10 = arith.constant 0 : index
    %c0_11 = arith.constant 0 : index
    %6 = vector.load %arg7[%c0_10, %c0_11] : memref<128x128xf32, #tpu.memory_space<vmem>>, vector<128x128xf32>
    %c0_12 = arith.constant 0 : index
    %c0_13 = arith.constant 0 : index
    %c0_14 = arith.constant 0 : index
    %7 = vector.load %arg8[%c0_12, %c0_13, %c0_14] : memref<2x128x384xf32, #tpu.memory_space<vmem>>, vector<1x128x384xf32>
    %8 = vector.shape_cast %7 : vector<1x128x384xf32> to vector<128x384xf32>
    %cst = arith.constant dense<0.000000e+00> : vector<2x384xf32>
    %9 = tpu.matmul %1, %8, %cst {dimension_numbers = #tpu.dot_dimension_numbers<[1], [0], [0], [1], [0, 0, 1, 1], [], []>} : vector<2x128xf32>, vector<128x384xf32>, vector<2x384xf32> -> vector<2x384xf32>
    %c0_15 = arith.constant 0 : index
    %c0_16 = arith.constant 0 : index
    %c0_17 = arith.constant 0 : index
    %10 = vector.load %arg9[%c0_15, %c0_16, %c0_17] : memref<2x1x384xf32, #tpu.memory_space<vmem>>, vector<1x1x384xf32>
    %11 = vector.shape_cast %10 : vector<1x1x384xf32> to vector<1x384xf32>
    %12 = vector.broadcast %11 : vector<1x384xf32> to vector<2x384xf32>
    %13 = arith.addf %9, %12 : vector<2x384xf32>
    %14 = vector.extract_strided_slice %13 {offsets = [0, 0], sizes = [2, 128], strides = [1, 1]} : vector<2x384xf32> to vector<2x128xf32>
    %15 = vector.extract_strided_slice %13 {offsets = [0, 128], sizes = [2, 128], strides = [1, 1]} : vector<2x384xf32> to vector<2x128xf32>
    %16 = vector.extract_strided_slice %13 {offsets = [0, 256], sizes = [2, 128], strides = [1, 1]} : vector<2x384xf32> to vector<2x128xf32>
    %cst_18 = arith.constant dense<0.000000e+00> : vector<2x512xf32>
    %17 = tpu.matmul %14, %2, %cst_18 {dimension_numbers = #tpu.dot_dimension_numbers<[1], [0], [0], [1], [0, 0, 1, 1], [], []>} : vector<2x128xf32>, vector<128x512xf32>, vector<2x512xf32> -> vector<2x512xf32>
    %cst_19 = arith.constant dense<0.000000e+00> : vector<2x512xf32>
    %18 = tpu.matmul %15, %3, %cst_19 {dimension_numbers = #tpu.dot_dimension_numbers<[1], [0], [0], [1], [0, 0, 1, 1], [], []>} : vector<2x128xf32>, vector<128x512xf32>, vector<2x512xf32> -> vector<2x512xf32>
    %cst_20 = arith.constant dense<0.000000e+00> : vector<2x512xf32>
    %19 = tpu.matmul %16, %3, %cst_20 {dimension_numbers = #tpu.dot_dimension_numbers<[1], [0], [0], [1], [0, 0, 1, 1], [], []>} : vector<2x128xf32>, vector<128x512xf32>, vector<2x512xf32> -> vector<2x512xf32>
    %20 = arith.mulf %17, %18 : vector<2x512xf32>
    %cst_21 = arith.constant dense<0.000000e+00> : vector<2x512xf32>
    %21 = tpu.matmul %20, %4, %cst_21 {dimension_numbers = #tpu.dot_dimension_numbers<[1], [0], [0], [1], [0, 0, 1, 1], [], []>} : vector<2x512xf32>, vector<512x512xf32>, vector<2x512xf32> -> vector<2x512xf32>
    %cst_22 = arith.constant dense<0xFF800000> : vector<2xf32>
    %22 = vector.multi_reduction <maximumf>, %21, %cst_22 [1] : vector<2x512xf32> to vector<2xf32>
    %23 = vector.shape_cast %22 : vector<2xf32> to vector<2x1xf32>
    %24 = vector.broadcast %23 : vector<2x1xf32> to vector<2x512xf32>
    %25 = arith.subf %21, %24 : vector<2x512xf32>
    %26 = math.exp %25 : vector<2x512xf32>
    %cst_23 = arith.constant dense<0.000000e+00> : vector<2x128xf32>
    %27 = tpu.matmul %26, %5, %cst_23 {dimension_numbers = #tpu.dot_dimension_numbers<[1], [0], [0], [1], [0, 0, 1, 1], [], []>} : vector<2x512xf32>, vector<512x128xf32>, vector<2x128xf32> -> vector<2x128xf32>
    %28 = arith.mulf %26, %19 : vector<2x512xf32>
    %cst_24 = arith.constant dense<0.000000e+00> : vector<2x128xf32>
    %29 = tpu.matmul %28, %5, %cst_24 {dimension_numbers = #tpu.dot_dimension_numbers<[1], [0], [0], [1], [0, 0, 1, 1], [], []>} : vector<2x512xf32>, vector<512x128xf32>, vector<2x128xf32> -> vector<2x128xf32>
    %30 = tpu.reciprocal %27 {approx = true} : vector<2x128xf32> -> vector<2x128xf32>
    %31 = arith.mulf %29, %30 : vector<2x128xf32>
    %c0_25 = arith.constant 0 : index
    %c0_26 = arith.constant 0 : index
    %c0_27 = arith.constant 0 : index
    %32 = vector.load %arg10[%c0_25, %c0_26, %c0_27] : memref<2x128x128xf32, #tpu.memory_space<vmem>>, vector<1x128x128xf32>
    %33 = vector.shape_cast %32 : vector<1x128x128xf32> to vector<128x128xf32>
    %cst_28 = arith.constant dense<0.000000e+00> : vector<2x128xf32>
    %34 = tpu.matmul %31, %33, %cst_28 {dimension_numbers = #tpu.dot_dimension_numbers<[1], [0], [0], [1], [0, 0, 1, 1], [], []>} : vector<2x128xf32>, vector<128x128xf32>, vector<2x128xf32> -> vector<2x128xf32>
    %c0_29 = arith.constant 0 : index
    %c0_30 = arith.constant 0 : index
    %c0_31 = arith.constant 0 : index
    %35 = vector.load %arg11[%c0_29, %c0_30, %c0_31] : memref<2x1x128xf32, #tpu.memory_space<vmem>>, vector<1x1x128xf32>
    %36 = vector.shape_cast %35 : vector<1x1x128xf32> to vector<1x128xf32>
    %37 = vector.broadcast %36 : vector<1x128xf32> to vector<2x128xf32>
    %38 = arith.addf %34, %37 : vector<2x128xf32>
    %39 = arith.addf %38, %1 : vector<2x128xf32>
    %c0_32 = arith.constant 0 : index
    %c0_33 = arith.constant 0 : index
    %c0_34 = arith.constant 0 : index
    %40 = vector.load %arg12[%c0_32, %c0_33, %c0_34] : memref<2x1x128xf32, #tpu.memory_space<vmem>>, vector<1x1x128xf32>
    %41 = vector.shape_cast %40 : vector<1x1x128xf32> to vector<1x128xf32>
    %c0_35 = arith.constant 0 : index
    %c0_36 = arith.constant 0 : index
    %c0_37 = arith.constant 0 : index
    %42 = vector.load %arg13[%c0_35, %c0_36, %c0_37] : memref<2x1x128xf32, #tpu.memory_space<vmem>>, vector<1x1x128xf32>
    %43 = vector.shape_cast %42 : vector<1x1x128xf32> to vector<1x128xf32>
    %cst_38 = arith.constant dense<0.000000e+00> : vector<2x128xf32>
    %44 = tpu.matmul %39, %6, %cst_38 {dimension_numbers = #tpu.dot_dimension_numbers<[1], [0], [0], [1], [0, 0, 1, 1], [], []>} : vector<2x128xf32>, vector<128x128xf32>, vector<2x128xf32> -> vector<2x128xf32>
    %45 = arith.mulf %39, %39 : vector<2x128xf32>
    %cst_39 = arith.constant dense<0.000000e+00> : vector<2x128xf32>
    %46 = tpu.matmul %45, %6, %cst_39 {dimension_numbers = #tpu.dot_dimension_numbers<[1], [0], [0], [1], [0, 0, 1, 1], [], []>} : vector<2x128xf32>, vector<128x128xf32>, vector<2x128xf32> -> vector<2x128xf32>
    %47 = arith.mulf %44, %44 : vector<2x128xf32>
    %48 = arith.subf %46, %47 : vector<2x128xf32>
    %49 = arith.subf %39, %44 : vector<2x128xf32>
    %cst_40 = arith.constant 9.99999974E-6 : f32
    %50 = vector.broadcast %cst_40 : f32 to vector<2x128xf32>
    %51 = arith.addf %48, %50 : vector<2x128xf32>
    %52 = math.rsqrt %51 : vector<2x128xf32>
    %53 = arith.mulf %49, %52 : vector<2x128xf32>
    %54 = vector.broadcast %41 : vector<1x128xf32> to vector<2x128xf32>
    %55 = arith.mulf %53, %54 : vector<2x128xf32>
    %56 = vector.broadcast %43 : vector<1x128xf32> to vector<2x128xf32>
    %57 = arith.addf %55, %56 : vector<2x128xf32>
    %c0_41 = arith.constant 0 : index
    %c0_42 = arith.constant 0 : index
    %c0_43 = arith.constant 0 : index
    %58 = vector.load %arg14[%c0_41, %c0_42, %c0_43] : memref<2x128x128xf32, #tpu.memory_space<vmem>>, vector<1x128x128xf32>
    %59 = vector.shape_cast %58 : vector<1x128x128xf32> to vector<128x128xf32>
    %cst_44 = arith.constant dense<0.000000e+00> : vector<2x128xf32>
    %60 = tpu.matmul %57, %59, %cst_44 {dimension_numbers = #tpu.dot_dimension_numbers<[1], [0], [0], [1], [0, 0, 1, 1], [], []>} : vector<2x128xf32>, vector<128x128xf32>, vector<2x128xf32> -> vector<2x128xf32>
    %c0_45 = arith.constant 0 : index
    %c0_46 = arith.constant 0 : index
    %c0_47 = arith.constant 0 : index
    %61 = vector.load %arg15[%c0_45, %c0_46, %c0_47] : memref<2x1x128xf32, #tpu.memory_space<vmem>>, vector<1x1x128xf32>
    %62 = vector.shape_cast %61 : vector<1x1x128xf32> to vector<1x128xf32>
    %63 = vector.broadcast %62 : vector<1x128xf32> to vector<2x128xf32>
    %64 = arith.addf %60, %63 : vector<2x128xf32>
    %65 = arith.addf %64, %57 : vector<2x128xf32>
    %c0_48 = arith.constant 0 : index
    %c0_49 = arith.constant 0 : index
    %c0_50 = arith.constant 0 : index
    %66 = vector.load %arg16[%c0_48, %c0_49, %c0_50] : memref<2x1x128xf32, #tpu.memory_space<vmem>>, vector<1x1x128xf32>
    %67 = vector.shape_cast %66 : vector<1x1x128xf32> to vector<1x128xf32>
    %c0_51 = arith.constant 0 : index
    %c0_52 = arith.constant 0 : index
    %c0_53 = arith.constant 0 : index
    %68 = vector.load %arg17[%c0_51, %c0_52, %c0_53] : memref<2x1x128xf32, #tpu.memory_space<vmem>>, vector<1x1x128xf32>
    %69 = vector.shape_cast %68 : vector<1x1x128xf32> to vector<1x128xf32>
    %cst_54 = arith.constant dense<0.000000e+00> : vector<2x128xf32>
    %70 = tpu.matmul %65, %6, %cst_54 {dimension_numbers = #tpu.dot_dimension_numbers<[1], [0], [0], [1], [0, 0, 1, 1], [], []>} : vector<2x128xf32>, vector<128x128xf32>, vector<2x128xf32> -> vector<2x128xf32>
    %71 = arith.mulf %65, %65 : vector<2x128xf32>
    %cst_55 = arith.constant dense<0.000000e+00> : vector<2x128xf32>
    %72 = tpu.matmul %71, %6, %cst_55 {dimension_numbers = #tpu.dot_dimension_numbers<[1], [0], [0], [1], [0, 0, 1, 1], [], []>} : vector<2x128xf32>, vector<128x128xf32>, vector<2x128xf32> -> vector<2x128xf32>
    %73 = arith.mulf %70, %70 : vector<2x128xf32>
    %74 = arith.subf %72, %73 : vector<2x128xf32>
    %75 = arith.subf %65, %70 : vector<2x128xf32>
    %cst_56 = arith.constant 9.99999974E-6 : f32
    %76 = vector.broadcast %cst_56 : f32 to vector<2x128xf32>
    %77 = arith.addf %74, %76 : vector<2x128xf32>
    %78 = math.rsqrt %77 : vector<2x128xf32>
    %79 = arith.mulf %75, %78 : vector<2x128xf32>
    %80 = vector.broadcast %67 : vector<1x128xf32> to vector<2x128xf32>
    %81 = arith.mulf %79, %80 : vector<2x128xf32>
    %82 = vector.broadcast %69 : vector<1x128xf32> to vector<2x128xf32>
    %83 = arith.addf %81, %82 : vector<2x128xf32>
    %c1 = arith.constant 1 : index
    %c0_57 = arith.constant 0 : index
    %c0_58 = arith.constant 0 : index
    %84 = vector.load %arg8[%c1, %c0_57, %c0_58] : memref<2x128x384xf32, #tpu.memory_space<vmem>>, vector<1x128x384xf32>
    %85 = vector.shape_cast %84 : vector<1x128x384xf32> to vector<128x384xf32>
    %cst_59 = arith.constant dense<0.000000e+00> : vector<2x384xf32>
    %86 = tpu.matmul %83, %85, %cst_59 {dimension_numbers = #tpu.dot_dimension_numbers<[1], [0], [0], [1], [0, 0, 1, 1], [], []>} : vector<2x128xf32>, vector<128x384xf32>, vector<2x384xf32> -> vector<2x384xf32>
    %c1_60 = arith.constant 1 : index
    %c0_61 = arith.constant 0 : index
    %c0_62 = arith.constant 0 : index
    %87 = vector.load %arg9[%c1_60, %c0_61, %c0_62] : memref<2x1x384xf32, #tpu.memory_space<vmem>>, vector<1x1x384xf32>
    %88 = vector.shape_cast %87 : vector<1x1x384xf32> to vector<1x384xf32>
    %89 = vector.broadcast %88 : vector<1x384xf32> to vector<2x384xf32>
    %90 = arith.addf %86, %89 : vector<2x384xf32>
    %91 = vector.extract_strided_slice %90 {offsets = [0, 0], sizes = [2, 128], strides = [1, 1]} : vector<2x384xf32> to vector<2x128xf32>
    %92 = vector.extract_strided_slice %90 {offsets = [0, 128], sizes = [2, 128], strides = [1, 1]} : vector<2x384xf32> to vector<2x128xf32>
    %93 = vector.extract_strided_slice %90 {offsets = [0, 256], sizes = [2, 128], strides = [1, 1]} : vector<2x384xf32> to vector<2x128xf32>
    %cst_63 = arith.constant dense<0.000000e+00> : vector<2x512xf32>
    %94 = tpu.matmul %91, %2, %cst_63 {dimension_numbers = #tpu.dot_dimension_numbers<[1], [0], [0], [1], [0, 0, 1, 1], [], []>} : vector<2x128xf32>, vector<128x512xf32>, vector<2x512xf32> -> vector<2x512xf32>
    %cst_64 = arith.constant dense<0.000000e+00> : vector<2x512xf32>
    %95 = tpu.matmul %92, %3, %cst_64 {dimension_numbers = #tpu.dot_dimension_numbers<[1], [0], [0], [1], [0, 0, 1, 1], [], []>} : vector<2x128xf32>, vector<128x512xf32>, vector<2x512xf32> -> vector<2x512xf32>
    %cst_65 = arith.constant dense<0.000000e+00> : vector<2x512xf32>
    %96 = tpu.matmul %93, %3, %cst_65 {dimension_numbers = #tpu.dot_dimension_numbers<[1], [0], [0], [1], [0, 0, 1, 1], [], []>} : vector<2x128xf32>, vector<128x512xf32>, vector<2x512xf32> -> vector<2x512xf32>
    %97 = arith.mulf %94, %95 : vector<2x512xf32>
    %cst_66 = arith.constant dense<0.000000e+00> : vector<2x512xf32>
    %98 = tpu.matmul %97, %4, %cst_66 {dimension_numbers = #tpu.dot_dimension_numbers<[1], [0], [0], [1], [0, 0, 1, 1], [], []>} : vector<2x512xf32>, vector<512x512xf32>, vector<2x512xf32> -> vector<2x512xf32>
    %cst_67 = arith.constant dense<0xFF800000> : vector<2xf32>
    %99 = vector.multi_reduction <maximumf>, %98, %cst_67 [1] : vector<2x512xf32> to vector<2xf32>
    %100 = vector.shape_cast %99 : vector<2xf32> to vector<2x1xf32>
    %101 = vector.broadcast %100 : vector<2x1xf32> to vector<2x512xf32>
    %102 = arith.subf %98, %101 : vector<2x512xf32>
    %103 = math.exp %102 : vector<2x512xf32>
    %cst_68 = arith.constant dense<0.000000e+00> : vector<2x128xf32>
    %104 = tpu.matmul %103, %5, %cst_68 {dimension_numbers = #tpu.dot_dimension_numbers<[1], [0], [0], [1], [0, 0, 1, 1], [], []>} : vector<2x512xf32>, vector<512x128xf32>, vector<2x128xf32> -> vector<2x128xf32>
    %105 = arith.mulf %103, %96 : vector<2x512xf32>
    %cst_69 = arith.constant dense<0.000000e+00> : vector<2x128xf32>
    %106 = tpu.matmul %105, %5, %cst_69 {dimension_numbers = #tpu.dot_dimension_numbers<[1], [0], [0], [1], [0, 0, 1, 1], [], []>} : vector<2x512xf32>, vector<512x128xf32>, vector<2x128xf32> -> vector<2x128xf32>
    %107 = tpu.reciprocal %104 {approx = true} : vector<2x128xf32> -> vector<2x128xf32>
    %108 = arith.mulf %106, %107 : vector<2x128xf32>
    %c1_70 = arith.constant 1 : index
    %c0_71 = arith.constant 0 : index
    %c0_72 = arith.constant 0 : index
    %109 = vector.load %arg10[%c1_70, %c0_71, %c0_72] : memref<2x128x128xf32, #tpu.memory_space<vmem>>, vector<1x128x128xf32>
    %110 = vector.shape_cast %109 : vector<1x128x128xf32> to vector<128x128xf32>
    %cst_73 = arith.constant dense<0.000000e+00> : vector<2x128xf32>
    %111 = tpu.matmul %108, %110, %cst_73 {dimension_numbers = #tpu.dot_dimension_numbers<[1], [0], [0], [1], [0, 0, 1, 1], [], []>} : vector<2x128xf32>, vector<128x128xf32>, vector<2x128xf32> -> vector<2x128xf32>
    %c1_74 = arith.constant 1 : index
    %c0_75 = arith.constant 0 : index
    %c0_76 = arith.constant 0 : index
    %112 = vector.load %arg11[%c1_74, %c0_75, %c0_76] : memref<2x1x128xf32, #tpu.memory_space<vmem>>, vector<1x1x128xf32>
    %113 = vector.shape_cast %112 : vector<1x1x128xf32> to vector<1x128xf32>
    %114 = vector.broadcast %113 : vector<1x128xf32> to vector<2x128xf32>
    %115 = arith.addf %111, %114 : vector<2x128xf32>
    %116 = arith.addf %115, %83 : vector<2x128xf32>
    %c1_77 = arith.constant 1 : index
    %c0_78 = arith.constant 0 : index
    %c0_79 = arith.constant 0 : index
    %117 = vector.load %arg12[%c1_77, %c0_78, %c0_79] : memref<2x1x128xf32, #tpu.memory_space<vmem>>, vector<1x1x128xf32>
    %118 = vector.shape_cast %117 : vector<1x1x128xf32> to vector<1x128xf32>
    %c1_80 = arith.constant 1 : index
    %c0_81 = arith.constant 0 : index
    %c0_82 = arith.constant 0 : index
    %119 = vector.load %arg13[%c1_80, %c0_81, %c0_82] : memref<2x1x128xf32, #tpu.memory_space<vmem>>, vector<1x1x128xf32>
    %120 = vector.shape_cast %119 : vector<1x1x128xf32> to vector<1x128xf32>
    %cst_83 = arith.constant dense<0.000000e+00> : vector<2x128xf32>
    %121 = tpu.matmul %116, %6, %cst_83 {dimension_numbers = #tpu.dot_dimension_numbers<[1], [0], [0], [1], [0, 0, 1, 1], [], []>} : vector<2x128xf32>, vector<128x128xf32>, vector<2x128xf32> -> vector<2x128xf32>
    %122 = arith.mulf %116, %116 : vector<2x128xf32>
    %cst_84 = arith.constant dense<0.000000e+00> : vector<2x128xf32>
    %123 = tpu.matmul %122, %6, %cst_84 {dimension_numbers = #tpu.dot_dimension_numbers<[1], [0], [0], [1], [0, 0, 1, 1], [], []>} : vector<2x128xf32>, vector<128x128xf32>, vector<2x128xf32> -> vector<2x128xf32>
    %124 = arith.mulf %121, %121 : vector<2x128xf32>
    %125 = arith.subf %123, %124 : vector<2x128xf32>
    %126 = arith.subf %116, %121 : vector<2x128xf32>
    %cst_85 = arith.constant 9.99999974E-6 : f32
    %127 = vector.broadcast %cst_85 : f32 to vector<2x128xf32>
    %128 = arith.addf %125, %127 : vector<2x128xf32>
    %129 = math.rsqrt %128 : vector<2x128xf32>
    %130 = arith.mulf %126, %129 : vector<2x128xf32>
    %131 = vector.broadcast %118 : vector<1x128xf32> to vector<2x128xf32>
    %132 = arith.mulf %130, %131 : vector<2x128xf32>
    %133 = vector.broadcast %120 : vector<1x128xf32> to vector<2x128xf32>
    %134 = arith.addf %132, %133 : vector<2x128xf32>
    %c1_86 = arith.constant 1 : index
    %c0_87 = arith.constant 0 : index
    %c0_88 = arith.constant 0 : index
    %135 = vector.load %arg14[%c1_86, %c0_87, %c0_88] : memref<2x128x128xf32, #tpu.memory_space<vmem>>, vector<1x128x128xf32>
    %136 = vector.shape_cast %135 : vector<1x128x128xf32> to vector<128x128xf32>
    %cst_89 = arith.constant dense<0.000000e+00> : vector<2x128xf32>
    %137 = tpu.matmul %134, %136, %cst_89 {dimension_numbers = #tpu.dot_dimension_numbers<[1], [0], [0], [1], [0, 0, 1, 1], [], []>} : vector<2x128xf32>, vector<128x128xf32>, vector<2x128xf32> -> vector<2x128xf32>
    %c1_90 = arith.constant 1 : index
    %c0_91 = arith.constant 0 : index
    %c0_92 = arith.constant 0 : index
    %138 = vector.load %arg15[%c1_90, %c0_91, %c0_92] : memref<2x1x128xf32, #tpu.memory_space<vmem>>, vector<1x1x128xf32>
    %139 = vector.shape_cast %138 : vector<1x1x128xf32> to vector<1x128xf32>
    %140 = vector.broadcast %139 : vector<1x128xf32> to vector<2x128xf32>
    %141 = arith.addf %137, %140 : vector<2x128xf32>
    %142 = arith.addf %141, %134 : vector<2x128xf32>
    %c1_93 = arith.constant 1 : index
    %c0_94 = arith.constant 0 : index
    %c0_95 = arith.constant 0 : index
    %143 = vector.load %arg16[%c1_93, %c0_94, %c0_95] : memref<2x1x128xf32, #tpu.memory_space<vmem>>, vector<1x1x128xf32>
    %144 = vector.shape_cast %143 : vector<1x1x128xf32> to vector<1x128xf32>
    %c1_96 = arith.constant 1 : index
    %c0_97 = arith.constant 0 : index
    %c0_98 = arith.constant 0 : index
    %145 = vector.load %arg17[%c1_96, %c0_97, %c0_98] : memref<2x1x128xf32, #tpu.memory_space<vmem>>, vector<1x1x128xf32>
    %146 = vector.shape_cast %145 : vector<1x1x128xf32> to vector<1x128xf32>
    %cst_99 = arith.constant dense<0.000000e+00> : vector<2x128xf32>
    %147 = tpu.matmul %142, %6, %cst_99 {dimension_numbers = #tpu.dot_dimension_numbers<[1], [0], [0], [1], [0, 0, 1, 1], [], []>} : vector<2x128xf32>, vector<128x128xf32>, vector<2x128xf32> -> vector<2x128xf32>
    %148 = arith.mulf %142, %142 : vector<2x128xf32>
    %cst_100 = arith.constant dense<0.000000e+00> : vector<2x128xf32>
    %149 = tpu.matmul %148, %6, %cst_100 {dimension_numbers = #tpu.dot_dimension_numbers<[1], [0], [0], [1], [0, 0, 1, 1], [], []>} : vector<2x128xf32>, vector<128x128xf32>, vector<2x128xf32> -> vector<2x128xf32>
    %150 = arith.mulf %147, %147 : vector<2x128xf32>
    %151 = arith.subf %149, %150 : vector<2x128xf32>
    %152 = arith.subf %142, %147 : vector<2x128xf32>
    %cst_101 = arith.constant 9.99999974E-6 : f32
    %153 = vector.broadcast %cst_101 : f32 to vector<2x128xf32>
    %154 = arith.addf %151, %153 : vector<2x128xf32>
    %155 = math.rsqrt %154 : vector<2x128xf32>
    %156 = arith.mulf %152, %155 : vector<2x128xf32>
    %157 = vector.broadcast %144 : vector<1x128xf32> to vector<2x128xf32>
    %158 = arith.mulf %156, %157 : vector<2x128xf32>
    %159 = vector.broadcast %146 : vector<1x128xf32> to vector<2x128xf32>
    %160 = arith.addf %158, %159 : vector<2x128xf32>
    %c0_i32 = arith.constant 0 : i32
    %161 = arith.cmpi eq, %arg1, %c0_i32 : i32
    %162 = arith.extui %161 : i1 to i32
    %c0_i32_102 = arith.constant 0 : i32
    %163 = arith.cmpi ne, %162, %c0_i32_102 : i32
    scf.if %163 {
      %c0_103 = arith.constant 0 : index
      %c0_104 = arith.constant 0 : index
      %164 = vector.load %arg18[%c0_103, %c0_104] : memref<128x128xf32, #tpu.memory_space<vmem>>, vector<128x128xf32>
      %cst_105 = arith.constant dense<0.000000e+00> : vector<2x128xf32>
      %165 = tpu.matmul %160, %164, %cst_105 {dimension_numbers = #tpu.dot_dimension_numbers<[1], [0], [0], [1], [0, 0, 1, 1], [], []>} : vector<2x128xf32>, vector<128x128xf32>, vector<2x128xf32> -> vector<2x128xf32>
      %c0_106 = arith.constant 0 : index
      %c0_107 = arith.constant 0 : index
      %166 = vector.load %arg19[%c0_106, %c0_107] : memref<1x128xf32, #tpu.memory_space<vmem>>, vector<1x128xf32>
      %167 = vector.broadcast %166 : vector<1x128xf32> to vector<2x128xf32>
      %168 = arith.addf %165, %167 : vector<2x128xf32>
      %169 = vector.extract_strided_slice %168 {offsets = [0, 0], sizes = [1, 128], strides = [1, 1]} : vector<2x128xf32> to vector<1x128xf32>
      %c0_108 = arith.constant 0 : index
      %c0_109 = arith.constant 0 : index
      %c0_110 = arith.constant 0 : index
      %170 = vector.load %arg20[%c0_108, %c0_109, %c0_110] : memref<1x1x128xf32, #tpu.memory_space<vmem>>, vector<1x1x128xf32>
      %171 = vector.shape_cast %170 : vector<1x1x128xf32> to vector<1x128xf32>
      %172 = vector.shape_cast %169 : vector<1x128xf32> to vector<1x1x128xf32>
      tpu.vector_store %arg20[%c0_108, %c0_109, %c0_110], %172 {strides = array<i32>} : memref<1x1x128xf32, #tpu.memory_space<vmem>>, vector<1x1x128xf32>,
    } else {
    }
    return
  }
  func.func @transform_0(%arg0: i32, %arg1: i32) -> (i32, i32, i32) {
    %c0_i32 = arith.constant 0 : i32
    %c0_i32_0 = arith.constant 0 : i32
    return %arg0, %arg1, %c0_i32 : i32, i32, i32
  }
  func.func @transform_1(%arg0: i32, %arg1: i32) -> (i32, i32) {
    %c0_i32 = arith.constant 0 : i32
    %c0_i32_0 = arith.constant 0 : i32
    %c0_i32_1 = arith.constant 0 : i32
    return %c0_i32, %c0_i32_0 : i32, i32
  }
  func.func @transform_2(%arg0: i32, %arg1: i32) -> (i32, i32) {
    %c0_i32 = arith.constant 0 : i32
    %c0_i32_0 = arith.constant 0 : i32
    %c0_i32_1 = arith.constant 0 : i32
    return %c0_i32, %c0_i32_0 : i32, i32
  }
  func.func @transform_3(%arg0: i32, %arg1: i32) -> (i32, i32) {
    %c0_i32 = arith.constant 0 : i32
    %c0_i32_0 = arith.constant 0 : i32
    %c0_i32_1 = arith.constant 0 : i32
    return %c0_i32, %c0_i32_0 : i32, i32
  }
  func.func @transform_4(%arg0: i32, %arg1: i32) -> (i32, i32) {
    %c0_i32 = arith.constant 0 : i32
    %c0_i32_0 = arith.constant 0 : i32
    %c0_i32_1 = arith.constant 0 : i32
    return %c0_i32, %c0_i32_0 : i32, i32
  }
  func.func @transform_5(%arg0: i32, %arg1: i32) -> (i32, i32) {
    %c0_i32 = arith.constant 0 : i32
    %c0_i32_0 = arith.constant 0 : i32
    %c0_i32_1 = arith.constant 0 : i32
    return %c0_i32, %c0_i32_0 : i32, i32
  }
  func.func @transform_6(%arg0: i32, %arg1: i32) -> (i32, i32, i32) {
    %c0_i32 = arith.constant 0 : i32
    %c0_i32_0 = arith.constant 0 : i32
    %c0_i32_1 = arith.constant 0 : i32
    %c0_i32_2 = arith.constant 0 : i32
    return %c0_i32, %c0_i32_0, %c0_i32_1 : i32, i32, i32
  }
  func.func @transform_7(%arg0: i32, %arg1: i32) -> (i32, i32, i32) {
    %c0_i32 = arith.constant 0 : i32
    %c0_i32_0 = arith.constant 0 : i32
    %c0_i32_1 = arith.constant 0 : i32
    %c0_i32_2 = arith.constant 0 : i32
    return %c0_i32, %c0_i32_0, %c0_i32_1 : i32, i32, i32
  }
  func.func @transform_8(%arg0: i32, %arg1: i32) -> (i32, i32, i32) {
    %c0_i32 = arith.constant 0 : i32
    %c0_i32_0 = arith.constant 0 : i32
    %c0_i32_1 = arith.constant 0 : i32
    %c0_i32_2 = arith.constant 0 : i32
    return %c0_i32, %c0_i32_0, %c0_i32_1 : i32, i32, i32
  }
  func.func @transform_9(%arg0: i32, %arg1: i32) -> (i32, i32, i32) {
    %c0_i32 = arith.constant 0 : i32
    %c0_i32_0 = arith.constant 0 : i32
    %c0_i32_1 = arith.constant 0 : i32
    %c0_i32_2 = arith.constant 0 : i32
    return %c0_i32, %c0_i32_0, %c0_i32_1 : i32, i32, i32
  }
  func.func @transform_10(%arg0: i32, %arg1: i32) -> (i32, i32, i32) {
    %c0_i32 = arith.constant 0 : i32
    %c0_i32_0 = arith.constant 0 : i32
    %c0_i32_1 = arith.constant 0 : i32
    %c0_i32_2 = arith.constant 0 : i32
    return %c0_i32, %c0_i32_0, %c0_i32_1 : i32, i32, i32
  }
  func.func @transform_11(%arg0: i32, %arg1: i32) -> (i32, i32, i32) {
    %c0_i32 = arith.constant 0 : i32
    %c0_i32_0 = arith.constant 0 : i32
    %c0_i32_1 = arith.constant 0 : i32
    %c0_i32_2 = arith.constant 0 : i32
    return %c0_i32, %c0_i32_0, %c0_i32_1 : i32, i32, i32
  }
  func.func @transform_12(%arg0: i32, %arg1: i32) -> (i32, i32, i32) {
    %c0_i32 = arith.constant 0 : i32
    %c0_i32_0 = arith.constant 0 : i32
    %c0_i32_1 = arith.constant 0 : i32
    %c0_i32_2 = arith.constant 0 : i32
    return %c0_i32, %c0_i32_0, %c0_i32_1 : i32, i32, i32
  }
  func.func @transform_13(%arg0: i32, %arg1: i32) -> (i32, i32, i32) {
    %c0_i32 = arith.constant 0 : i32
    %c0_i32_0 = arith.constant 0 : i32
    %c0_i32_1 = arith.constant 0 : i32
    %c0_i32_2 = arith.constant 0 : i32
    return %c0_i32, %c0_i32_0, %c0_i32_1 : i32, i32, i32
  }
  func.func @transform_14(%arg0: i32, %arg1: i32) -> (i32, i32, i32) {
    %c0_i32 = arith.constant 0 : i32
    %c0_i32_0 = arith.constant 0 : i32
    %c0_i32_1 = arith.constant 0 : i32
    %c0_i32_2 = arith.constant 0 : i32
    return %c0_i32, %c0_i32_0, %c0_i32_1 : i32, i32, i32
  }
  func.func @transform_15(%arg0: i32, %arg1: i32) -> (i32, i32, i32) {
    %c0_i32 = arith.constant 0 : i32
    %c0_i32_0 = arith.constant 0 : i32
    %c0_i32_1 = arith.constant 0 : i32
    %c0_i32_2 = arith.constant 0 : i32
    return %c0_i32, %c0_i32_0, %c0_i32_1 : i32, i32, i32
  }
  func.func @transform_16(%arg0: i32, %arg1: i32) -> (i32, i32) {
    %c0_i32 = arith.constant 0 : i32
    %c0_i32_0 = arith.constant 0 : i32
    %c0_i32_1 = arith.constant 0 : i32
    return %c0_i32, %c0_i32_0 : i32, i32
  }
  func.func @transform_17(%arg0: i32, %arg1: i32) -> (i32, i32) {
    %c0_i32 = arith.constant 0 : i32
    %c0_i32_0 = arith.constant 0 : i32
    %c0_i32_1 = arith.constant 0 : i32
    return %c0_i32, %c0_i32_0 : i32, i32
  }
  func.func @transform_18(%arg0: i32, %arg1: i32) -> (i32, i32, i32) {
    %c0_i32 = arith.constant 0 : i32
    %c0_i32_0 = arith.constant 0 : i32
    %c0_i32_1 = arith.constant 0 : i32
    return %arg0, %c0_i32, %c0_i32_0 : i32, i32, i32
  }
}

</mosaic_0001>

<bundles_post_ra>
// kernel: tpu_custom_call.1
= control target key start
LH: loop header
LB: loop body
LE: loop exit
PB: predicated region body
PF: predicated region fallthrough
CT: control target
= control target key end

     0   :  { %s10213_s0 = inlined_call_operand.hbm [shape: f32[2,2,128], index: 0, kind: input, shape index: {}]   ;;  %s10214_s1 = inlined_call_operand.hbm [shape: f32[128,512], index: 1, kind: input, shape index: {}]   ;;  %s10215_s2 = inlined_call_operand.hbm [shape: f32[128,512], index: 2, kind: input, shape index: {}]   ;;  %s10216_s3 = inlined_call_operand.hbm [shape: f32[512,512], index: 3, kind: input, shape index: {}]   ;;  %s10217_s4 = inlined_call_operand.hbm [shape: f32[512,128], index: 4, kind: input, shape index: {}]   ;;  %s10218_s5 = inlined_call_operand.hbm [shape: f32[128,128], index: 5, kind: input, shape index: {}]   ;;  %s10219_s6 = inlined_call_operand.hbm [shape: f32[2,128,384], index: 6, kind: input, shape index: {}]   ;;  %s10220_s7 = inlined_call_operand.vmem [shape: f32[2,1,384], index: 7, kind: input, shape index: {}]   ;;  %s10221_s8 = inlined_call_operand.hbm [shape: f32[2,128,128], index: 8, kind: input, shape index: {}]   ;;  %s10222_s9 = inlined_call_operand.vmem [shape: f32[2,1,128], index: 9, kind: input, shape index: {}]   ;;  %s10223_s10 = inlined_call_operand.vmem [shape: f32[2,1,128], index: 10, kind: input, shape index: {}]   ;;  %s10224_s11 = inlined_call_operand.vmem [shape: f32[2,1,128], index: 11, kind: input, shape index: {}]   ;;  %s10225_s12 = inlined_call_operand.hbm [shape: f32[2,128,128], index: 12, kind: input, shape index: {}]   ;;  %s10226_s13 = inlined_call_operand.vmem [shape: f32[2,1,128], index: 13, kind: input, shape index: {}]   ;;  %s10227_s14 = inlined_call_operand.vmem [shape: f32[2,1,128], index: 14, kind: input, shape index: {}]   ;;  %s10228_s15 = inlined_call_operand.vmem [shape: f32[2,1,128], index: 15, kind: input, shape index: {}]   ;;  %s10229_s16 = inlined_call_operand.hbm [shape: f32[128,128], index: 16, kind: input, shape index: {}]   ;;  %s10230_s17 = inlined_call_operand.vmem [shape: f32[1,128], index: 17, kind: input, shape index: {}]   ;;  %s10231_s18 = inlined_call_operand.hbm [shape: f32[2,1,128], index: 18, kind: output, shape index: {}]  }
   0x1   :  { %10511 = sst [smem:[#allocation226_spill]] %s10213_s0 }
   0x2   :  { %10512 = sst [smem:[#allocation227_spill]] %s10214_s1 }
   0x3   :  { %10513 = sst [smem:[#allocation228_spill]] %s10215_s2 }
   0x4   :  { %10514 = sst [smem:[#allocation229_spill]] %s10216_s3 }
   0x5   :  { %10515 = sst [smem:[#allocation230_spill]] %s10217_s4 }
   0x6   :  { %10516 = sst [smem:[#allocation231_spill]] %s10218_s5 }
   0x7   :  { %10517 = sst [smem:[#allocation232_spill]] %s10219_s6 }
   0x8   :  { %10518 = sst [smem:[#allocation233_spill]] %s10220_s7 }
   0x9   :  { %10519 = sst [smem:[#allocation234_spill]] %s10221_s8 }
   0xa   :  { %10520 = sst [smem:[#allocation235_spill]] %s10222_s9 }
   0xb   :  { %10521 = sst [smem:[#allocation236_spill]] %s10223_s10 }
   0xc   :  { %10522 = sst [smem:[#allocation237_spill]] %s10224_s11 }
   0xd   :  { %10523 = sst [smem:[#allocation238_spill]] %s10226_s13 }
   0xe   :  { %10524 = sst [smem:[#allocation239_spill]] %s10227_s14 }
   0xf   :  { %10525 = sst [smem:[#allocation240_spill]] %s10228_s15 }
  0x10   :  { %10526 = sst [smem:[#allocation241_spill]] %s10230_s17 }
  0x11   :  { %10527 = sst [smem:[#allocation242_spill]] %s10231_s18 }
  0x12   :  { %23 = vsyncpa [#allocation3], 0 }
  0x13   :  { %25 = vsyncpa [#allocation3 + $0x1], 0 }
  0x14   :  { %26 = vsyncpa [#allocation6], 0 }
  0x15   :  { %27 = vsyncpa [#allocation9], 0 }
  0x16   :  { %28 = vsyncpa [#allocation12], 0 }
  0x17   :  { %29 = vsyncpa [#allocation15], 0 }
  0x18   :  { %30 = vsyncpa [#allocation18], 0 }
  0x19   :  { %31 = vsyncpa [#allocation4], 0 }
  0x1a   :  { %33 = vsyncpa [#allocation4 + $0x1], 0  ;;  %s8351_s27 = smov 0   ;;  %s8353_s28 = smov 0  }
  0x1b   :  { %s8355_s29 = smov 0   ;;  %s8357_s30 = smov 0  }
  0x1c   :  { %s8359_s0 = smov 0   ;;  %s8361_s19 = smov 0  }
  0x1d LB: > { %10528 = sst [smem:[#allocation27_spill]] %s8226_s30  ;;  %s10235_s1 = sadd.s32 4294967295, %s8234_s19   ;;  %s8234_s19 = sphi %s8361_s19, %s39_s19   ;;  %s8230_s0 = sphi %s8359_s0, %s10973_s0   ;;  %s8226_s30 = sphi %s8357_s30, %s10972_s30   ;;  %s8222_s29 = sphi %s8355_s29, %s10971_s29   ;;  %s8218_s28 = sphi %s8353_s28, %s10970_s28   ;;  %s8214_s27 = sphi %s8351_s27, %s10969_s27  }
  0x1e   : > { %p4968_p0 = scmp.ge.s32.totalorder %s8234_s19, 1  ;;  %p8385_p1 = scmp.eq.s32.totalorder %s10235_s1, 0 }
  0x1f   : > { %p467_p2 = scmp.lt.s32.totalorder %s8234_s19, 3  ;;  %s8236_s22 = smov [#allocation5]  }
  0x20   : > { %s10529_s20 = scalar_select %p8385_p1, 1, 0 }
  0x21   : > { %p8390_p3 = pnand %p4968_p0, %p467_p2  ;;  %s479_s2 = sshll.u32 %s8236_s22, 4  ;;  %s8394_s2 = int_to_ptr.vmem [resolvable:$true] %s479_s2 }
  0x22   : > { %s8237_s24 = smov [#allocation8]   ;;  %s10532_s18 = sld [smem:[#allocation227_spill]] }
  0x23   : > { %s10530_s21 = scalar_select %p8390_p3, 1, 0 }
  0x24   : > { %p7699_p4 = pneg %p8390_p3  ;;  %s505_s25 = sshll.u32 %s8237_s24, 4  ;;  %s8405_s25 = int_to_ptr.vmem [resolvable:$true] %s505_s25 }
  0x26   : > { %p8401_p6 = pnand %p7699_p4, %p8385_p1 }
  0x28   : > { %s7850_s17 = scalar_lea.hbm %s10532_s18, 8192  ;;  %p8415_p8 = pneg %p8401_p6 }
  0x29   : > { %p7851_p7 = scmp.ne.s32.totalorder %s10532_s18, %s7850_s17  ;;  %p7857_p11 = scmp.lt.u32.totalorder %s7850_s17, %s10532_s18 }
  0x2b   : > { %p7853_p9 = pnand %p8415_p8, %p7851_p7 }
  0x2d   : > { %p7854_p10 = pneg %p7853_p9 }
  0x2f   : > { %p7859_p12 = pnand %p7857_p11, %p7854_p10 }
  0x31   : > { %7862 = shalt.err (!%p7859_p12)
}
  0x32   : > { %s7863_s30 = scalar_lea.vmem %s8394_s2, 8192  ;;  %p7871_p4 = scmp.lt.s32.totalorder %s8394_s2, %s8394_s2 }
  0x33   : > { %p7864_p13 = scmp.ne.s32.totalorder %s8394_s2, %s7863_s30  ;;  %p7872_p5 = scmp.lt.s32.totalorder %s7863_s30, %s7863_s30 }
  0x35   : > { %p7866_p0 = pnand %p7864_p13, %p8415_p8  ;;  %p7873_p7 = por %p7872_p5, %p7871_p4 }
  0x37   : > { %p7867_p2 = pneg %p7866_p0 }
  0x39   : > { %p7874_p9 = pnand %p7873_p7, %p7867_p2 }
  0x3b   : > { %7877 = shalt.err (!%p7874_p9)
}
  0x3c   : > { %s10247_s1 = smov 512   ;;  %s10248_s14 = smov 32  }
  0x3d   : > { %7702 = dma.hbm_to_vmem [thread:$0]  (!%p8401_p6), %s10532_s18, 8192, %s8394_s2, [#allocation6], %s10247_s1, %s10247_s1, %s10248_s14  }
  0x3e   : > { %s10534_s3 = sld [smem:[#allocation229_spill]] }
  0x44   : > { %s7878_s30 = scalar_lea.hbm %s10534_s3, 32768 }
  0x45   : > { %p7879_p5 = scmp.ne.s32.totalorder %s10534_s3, %s7878_s30  ;;  %p7885_p12 = scmp.lt.u32.totalorder %s7878_s30, %s10534_s3 }
  0x47   : > { %p7881_p10 = pnand %p7879_p5, %p8415_p8 }
  0x49   : > { %p7882_p11 = pneg %p7881_p10 }
  0x4b   : > { %p7887_p13 = pnand %p7885_p12, %p7882_p11 }
  0x4d   : > { %7890 = shalt.err (!%p7887_p13)
}
  0x4e   : > { %s7891_s2 = scalar_lea.vmem %s8405_s25, 32768  ;;  %p7899_p7 = scmp.lt.s32.totalorder %s8405_s25, %s8405_s25 }
  0x4f   : > { %p7892_p0 = scmp.ne.s32.totalorder %s8405_s25, %s7891_s2  ;;  %p7900_p9 = scmp.lt.s32.totalorder %s7891_s2, %s7891_s2 }
  0x51   : > { %p7894_p2 = pnand %p7892_p0, %p8415_p8  ;;  %p7901_p5 = por %p7900_p9, %p7899_p7 }
  0x53   : > { %p7895_p4 = pneg %p7894_p2 }
  0x55   : > { %p7902_p10 = pnand %p7901_p5, %p7895_p4 }
  0x57   : > { %7905 = shalt.err (!%p7902_p10)
}
  0x58   : > { %7708 = dma.hbm_to_vmem [thread:$0]  (!%p8401_p6), %s10534_s3, 32768, %s8405_s25, [#allocation9], %s10247_s1, %s10247_s1, %s10248_s14  }
  0x59   : > { %s8240_s11 = smov [#allocation11]   ;;  %s8241_s17 = smov [#allocation14]  }
  0x5a   : > { %s531_s13 = sshll.u32 %s8240_s11, 4  ;;  %s560_s26 = sshll.u32 %s8241_s17, 4  ;;  %s532_s13 = int_to_ptr.vmem [resolvable:$true] %s531_s13  ;;  %s8465_s26 = int_to_ptr.vmem [resolvable:$true] %s560_s26 }
  0x5b   : > { %s10535_s5 = sld [smem:[#allocation231_spill]] }
  0x61   : > { %s7906_s30 = scalar_lea.hbm %s10535_s5, 2048 }
  0x62   : > { %p7907_p11 = scmp.ne.s32.totalorder %s10535_s5, %s7906_s30  ;;  %p7913_p0 = scmp.lt.u32.totalorder %s7906_s30, %s10535_s5 }
  0x64   : > { %p7909_p12 = pnand %p7907_p11, %p8415_p8 }
  0x66   : > { %p7910_p13 = pneg %p7909_p12 }
  0x68   : > { %p7915_p2 = pnand %p7913_p0, %p7910_p13 }
  0x6a   : > { %7918 = shalt.err (!%p7915_p2)
}
  0x6b   : > { %s7919_s10 = scalar_lea.vmem %s532_s13, 2048  ;;  %p7927_p5 = scmp.lt.s32.totalorder %s532_s13, %s532_s13 }
  0x6c   : > { %p7920_p4 = scmp.ne.s32.totalorder %s532_s13, %s7919_s10  ;;  %p7928_p10 = scmp.lt.s32.totalorder %s7919_s10, %s7919_s10 }
  0x6e   : > { %p7922_p7 = pnand %p7920_p4, %p8415_p8  ;;  %p7929_p3 = por %p7928_p10, %p7927_p5 }
  0x70   : > { %p7923_p9 = pneg %p7922_p7 }
  0x72   : > { %p7930_p1 = pnand %p7929_p3, %p7923_p9 }
  0x74   : > { %7933 = shalt.err (!%p7930_p1)
}
  0x75   : > { %s10249_s18 = smov 128   ;;  %s10251_s11 = smov 8  }
  0x76   : > { %7714 = dma.hbm_to_vmem [thread:$0]  (!%p8401_p6), %s10535_s5, 2048, %s532_s13, [#allocation12], %s10249_s18, %s10249_s18, %s10251_s11  }
  0x77   : > { %s10536_s8 = sld [smem:[#allocation234_spill]] }
  0x7d   : > { %s7934_s2 = scalar_lea.hbm %s10536_s8, 4096 }
  0x7e   : > { %p7935_p1 = scmp.ne.s32.totalorder %s10536_s8, %s7934_s2  ;;  %p7941_p12 = scmp.lt.u32.totalorder %s7934_s2, %s10536_s8 }
  0x80   : > { %p7937_p3 = pnand %p7935_p1, %p8415_p8 }
  0x82   : > { %p7938_p11 = pneg %p7937_p3 }
  0x84   : > { %p7943_p13 = pnand %p7941_p12, %p7938_p11 }
  0x86   : > { %7946 = shalt.err (!%p7943_p13)
}
  0x87   : > { %s7947_s13 = scalar_lea.vmem %s8465_s26, 4096  ;;  %p7955_p7 = scmp.lt.s32.totalorder %s8465_s26, %s8465_s26 }
  0x88   : > { %p7948_p0 = scmp.ne.s32.totalorder %s8465_s26, %s7947_s13  ;;  %p7956_p9 = scmp.lt.s32.totalorder %s7947_s13, %s7947_s13 }
  0x8a   : > { %p7950_p2 = pnand %p7948_p0, %p8415_p8  ;;  %p7957_p5 = por %p7956_p9, %p7955_p7 }
  0x8c   : > { %p7951_p4 = pneg %p7950_p2 }
  0x8e   : > { %p7958_p10 = pnand %p7957_p5, %p7951_p4 }
  0x90   : > { %7961 = shalt.err (!%p7958_p10)
}
  0x91   : > { %7720 = dma.hbm_to_vmem [thread:$0]  (!%p8401_p6), %s10536_s8, 4096, %s8465_s26, [#allocation15], %s10249_s18, %s10249_s18, %s10251_s11  }
  0x92   : > { %s8244_s22 = smov [#allocation7]   ;;  %s8245_s30 = smov [#allocation10]  }
  0x93   : > { %s492_s24 = sshll.u32 %s8244_s22, 4  ;;  %s518_s2 = sshll.u32 %s8245_s30, 4  ;;  %s493_s24 = int_to_ptr.vmem [resolvable:$true] %s492_s24  ;;  %s8514_s2 = int_to_ptr.vmem [resolvable:$true] %s518_s2 }
  0x94   : > { %s10537_s10 = sld [smem:[#allocation228_spill]] }
  0x9a   : > { %s7962_s13 = scalar_lea.hbm %s10537_s10, 8192 }
  0x9b   : > { %p7963_p1 = scmp.ne.s32.totalorder %s10537_s10, %s7962_s13  ;;  %p7969_p12 = scmp.lt.u32.totalorder %s7962_s13, %s10537_s10 }
  0x9d   : > { %p7965_p3 = pnand %p7963_p1, %p8415_p8 }
  0x9f   : > { %p7966_p11 = pneg %p7965_p3 }
  0xa1   : > { %p7971_p13 = pnand %p7969_p12, %p7966_p11 }
  0xa3   : > { %7974 = shalt.err (!%p7971_p13)
}
  0xa4   : > { %s7975_s17 = scalar_lea.vmem %s493_s24, 8192  ;;  %p7983_p7 = scmp.lt.s32.totalorder %s493_s24, %s493_s24 }
  0xa5   : > { %p7976_p0 = scmp.ne.s32.totalorder %s493_s24, %s7975_s17  ;;  %p7984_p9 = scmp.lt.s32.totalorder %s7975_s17, %s7975_s17 }
  0xa7   : > { %p7978_p2 = pnand %p7976_p0, %p8415_p8  ;;  %p7985_p5 = por %p7984_p9, %p7983_p7 }
  0xa9   : > { %p7979_p4 = pneg %p7978_p2 }
  0xab   : > { %p7986_p10 = pnand %p7985_p5, %p7979_p4 }
  0xad   : > { %7989 = shalt.err (!%p7986_p10)
}
  0xae   : > { %s10538_s3 = smov 32   ;;  %s10539_s14 = smov 512  }
  0xaf   : > { %7705 = dma.hbm_to_vmem [thread:$0]  (!%p8401_p6), %s10537_s10, 8192, %s493_s24, [#allocation6], %s10539_s14, %s10539_s14, %s10538_s3  }
  0xb0   : > { %s10540_s4 = sld [smem:[#allocation230_spill]] }
  0xb6   : > { %s7990_s13 = scalar_lea.hbm %s10540_s4, 8192 }
  0xb7   : > { %p7991_p1 = scmp.ne.s32.totalorder %s10540_s4, %s7990_s13  ;;  %p7997_p12 = scmp.lt.u32.totalorder %s7990_s13, %s10540_s4 }
  0xb9   : > { %p7993_p3 = pnand %p7991_p1, %p8415_p8 }
  0xbb   : > { %p7994_p11 = pneg %p7993_p3 }
  0xbd   : > { %p7999_p13 = pnand %p7997_p12, %p7994_p11 }
  0xbf   : > { %8002 = shalt.err (!%p7999_p13)
}
  0xc0   : > { %s8003_s24 = scalar_lea.vmem %s8514_s2, 8192  ;;  %p8011_p7 = scmp.lt.s32.totalorder %s8514_s2, %s8514_s2 }
  0xc1   : > { %p8004_p0 = scmp.ne.s32.totalorder %s8514_s2, %s8003_s24  ;;  %p8012_p9 = scmp.lt.s32.totalorder %s8003_s24, %s8003_s24 }
  0xc3   : > { %p8006_p2 = pnand %p8004_p0, %p8415_p8  ;;  %p8013_p5 = por %p8012_p9, %p8011_p7 }
  0xc5   : > { %p8007_p4 = pneg %p8006_p2 }
  0xc7   : > { %p8014_p10 = pnand %p8013_p5, %p8007_p4 }
  0xc9   : > { %8017 = shalt.err (!%p8014_p10)
}
  0xca   : > { %s10541_s18 = smov 128   ;;  %s8246_s22 = smov [#allocation13]  }
  0xcb   : > { %7711 = dma.hbm_to_vmem [thread:$0]  (!%p8401_p6), %s10540_s4, 8192, %s8514_s2, [#allocation9], %s10541_s18, %s10541_s18, %s10251_s11  }
  0xcc   : > { %s544_s30 = sshll.u32 %s8246_s22, 4  ;;  %s10542_s6 = sld [smem:[#allocation232_spill]]  ;;  %s545_s30 = int_to_ptr.vmem [resolvable:$true] %s544_s30 }
  0xd2   : > { %s8018_s13 = scalar_lea.hbm %s10542_s6, 12288 }
  0xd3   : > { %p8019_p1 = scmp.ne.s32.totalorder %s10542_s6, %s8018_s13  ;;  %p8025_p12 = scmp.lt.u32.totalorder %s8018_s13, %s10542_s6 }
  0xd5   : > { %p8021_p3 = pnand %p8019_p1, %p8415_p8 }
  0xd7   : > { %p8022_p11 = pneg %p8021_p3 }
  0xd9   : > { %p8027_p13 = pnand %p8025_p12, %p8022_p11 }
  0xdb   : > { %8030 = shalt.err (!%p8027_p13)
}
  0xdc   : > { %s8031_s2 = scalar_lea.vmem %s545_s30, 12288  ;;  %p8039_p7 = scmp.lt.s32.totalorder %s545_s30, %s545_s30 }
  0xdd   : > { %p8032_p0 = scmp.ne.s32.totalorder %s545_s30, %s8031_s2  ;;  %p8040_p9 = scmp.lt.s32.totalorder %s8031_s2, %s8031_s2 }
  0xdf   : > { %p8034_p2 = pnand %p8032_p0, %p8415_p8  ;;  %p8041_p5 = por %p8040_p9, %p8039_p7 }
  0xe1   : > { %p8035_p4 = pneg %p8034_p2 }
  0xe3   : > { %p8042_p10 = pnand %p8041_p5, %p8035_p4 }
  0xe5   : > { %8045 = shalt.err (!%p8042_p10)
}
  0xe6   : > { %s8247_s3 = smov 384   ;;  %s8248_s14 = smov 24  }
  0xe7   : > { %7717 = dma.hbm_to_vmem [thread:$0]  (!%p8401_p6), %s10542_s6, 12288, %s545_s30, [#allocation12], %s8247_s3, %s8247_s3, %s8248_s14  }
  0xe8   : > { %s8249_s25 = smov [#allocation16]   ;;  %s8250_s1 = smov [#allocation17]  }
  0xe9   : > { %s582_s13 = sshll.u32 %s8249_s25, 4  ;;  %s604_s26 = sshll.u32 %s8250_s1, 4  ;;  %s583_s13 = int_to_ptr.vmem [resolvable:$true] %s582_s13  ;;  %s605_s26 = int_to_ptr.vmem [resolvable:$true] %s604_s26 }
  0xea   : > { %s8046_s2 = scalar_lea.hbm %s10225_s12, 4096 }
  0xeb   : > { %p8047_p1 = scmp.ne.s32.totalorder %s10225_s12, %s8046_s2  ;;  %p8053_p12 = scmp.lt.u32.totalorder %s8046_s2, %s10225_s12 }
  0xed   : > { %p8049_p3 = pnand %p8047_p1, %p8415_p8 }
  0xef   : > { %p8050_p11 = pneg %p8049_p3 }
  0xf1   : > { %p8055_p13 = pnand %p8053_p12, %p8050_p11 }
  0xf3   : > { %8058 = shalt.err (!%p8055_p13)
}
  0xf4   : > { %s8059_s30 = scalar_lea.vmem %s583_s13, 4096  ;;  %p8067_p7 = scmp.lt.s32.totalorder %s583_s13, %s583_s13 }
  0xf5   : > { %p8060_p0 = scmp.ne.s32.totalorder %s583_s13, %s8059_s30  ;;  %p8068_p9 = scmp.lt.s32.totalorder %s8059_s30, %s8059_s30 }
  0xf7   : > { %p8062_p2 = pnand %p8060_p0, %p8415_p8  ;;  %p8069_p5 = por %p8068_p9, %p8067_p7 }
  0xf9   : > { %p8063_p4 = pneg %p8062_p2 }
  0xfb   : > { %p8070_p10 = pnand %p8069_p5, %p8063_p4 }
  0xfd   : > { %8073 = shalt.err (!%p8070_p10)
}
  0xfe   : > { %s10543_s4 = smov 8   ;;  %s8074_s14 = scalar_lea.hbm %s10229_s16, 2048 }
  0xff   : > { %7723 = dma.hbm_to_vmem [thread:$0]  (!%p8401_p6), %s10225_s12, 4096, %s583_s13, [#allocation15], %s10541_s18, %s10541_s18, %s10543_s4  }
 0x100   : > { %p8075_p1 = scmp.ne.s32.totalorder %s10229_s16, %s8074_s14  ;;  %p8081_p12 = scmp.lt.u32.totalorder %s8074_s14, %s10229_s16 }
 0x102   : > { %p8077_p3 = pnand %p8075_p1, %p8415_p8 }
 0x104   : > { %p8078_p11 = pneg %p8077_p3 }
 0x106   : > { %p8083_p13 = pnand %p8081_p12, %p8078_p11 }
 0x108   : > { %8086 = shalt.err (!%p8083_p13)
}
 0x109   : > { %s8087_s17 = scalar_lea.vmem %s605_s26, 2048  ;;  %p8095_p7 = scmp.lt.s32.totalorder %s605_s26, %s605_s26 }
 0x10a   : > { %p8088_p0 = scmp.ne.s32.totalorder %s605_s26, %s8087_s17  ;;  %p8096_p9 = scmp.lt.s32.totalorder %s8087_s17, %s8087_s17 }
 0x10c   : > { %p8090_p2 = pnand %p8088_p0, %p8415_p8  ;;  %p8097_p5 = por %p8096_p9, %p8095_p7 }
 0x10e   : > { %p8091_p4 = pneg %p8090_p2 }
 0x110   : > { %p8098_p10 = pnand %p8097_p5, %p8091_p4 }
 0x112   : > { %8101 = shalt.err (!%p8098_p10)
}
 0x113   : > { %7726 = dma.hbm_to_vmem [thread:$0]  (!%p8401_p6), %s10229_s16, 2048, %s605_s26, [#allocation18], %s10541_s18, %s10541_s18, %s10543_s4  }
 0x114   : > { %s4967_s15 = sadd.s32 4294967294, %s8234_s19   ;;  %s51_s23 = sadd.s32 1, %s8230_s0 }
 0x115   : > { %s60_s2 = sadd.s32 1, %s8222_s29  ;;  %p53_p8 = scmp.ge.s32.totalorder %s51_s23, 2 }
 0x116   : > { %p67_p1 = scmp.ne.s32.totalorder %s8222_s29, %s8218_s28  ;;  %p68_p3 = scmp.eq.s32.totalorder %s8234_s19, 0 }
 0x117   : > { %p73_p11 = scmp.ne.s32.totalorder %s8218_s28, %s8214_s27  ;;  %s10975_s23 = smov (%p53_p8, %s51_s23), 0 }
 0x118   : > { %p8633_p12 = por %p68_p3, %p67_p1  ;;  %p10545_p13 = scmp.ne.s32.totalorder %s10529_s20, 0 }
 0x119   : > { %s55_s26 = ssub.s32 %s8230_s0, %s10975_s23  ;;  %s10547_s4 = sadd.s32 4294967295, %s8234_s19  }
 0x11a   : > { %p8639_p6 = por %p10545_p13, %p73_p11  ;;  %p454_p0 = scmp.eq.s32.totalorder %s10547_s4, 1 }
 0x11b   : > { %p58_p2 = scmp.eq.s32.totalorder %s55_s26, 0  ;;  %p460_p4 = scmp.eq.s32.totalorder %s4967_s15, 1 }
 0x11c   : > { %p8647_p7 = por %p454_p0, %p67_p1  ;;  %p7744_p9 = scmp.lt.s32.totalorder %s8234_s19, 2 }
 0x11d   : > { %s8653_s8 = scalar_select %p58_p2, %s8222_s29, %s60_s2  }
 0x11e   : > { %s10548_s5 = scalar_select %p8647_p7, 1, 0 }
 0x11f   : > { %p8655_p5 = por %p460_p4, %p73_p11  ;;  %s621_s3 = sand.u32 1, %s8222_s29  }
 0x120   : > { %s4979_s14 = sshll.u32 %s621_s3, 1  ;;  %s4980_s22 = sshll.u32 %s8230_s0, 5 }
 0x121   : > { %s10549_s11 = scalar_select %p8655_p5, 1, 0 }
 0x122   : > { %s10550_s1 = sld [smem:[#allocation226_spill]]  ;;  %s625_s13 = scalar_lea.vmem [#allocation2], %s4979_s14 }
 0x123   : > { %s633_s24 = sshll.u32 %s625_s13, 4  ;;  %p8670_p10 = pnand %p7744_p9, %p8633_p12  ;;  %s8666_s24 = int_to_ptr.vmem [resolvable:$true] %s633_s24 }
 0x124   : > { %s622_s2 = scalar_lea.sflag [#allocation3], %s621_s3 }
 0x125   : > { %p8104_p1 = pneg %p8670_p10 }
 0x128   : > { %s8664_s17 = scalar_lea.hbm %s10550_s1, %s4980_s22  ;;  %s8107_s22 = scalar_lea.hbm %s10550_s1, 64 }
 0x129   : > { %s8102_s26 = scalar_lea.hbm %s8664_s17, 32  ;;  %p8108_p12 = scmp.lt.u32.totalorder %s8664_s17, %s10550_s1 }
 0x12a   : > { %p8103_p8 = scmp.ne.s32.totalorder %s8664_s17, %s8102_s26  ;;  %p8109_p13 = scmp.lt.u32.totalorder %s8107_s22, %s8102_s26 }
 0x12b   : > { %p8111_p2 = scmp.lt.u32.totalorder %s8102_s26, %s8664_s17 }
 0x12c   : > { %p8105_p3 = pnand %p8104_p1, %p8103_p8  ;;  %p8110_p0 = por %p8109_p13, %p8108_p12 }
 0x12e   : > { %p8106_p11 = pneg %p8105_p3  ;;  %p8112_p4 = por %p8111_p2, %p8110_p0 }
 0x130   : > { %p8113_p9 = pnand %p8112_p4, %p8106_p11 }
 0x132   : > { %8116 = shalt.err (!%p8113_p9)
}
 0x133   : > { %s8117_s3 = scalar_lea.vmem %s8666_s24, 32  ;;  %s8251_s25 = smov [#allocation2]  }
 0x134   : > { %p8118_p8 = scmp.ne.s32.totalorder %s8666_s24, %s8117_s3  ;;  %s8122_s13 = sshll.u32 %s8251_s25, 4  ;;  %s8123_s13 = int_to_ptr.vmem [resolvable:$false] %s8122_s13 }
 0x135   : > { %s8124_s4 = scalar_lea.vmem %s8123_s13, 64  ;;  %p8125_p7 = scmp.lt.s32.totalorder %s8666_s24, %s8123_s13 }
 0x136   : > { %p8120_p3 = pnand %p8118_p8, %p8104_p1  ;;  %p8126_p12 = scmp.lt.s32.totalorder %s8124_s4, %s8117_s3 }
 0x138   : > { %p8121_p5 = pneg %p8120_p3  ;;  %p8127_p13 = por %p8126_p12, %p8125_p7 }
 0x13a   : > { %p8128_p0 = pnand %p8127_p13, %p8121_p5 }
 0x13c   : > { %8131 = shalt.err (!%p8128_p0)
}
 0x13d   : > { %7730 = dma.hbm_to_vmem [thread:$0]  (!%p8670_p10), %s8664_s17, 32, %s8666_s24, %s622_s2  }
 0x13e   : > { %p10552_p11 = scmp.ne.s32.totalorder %s10530_s21, 0 }
 0x140   : > { %642 = sbr.rel (%p10552_p11) target bundleno = 4722 (0x1272), region = 92 }
 0x147   : > { %s8702_s26 = sand.u32 1, %s8218_s28  }
 0x148   : > { %s4982_s14 = sshll.u32 %s8702_s26, 1  ;;  %s645_s22 = scalar_lea.sflag [#allocation3], %s8702_s26 }
 0x149   : > { %s8706_s30 = scalar_lea.vmem [#allocation2], %s4982_s14 }
 0x14a   : > { %8185 = dma.done.wait (%p8639_p6), %s645_s22, 32  }
 0x14b   : > { %8187 = vsyncadd (%p8639_p6), %s645_s22, 4294967264  ;;  %p10553_p7 = scmp.ne.s32.totalorder %s10529_s20, 0 }
 0x14d   : > { %8189 = dma.done.wait (%p10553_p7), [#allocation6], 16384  }
 0x14e   : > { %8191 = vsyncadd (%p10553_p7), [#allocation6], 4294950912 }
 0x14f   : > { %8193 = dma.done.wait (%p10553_p7), [#allocation9], 40960  }
 0x150   : > { %8195 = vsyncadd (%p10553_p7), [#allocation9], 4294926336 }
 0x151   : > { %8197 = dma.done.wait (%p10553_p7), [#allocation12], 14336  }
 0x152   : > { %8199 = vsyncadd (%p10553_p7), [#allocation12], 4294952960 }
 0x153   : > { %8201 = dma.done.wait (%p10553_p7), [#allocation15], 8192  }
 0x154   : > { %8203 = vsyncadd (%p10553_p7), [#allocation15], 4294959104 }
 0x155   : > { %8205 = dma.done.wait (%p10553_p7), [#allocation18], 2048  }
 0x156   : > { %8207 = vsyncadd (%p10553_p7), [#allocation18], 4294965248  ;;  %v10258_v0 = vmov 0.0   ;;  %v10256_v1 = vmov 0.0|0.0   ;;  %vm8254_vm0 = vmmov 0   ;;  %v1202_v2 = vld [vmem:[#allocation13 + $0x8] sm:$0xff] }
 0x157   : > { %1330 = vmatprep.mubr.f32.mxu0 %v10258_v0  ;;  %6107 = vmatprep.subr.bf16.mxu1 %v10256_v1  ;;  %v1205_v3 = vld [vmem:[#allocation13 + $0x20] sm:$0xff]  ;;  %v1204_v6 = vld [vmem:[#allocation13 + $0x18] sm:$0xff]  ;;  %v1211_v8 = vld [vmem:[#allocation13 + $0x50] sm:$0xff]  ;;  %s10577_s7 = sld [smem:[#allocation233_spill]]  ;;  %vm2121_vm1 = vcmask 1041408   ;;  %s10754_s24 = sld [smem:[#allocation235_spill]] }
 0x158   : > { %5582 = vmatprep.mubr.msk.f32.mxu1 %vm8254_vm0, %v10258_v0  ;;  %v1201_v4 = vld [vmem:[#allocation13] sm:$0xff]  ;;  %v6075_v5 = vpack.c.bf16 %v1205_v3, %v1202_v2  ;;  %v1208_v7 = vld [vmem:[#allocation13 + $0x38] sm:$0xff]  ;;  %v1207_v11 = vld [vmem:[#allocation13 + $0x30] sm:$0xff]  ;;  %s10755_s9 = sld [smem:[#allocation236_spill]]  ;;  %s10756_s13 = sld [smem:[#allocation237_spill]] }
 0x159   : > { %v6077_v9 = vpack.c.bf16 %v1204_v6, %v1201_v4  ;;  %v6079_v10 = vpack.c.bf16 %v1211_v8, %v1208_v7  ;;  %v1210_v12 = vld [vmem:[#allocation13 + $0x48] sm:$0xff]  ;;  %v1217_v14 = vld [vmem:[#allocation13 + $0x80] sm:$0xff]  ;;  %v1216_v18 = vld [vmem:[#allocation13 + $0x78] sm:$0xff]  ;;  %s10757_s22 = sld [smem:[#allocation238_spill]]  ;;  %s10758_s21 = sld [smem:[#allocation239_spill]] }
 0x15a   : > { %v1214_v13 = vld [vmem:[#allocation13 + $0x68] sm:$0xff]  ;;  %6076 = vmatprep.subr.bf16.mxu0 %v6075_v5  ;;  %v6081_v15 = vpack.c.bf16 %v1210_v12, %v1207_v11  ;;  %v1213_v17 = vld [vmem:[#allocation13 + $0x60] sm:$0xff]  ;;  %v1220_v19 = vld [vmem:[#allocation13 + $0x98] sm:$0xff]  ;;  %s10759_s15 = sld [smem:[#allocation240_spill]]  ;;  %s10963_s3 = sld [smem:[#allocation27_spill]] }
 0x15b   : > { %6078 = vmatpush1.bf16.msra.mxu0 %v6077_v9  ;;  %v6083_v16 = vpack.c.bf16 %v1217_v14, %v1214_v13  ;;  %v1223_v20 = vld [vmem:[#allocation13 + $0xb0] sm:$0xff]  ;;  %v6085_v21 = vpack.c.bf16 %v1216_v18, %v1213_v17  ;;  %v1222_v24 = vld [vmem:[#allocation13 + $0xa8] sm:$0xff]  ;;  %v1229_v26 = vld [vmem:[#allocation13 + $0xe0] sm:$0xff]  ;;  %s10964_s17 = sld [smem:[#allocation241_spill]]  ;;  %s735_s1 = scalar_lea.vmem [#allocation19], %s8702_s26 }
 0x15c   : > { %6080 = vmatprep.subr.bf16.mxu0 %v6079_v10  ;;  %v6087_v22 = vpack.c.bf16 %v1223_v20, %v1220_v19  ;;  %v1219_v23 = vld [vmem:[#allocation13 + $0x90] sm:$0xff]  ;;  %v1226_v25 = vld [vmem:[#allocation13 + $0xc8] sm:$0xff]  ;;  %v1209_v29 = vld [vmem:[#allocation13 + $0x40] sm:$0xff]  ;;  %s4805_s6 = sshll.u32 %s735_s1, 4  ;;  %s4793_s14 = scalar_lea.sflag [#allocation4], %s8702_s26  ;;  %s10166_s6 = int_to_ptr.vmem [resolvable:$true] %s4805_s6 }
 0x15d   : > { %v1203_v27 = vld [vmem:[#allocation13 + $0x10] sm:$0xff]  ;;  %v1206_v28 = vld [vmem:[#allocation13 + $0x28] sm:$0xff]  ;;  %v6089_v30 = vpack.c.bf16 %v1222_v24, %v1219_v23  ;;  %v1212_v32 = vld [vmem:[#allocation13 + $0x58] sm:$0xff]  ;;  %v6091_v33 = vpack.c.bf16 %v1229_v26, %v1226_v25  ;;  %p10966_p5 = scmp.ne.s32.totalorder %s10548_s5, 0 }
 0x15e   : > { %v6108_v31 = vpack.c.bf16 %v1206_v28, %v1203_v27  ;;  %v1225_v34 = vld [vmem:[#allocation13 + $0xc0] sm:$0xff]  ;;  %v1228_v35 = vld [vmem:[#allocation13 + $0xd8] sm:$0xff]  ;;  %v1235_v37 = vld [vmem:[#allocation13 + $0x110] sm:$0xff]  ;;  %v6111_v38 = vpack.c.bf16 %v1212_v32, %v1209_v29 }
 0x15f   : > { %6082 = vmatpush1.bf16.msra.mxu0 %v6081_v15  ;;  %v1232_v36 = vld [vmem:[#allocation13 + $0xf8] sm:$0xff]  ;;  %v1215_v39 = vld [vmem:[#allocation13 + $0x70] sm:$0xff]  ;;  %v1218_v40 = vld [vmem:[#allocation13 + $0x88] sm:$0xff]  ;;  %v6093_v41 = vpack.c.bf16 %v1228_v35, %v1225_v34 }
 0x160   : > { %6084 = vmatprep.subr.bf16.mxu0 %v6083_v16  ;;  %6109 = vmatpush3.bf16.msra.mxu1 %v6108_v31  ;;  %v6095_v42 = vpack.c.bf16 %v1235_v37, %v1232_v36  ;;  %v1231_v43 = vld [vmem:[#allocation13 + $0xf0] sm:$0xff]  ;;  %v1234_v44 = vld [vmem:[#allocation13 + $0x108] sm:$0xff]  ;;  %v1241_v46 = vld [vmem:[#allocation13 + $0x140] sm:$0xff]  ;;  %v6114_v47 = vpack.c.bf16 %v1218_v40, %v1215_v39  ;;  %s5012_s2 = sshll.u32 %s10963_s3, 4  ;;  %s8255_s3 = smov [#allocation19]  }
 0x161   : > { %6110 = vmatprep.subr.bf16.mxu1 %v10256_v1  ;;  %v1238_v45 = vld [vmem:[#allocation13 + $0x128] sm:$0xff]  ;;  %v1221_v48 = vld [vmem:[#allocation13 + $0xa0] sm:$0xff]  ;;  %v1224_v49 = vld [vmem:[#allocation13 + $0xb8] sm:$0xff]  ;;  %v6097_v50 = vpack.c.bf16 %v1234_v44, %v1231_v43  ;;  %s8136_s20 = sshll.u32 %s8255_s3, 4  ;;  %s8137_s20 = int_to_ptr.vmem [resolvable:$false] %s8136_s20 }
 0x162   : > { %v6099_v51 = vpack.c.bf16 %v1241_v46, %v1238_v45  ;;  %v1237_v52 = vld [vmem:[#allocation13 + $0x120] sm:$0xff]  ;;  %v1240_v53 = vld [vmem:[#allocation13 + $0x138] sm:$0xff]  ;;  %v1247_v55 = vld [vmem:[#allocation13 + $0x170] sm:$0xff]  ;;  %v6117_v56 = vpack.c.bf16 %v1224_v49, %v1221_v48  ;;  %s8138_s18 = scalar_lea.vmem %s8137_s20, 32  ;;  %p8139_p2 = scmp.lt.s32.totalorder %s10166_s6, %s8137_s20 }
 0x163   : > { %6086 = vmatpush1.bf16.msra.mxu0 %v6085_v21  ;;  %v1244_v54 = vld [vmem:[#allocation13 + $0x158] sm:$0xff]  ;;  %v1227_v57 = vld [vmem:[#allocation13 + $0xd0] sm:$0xff]  ;;  %v1230_v58 = vld [vmem:[#allocation13 + $0xe8] sm:$0xff]  ;;  %v6101_v59 = vpack.c.bf16 %v1240_v53, %v1237_v52 }
 0x164   : > { %6088 = vmatprep.subr.bf16.mxu0 %v6087_v22  ;;  %6112 = vmatpush3.bf16.msra.mxu1 %v6111_v38  ;;  %v6103_v60 = vpack.c.bf16 %v1247_v55, %v1244_v54  ;;  %v1243_v61 = vld [vmem:[#allocation13 + $0x150] sm:$0xff]  ;;  %v1246_v62 = vld [vmem:[#allocation13 + $0x168] sm:$0xff]  ;;  %v6120_v63 = vpack.c.bf16 %v1230_v58, %v1227_v57  ;;  %v1233_v4 = vld [vmem:[#allocation13 + $0x100] sm:$0xff] }
 0x165   : > { %6113 = vmatprep.subr.bf16.mxu1 %v10256_v1  ;;  %v738_v2 = vld [vmem:[#allocation5 + $0x8] sm:$0xff]  ;;  %v1236_v5 = vld [vmem:[#allocation13 + $0x118] sm:$0xff]  ;;  %v6105_v6 = vpack.c.bf16 %v1246_v62, %v1243_v61  ;;  %v737_v8 = vld [vmem:[#allocation5] sm:$0xff] }
 0x166   : > { %v742_v3 = vld [vmem:[#allocation5 + $0x28] sm:$0xff]  ;;  %v741_v9 = vld [vmem:[#allocation5 + $0x20] sm:$0xff]  ;;  %v6123_v10 = vpack.c.bf16 %v1236_v5, %v1233_v4  ;;  %v1239_v13 = vld [vmem:[#allocation13 + $0x130] sm:$0xff] }
 0x167   : > { %6090 = vmatpush1.bf16.msra.mxu0 %v6089_v30  ;;  %v8740_v7 = vpack.c.bf16 %v742_v3, %v738_v2  ;;  %v746_v11 = vld [vmem:[#allocation5 + $0x48] sm:$0xff]  ;;  %v736_v15 = vld [vmem:[%s8706_s30] sm:$0x3]  ;;  %v8744_v16 = vpack.c.bf16 %v741_v9, %v737_v8  ;;  %v745_v18 = vld [vmem:[#allocation5 + $0x40] sm:$0xff] }
 0x168   : > { %6092 = vmatprep.subr.bf16.mxu0 %v6091_v33  ;;  %6115 = vmatpush3.bf16.msra.mxu1 %v6114_v47  ;;  %v750_v12 = vld [vmem:[#allocation5 + $0x68] sm:$0xff]  ;;  %v749_v19 = vld [vmem:[#allocation5 + $0x60] sm:$0xff]  ;;  %v1248_v24 = vld [vmem:[#allocation13 + $0x178] sm:$0xff] }
 0x169   : > { %6116 = vmatprep.subr.bf16.mxu1 %v10256_v1  ;;  %v1242_v14 = vld [vmem:[#allocation13 + $0x148] sm:$0xff]  ;;  %v8747_v17 = vpack.c.bf16 %v750_v12, %v746_v11  ;;  %v1245_v23 = vld [vmem:[#allocation13 + $0x160] sm:$0xff]  ;;  %v740_v25 = vld [vmem:[#allocation5 + $0x18] sm:$0xff]  ;;  %v8751_v27 = vpack.c.bf16 %v749_v19, %v745_v18 }
 0x16a   : > { %v6126_v20 = vpack.c.bf16 %v1242_v14, %v1239_v13  ;;  %v754_v21 = vld [vmem:[#allocation5 + $0x88] sm:$0xff]  ;;  %v744_v26 = vld [vmem:[#allocation5 + $0x38] sm:$0xff]  ;;  %v753_v29 = vld [vmem:[#allocation5 + $0x80] sm:$0xff]  ;;  %v6129_v31 = vpack.c.bf16 %v1248_v24, %v1245_v23 }
 0x16b   : > { %6094 = vmatpush1.bf16.msra.mxu0 %v6093_v41  ;;  %v758_v22 = vld [vmem:[#allocation5 + $0xa8] sm:$0xff]  ;;  %v757_v30 = vld [vmem:[#allocation5 + $0xa0] sm:$0xff]  ;;  %v8758_v34 = vpack.c.bf16 %v744_v26, %v740_v25  ;;  %v739_v35 = vld [vmem:[#allocation5 + $0x10] sm:$0xff] }
 0x16c   : > { %6096 = vmatprep.subr.bf16.mxu0 %v6095_v42  ;;  %6118 = vmatpush3.bf16.msra.mxu1 %v6117_v56  ;;  %v8755_v28 = vpack.c.bf16 %v758_v22, %v754_v21  ;;  %v762_v32 = vld [vmem:[#allocation5 + $0xc8] sm:$0xff]  ;;  %v743_v36 = vld [vmem:[#allocation5 + $0x30] sm:$0xff]  ;;  %v748_v37 = vld [vmem:[#allocation5 + $0x58] sm:$0xff]  ;;  %v8761_v39 = vpack.c.bf16 %v757_v30, %v753_v29 }
 0x16d   : > { %6119 = vmatprep.subr.bf16.mxu1 %v10256_v1  ;;  %v766_v33 = vld [vmem:[#allocation5 + $0xe8] sm:$0xff]  ;;  %v752_v38 = vld [vmem:[#allocation5 + $0x78] sm:$0xff]  ;;  %v761_v41 = vld [vmem:[#allocation5 + $0xc0] sm:$0xff]  ;;  %v8766_v43 = vpack.c.bf16 %v743_v36, %v739_v35 }
 0x16e   : > { %v8764_v40 = vpack.c.bf16 %v766_v33, %v762_v32  ;;  %v765_v42 = vld [vmem:[#allocation5 + $0xe0] sm:$0xff]  ;;  %v770_v44 = vld [vmem:[#allocation5 + $0x108] sm:$0xff]  ;;  %v8769_v46 = vpack.c.bf16 %v752_v38, %v748_v37  ;;  %v747_v47 = vld [vmem:[#allocation5 + $0x50] sm:$0xff] }
 0x16f   : > { %6098 = vmatpush1.bf16.msra.mxu0 %v6097_v50  ;;  %v774_v45 = vld [vmem:[#allocation5 + $0x128] sm:$0xff]  ;;  %v751_v48 = vld [vmem:[#allocation5 + $0x70] sm:$0xff]  ;;  %v756_v49 = vld [vmem:[#allocation5 + $0x98] sm:$0xff] }
 0x170   : > { %6100 = vmatprep.subr.bf16.mxu0 %v6099_v51  ;;  %6121 = vmatpush3.bf16.msra.mxu1 %v6120_v63  ;;  %10554 = vst [vmem:[#allocation28_spill] sm:$0xff] %v8764_v40  ;;  %v760_v50 = vld [vmem:[#allocation5 + $0xb8] sm:$0xff]  ;;  %v8772_v51 = vpack.c.bf16 %v765_v42, %v761_v41  ;;  %v8775_v52 = vpack.c.bf16 %v774_v45, %v770_v44  ;;  %v769_v53 = vld [vmem:[#allocation5 + $0x100] sm:$0xff]  ;;  %v778_v56 = vld [vmem:[#allocation5 + $0x148] sm:$0xff] }
 0x171   : > { %6122 = vmatprep.subr.bf16.mxu1 %v10256_v1  ;;  %v773_v54 = vld [vmem:[#allocation5 + $0x120] sm:$0xff]  ;;  %v8778_v55 = vpack.c.bf16 %v751_v48, %v747_v47  ;;  %v782_v57 = vld [vmem:[#allocation5 + $0x168] sm:$0xff]  ;;  %v8782_v58 = vpack.c.bf16 %v760_v50, %v756_v49  ;;  %v764_v61 = vld [vmem:[#allocation5 + $0xd8] sm:$0xff] }
 0x172   : > { %10555 = vst [vmem:[#allocation29_spill] sm:$0xff] %v8772_v51  ;;  %10556 = vst [vmem:[#allocation30_spill] sm:$0xff] %v8775_v52  ;;  %v768_v62 = vld [vmem:[#allocation5 + $0xf8] sm:$0xff]  ;;  %v8785_v63 = vpack.c.bf16 %v773_v54, %v769_v53  ;;  %v8788_v2 = vpack.c.bf16 %v782_v57, %v778_v56  ;;  %v777_v3 = vld [vmem:[#allocation5 + $0x140] sm:$0xff] }
 0x173   : > { %6102 = vmatpush1.bf16.msra.mxu0 %v6101_v59  ;;  %v755_v59 = vld [vmem:[#allocation5 + $0x90] sm:$0xff]  ;;  %v781_v4 = vld [vmem:[#allocation5 + $0x160] sm:$0xff]  ;;  %v790_v8 = vld [vmem:[#allocation5 + $0x1a8] sm:$0xff]  ;;  %v8794_v9 = vpack.c.bf16 %v768_v62, %v764_v61 }
 0x174   : > { %6104 = vmatprep.subr.bf16.mxu0 %v6103_v60  ;;  %6124 = vmatpush3.bf16.msra.mxu1 %v6123_v10  ;;  %v759_v60 = vld [vmem:[#allocation5 + $0xb0] sm:$0xff]  ;;  %10557 = vst [vmem:[#allocation31_spill] sm:$0xff] %v8785_v63  ;;  %10558 = vst [vmem:[#allocation32_spill] sm:$0xff] %v8788_v2  ;;  %v772_v12 = vld [vmem:[#allocation5 + $0x118] sm:$0xff]  ;;  %v8797_v14 = vpack.c.bf16 %v781_v4, %v777_v3 }
 0x175   : > { %6125 = vmatprep.subr.bf16.mxu1 %v10256_v1  ;;  %v8791_v5 = vpack.c.bf16 %v759_v60, %v755_v59  ;;  %10559 = vst [vmem:[#allocation33_spill] sm:$0xff] %v8794_v9  ;;  %v763_v10 = vld [vmem:[#allocation5 + $0xd0] sm:$0xff]  ;;  %v776_v13 = vld [vmem:[#allocation5 + $0x138] sm:$0xff]  ;;  %v785_v18 = vld [vmem:[#allocation5 + $0x180] sm:$0xff] }
 0x176   : > { %v767_v11 = vld [vmem:[#allocation5 + $0xf0] sm:$0xff]  ;;  %10560 = vst [vmem:[#allocation34_spill] sm:$0xff] %v8797_v14  ;;  %v789_v19 = vld [vmem:[#allocation5 + $0x1a0] sm:$0xff]  ;;  %v794_v21 = vld [vmem:[#allocation5 + $0x1c8] sm:$0xff]  ;;  %v8806_v23 = vpack.c.bf16 %v776_v13, %v772_v12 }
 0x177   : > { %6106 = vmatpush1.bf16.msra.mxu0 %v6105_v6  ;;  %v786_v6 = vld [vmem:[#allocation5 + $0x188] sm:$0xff]  ;;  %v771_v24 = vld [vmem:[#allocation5 + $0x110] sm:$0xff]  ;;  %v780_v26 = vld [vmem:[#allocation5 + $0x158] sm:$0xff]  ;;  %v8809_v30 = vpack.c.bf16 %v789_v19, %v785_v18 }
 0x178   : > { %6132 = vmatprep.subr.bf16.mxu0 %v8740_v7  ;;  %6127 = vmatpush3.bf16.msra.mxu1 %v6126_v20  ;;  %v8803_v20 = vpack.c.bf16 %v767_v11, %v763_v10  ;;  %v798_v22 = vld [vmem:[#allocation5 + $0x1e8] sm:$0xff]  ;;  %10563 = vst [vmem:[#allocation37_spill] sm:$0xff] %v8806_v23  ;;  %v775_v25 = vld [vmem:[#allocation5 + $0x130] sm:$0xff]  ;;  %v784_v29 = vld [vmem:[#allocation5 + $0x178] sm:$0xff]  ;;  %v1251_v10 = vlaneseq }
 0x179   : > { %6128 = vmatprep.subr.bf16.mxu1 %v10256_v1  ;;  %10564 = vst [vmem:[#allocation38_spill] sm:$0xff] %v8809_v30  ;;  %v793_v32 = vld [vmem:[#allocation5 + $0x1c0] sm:$0xff]  ;;  %v8815_v35 = vpack.c.bf16 %v775_v25, %v771_v24  ;;  %v8818_v36 = vpack.c.bf16 %v784_v29, %v780_v26  ;;  %v779_v37 = vld [vmem:[#allocation5 + $0x150] sm:$0xff]  ;;  %v788_v41 = vld [vmem:[#allocation5 + $0x198] sm:$0xff] }
 0x17a   : > { %1331 = vmatmul.mubr.f32.vlgmr.msra.gmra.mrb[0].mxu0 %v736_v15  ;;  %10562 = vst [vmem:[#allocation36_spill] sm:$0xff] %v8803_v20  ;;  %v797_v33 = vld [vmem:[#allocation5 + $0x1e0] sm:$0xff]  ;;  %v783_v38 = vld [vmem:[#allocation5 + $0x170] sm:$0xff]  ;;  %v792_v42 = vld [vmem:[#allocation5 + $0x1b8] sm:$0xff]  ;;  %v8848_v11 = vshrl.u32 %v1251_v10, 7 }
 0x17b   : > { %6134 = vmatpush1.bf16.msra.mxu0 %v8744_v16  ;;  %1471 = vmatprep.mubr.f32.mxu0 %v10258_v0  ;;  %10566 = vst [vmem:[#allocation40_spill] sm:$0xff] %v8815_v35  ;;  %10567 = vst [vmem:[#allocation41_spill] sm:$0xff] %v8818_v36  ;;  %v8821_v44 = vpack.c.bf16 %v797_v33, %v793_v32  ;;  %v8825_v45 = vpack.c.bf16 %v783_v38, %v779_v37  ;;  %v787_v48 = vld [vmem:[#allocation5 + $0x190] sm:$0xff]  ;;  %v796_v50 = vld [vmem:[#allocation5 + $0x1d8] sm:$0xff] }
 0x17c   : > { %6136 = vmatprep.subr.bf16.mxu0 %v8747_v17  ;;  %6130 = vmatpush3.bf16.msra.mxu1 %v6129_v31  ;;  %v8812_v31 = vpack.c.bf16 %v798_v22, %v794_v21  ;;  %v8828_v47 = vpack.c.bf16 %v792_v42, %v788_v41  ;;  %v791_v49 = vld [vmem:[#allocation5 + $0x1b0] sm:$0xff]  ;;  %v800_v53 = vld [vmem:[#allocation5 + $0x1f8] sm:$0xff]  ;;  %v802_v61 = vld [vmem:[#allocation7 + $0x8] sm:$0xff]  ;;  %10576 = vst [vmem:[#allocation50_spill] sm:$0xff] %v8848_v11  ;;  %v10254_v12 = vsub.s32 0, %v8848_v11  ;;  %v10255_v10 = vsub.s32 2, %v8848_v11 }
 0x17d   : > { %6164 = vmatprep.subr.bf16.mxu1 %v8758_v34  ;;  %10568 = vst [vmem:[#allocation42_spill] sm:$0xff] %v8821_v44  ;;  %10569 = vst [vmem:[#allocation43_spill] sm:$0xff] %v8825_v45  ;;  %v8832_v54 = vpack.c.bf16 %v791_v49, %v787_v48  ;;  %v8835_v56 = vpack.c.bf16 %v800_v53, %v796_v50  ;;  %v795_v57 = vld [vmem:[#allocation5 + $0x1d0] sm:$0xff]  ;;  %v806_v62 = vld [vmem:[#allocation7 + $0x28] sm:$0xff] }
 0x17e   : > { %10565 = vst [vmem:[#allocation39_spill] sm:$0xff] %v8812_v31  ;;  %10570 = vst [vmem:[#allocation44_spill] sm:$0xff] %v8828_v47  ;;  %v799_v59 = vld [vmem:[#allocation5 + $0x1f0] sm:$0xff]  ;;  %v804_v3 = vld [vmem:[#allocation7 + $0x18] sm:$0xff]  ;;  %v8842_v4 = vpack.c.bf16 %v806_v62, %v802_v61 }
 0x17f   : > { %6138 = vmatpush1.bf16.msra.mxu0 %v8751_v27  ;;  %5583 = vmatmul.mubr.f32.vlgmr.msra.gmra.mrb[0].mxu1 %v736_v15  ;;  %v8800_v15 = vpack.c.bf16 %v790_v8, %v786_v6  ;;  %10571 = vst [vmem:[#allocation45_spill] sm:$0xff] %v8832_v54  ;;  %10572 = vst [vmem:[#allocation46_spill] sm:$0xff] %v8835_v56  ;;  %v8838_v60 = vpack.c.bf16 %v799_v59, %v795_v57  ;;  %v808_v6 = vld [vmem:[#allocation7 + $0x38] sm:$0xff]  ;;  %v8854_v13 = vld [vmem:[%s10577_s7] sm:$0x7] }
 0x180   : > { %6140 = vmatprep.subr.bf16.mxu0 %v8755_v28  ;;  %6166 = vmatpush1.bf16.msra.mxu1 %v8766_v43  ;;  %10574 = vst [vmem:[#allocation48_spill] sm:$0xff] %v8842_v4  ;;  %v8844_v8 = vpack.c.bf16 %v808_v6, %v804_v3  ;;  %v801_v18 = vld [vmem:[#allocation7] sm:$0xff]  ;;  %v1254_v21 = vrot.slane %v8854_v13, %v10254_v12  ;;  %v803_v22 = vld [vmem:[#allocation7 + $0x10] sm:$0xff]  ;;  %v810_v25 = vld [vmem:[#allocation7 + $0x48] sm:$0xff] }
 0x181   : > { %1542 = vmatprep.mubr.f32.mxu1 %v10258_v0  ;;  %6168 = vmatprep.subr.bf16.mxu1 %v8769_v46  ;;  %10561 = vst [vmem:[#allocation35_spill] sm:$0xff] %v8800_v15  ;;  %10573 = vst [vmem:[#allocation47_spill] sm:$0xff] %v8838_v60  ;;  %v805_v19 = vld [vmem:[#allocation7 + $0x20] sm:$0xff]  ;;  %v807_v24 = vld [vmem:[#allocation7 + $0x30] sm:$0xff] }
 0x182   : > { %10575 = vst [vmem:[#allocation49_spill] sm:$0xff] %v8844_v8  ;;  %v814_v26 = vld [vmem:[#allocation7 + $0x68] sm:$0xff]  ;;  %v812_v29 = vld [vmem:[#allocation7 + $0x58] sm:$0xff]  ;;  %v8859_v37 = vpack.c.bf16 %v805_v19, %v801_v18  ;;  %v8861_v38 = vpack.c.bf16 %v807_v24, %v803_v22  ;;  %v809_v41 = vld [vmem:[#allocation7 + $0x40] sm:$0xff] }
 0x183   : > { %6142 = vmatpush1.bf16.msra.mxu0 %v8761_v39  ;;  %v816_v32 = vld [vmem:[#allocation7 + $0x78] sm:$0xff]  ;;  %v813_v42 = vld [vmem:[#allocation7 + $0x60] sm:$0xff]  ;;  %v8865_v50 = vpack.c.bf16 %v814_v26, %v810_v25  ;;  %v811_v57 = vld [vmem:[#allocation7 + $0x50] sm:$0xff] }
 0x184   : > { %6144 = vmatprep.subr.bf16.mxu0 %v8764_v40  ;;  %6170 = vmatpush1.bf16.msra.mxu1 %v8778_v55  ;;  %10578 = vst [vmem:[#allocation51_spill] sm:$0xff] %v8859_v37  ;;  %10579 = vst [vmem:[#allocation52_spill] sm:$0xff] %v8861_v38  ;;  %v8867_v53 = vpack.c.bf16 %v816_v32, %v812_v29  ;;  %v815_v59 = vld [vmem:[#allocation7 + $0x70] sm:$0xff]  ;;  %v818_v61 = vld [vmem:[#allocation7 + $0x88] sm:$0xff]  ;;  %v8872_v18 = vpack.c.bf16 %v813_v42, %v809_v41 }
 0x185   : > { %6172 = vmatprep.subr.bf16.mxu1 %v8782_v58  ;;  %10580 = vst [vmem:[#allocation53_spill] sm:$0xff] %v8865_v50  ;;  %v822_v62 = vld [vmem:[#allocation7 + $0xa8] sm:$0xff]  ;;  %v820_v3 = vld [vmem:[#allocation7 + $0x98] sm:$0xff]  ;;  %v8874_v19 = vpack.c.bf16 %v815_v59, %v811_v57  ;;  %v821_v22 = vld [vmem:[#allocation7 + $0xa0] sm:$0xff]  ;;  %v1262_v41 = vrot.slane %v8854_v13, %v10255_v10 }
 0x186   : > { %10581 = vst [vmem:[#allocation54_spill] sm:$0xff] %v8867_v53  ;;  %v824_v6 = vld [vmem:[#allocation7 + $0xb8] sm:$0xff]  ;;  %10582 = vst [vmem:[#allocation55_spill] sm:$0xff] %v8872_v18  ;;  %v8878_v24 = vpack.c.bf16 %v822_v62, %v818_v61  ;;  %v819_v26 = vld [vmem:[#allocation7 + $0x90] sm:$0xff] }
 0x187   : > { %6146 = vmatpush1.bf16.msra.mxu0 %v8772_v51  ;;  %10583 = vst [vmem:[#allocation56_spill] sm:$0xff] %v8874_v19  ;;  %v8880_v25 = vpack.c.bf16 %v824_v6, %v820_v3  ;;  %v823_v29 = vld [vmem:[#allocation7 + $0xb0] sm:$0xff]  ;;  %v826_v32 = vld [vmem:[#allocation7 + $0xc8] sm:$0xff]  ;;  %v832_v12 = vld [vmem:[#allocation7 + $0xf8] sm:$0xff] }
 0x188   : > { %6148 = vmatprep.subr.bf16.mxu0 %v8775_v52  ;;  %6174 = vmatpush1.bf16.msra.mxu1 %v8791_v5  ;;  %10584 = vst [vmem:[#allocation57_spill] sm:$0xff] %v8878_v24  ;;  %v8891_v57 = vpack.c.bf16 %v823_v29, %v819_v26  ;;  %v825_v59 = vld [vmem:[#allocation7 + $0xc0] sm:$0xff]  ;;  %v827_v6 = vld [vmem:[#allocation7 + $0xd0] sm:$0xff]  ;;  %v834_v1 = vld [vmem:[#allocation7 + $0x108] sm:$0xff] }
 0x189   : > { %6176 = vmatprep.subr.bf16.mxu1 %v8794_v9  ;;  %10585 = vst [vmem:[#allocation58_spill] sm:$0xff] %v8880_v25  ;;  %v829_v61 = vld [vmem:[#allocation7 + $0xe0] sm:$0xff]  ;;  %v831_v10 = vld [vmem:[#allocation7 + $0xf0] sm:$0xff] }
 0x18a   : > { %10587 = vst [vmem:[#allocation60_spill] sm:$0xff] %v8891_v57  ;;  %v8903_v29 = vpack.c.bf16 %v829_v61, %v825_v59  ;;  %v841_v61 = vld [vmem:[#allocation7 + $0x140] sm:$0xff]  ;;  %v1183_v52 = vld [vmem:[#allocation10 + $0x1f0] sm:$0xff] }
 0x18b   : > { %6150 = vmatpush1.bf16.msra.mxu0 %v8785_v63  ;;  %v864_v63 = vld [vmem:[#allocation7 + $0x1f8] sm:$0xff] }
 0x18c   : > { %6152 = vmatprep.subr.bf16.mxu0 %v8788_v2  ;;  %6178 = vmatpush1.bf16.msra.mxu1 %v8803_v20  ;;  %10590 = vst [vmem:[#allocation63_spill] sm:$0xff] %v8903_v29  ;;  %v862_v2 = vld [vmem:[#allocation7 + $0x1e8] sm:$0xff]  ;;  %v1184_v20 = vld [vmem:[#allocation10 + $0x1f8] sm:$0xff] }
 0x18d   : > { %6180 = vmatprep.subr.bf16.mxu1 %v8806_v23  ;;  %v863_v23 = vld [vmem:[#allocation7 + $0x1f0] sm:$0xff] }
 0x18f   : > { %6154 = vmatpush1.bf16.msra.mxu0 %v8797_v14  ;;  %v856_v14 = vld [vmem:[#allocation7 + $0x1b8] sm:$0xff] }
 0x190   : > { %6156 = vmatprep.subr.bf16.mxu0 %v8800_v15  ;;  %6182 = vmatpush1.bf16.msra.mxu1 %v8815_v35  ;;  %v854_v15 = vld [vmem:[#allocation7 + $0x1a8] sm:$0xff]  ;;  %v860_v35 = vld [vmem:[#allocation7 + $0x1d8] sm:$0xff] }
 0x191   : > { %6184 = vmatprep.subr.bf16.mxu1 %v8818_v36  ;;  %v858_v36 = vld [vmem:[#allocation7 + $0x1c8] sm:$0xff] }
 0x193   : > { %6158 = vmatpush1.bf16.msra.mxu0 %v8809_v30  ;;  %v848_v30 = vld [vmem:[#allocation7 + $0x178] sm:$0xff] }
 0x194   : > { %6160 = vmatprep.subr.bf16.mxu0 %v8812_v31  ;;  %6186 = vmatpush1.bf16.msra.mxu1 %v8825_v45  ;;  %v846_v31 = vld [vmem:[#allocation7 + $0x168] sm:$0xff]  ;;  %v852_v45 = vld [vmem:[#allocation7 + $0x198] sm:$0xff] }
 0x195   : > { %6188 = vmatprep.subr.bf16.mxu1 %v8828_v47  ;;  %v850_v47 = vld [vmem:[#allocation7 + $0x188] sm:$0xff] }
 0x197   : > { %6162 = vmatpush1.bf16.msra.mxu0 %v8821_v44  ;;  %v840_v44 = vld [vmem:[#allocation7 + $0x138] sm:$0xff] }
 0x198   : > { %6190 = vmatpush1.bf16.msra.mxu1 %v8832_v54  ;;  %6196 = vmatprep.subr.bf16.mxu0 %v8842_v4  ;;  %v844_v54 = vld [vmem:[#allocation7 + $0x158] sm:$0xff] }
 0x199   : > { %6192 = vmatprep.subr.bf16.mxu1 %v8835_v56 }
 0x19c   : > { %6194 = vmatpush1.bf16.msra.mxu1 %v8838_v60  ;;  %v836_v60 = vld [vmem:[#allocation7 + $0x118] sm:$0xff] }
 0x19d   : > { %6228 = vmatprep.subr.bf16.mxu1 %v8844_v8  ;;  %v8911_v56 = vpack.c.bf16 %v840_v44, %v836_v60  ;;  %v843_v44 = vld [vmem:[#allocation7 + $0x150] sm:$0xff] }
 0x19e   : > { %v847_v60 = vld [vmem:[#allocation7 + $0x170] sm:$0xff] }
 0x19f   : > { %10593 = vst [vmem:[#allocation66_spill] sm:$0xff] %v8911_v56 }
 0x24d   : > { %v1332_v33 = vpop.f32.mrb[0].mxu0 }
 0x24e   : > { %v1333_v48 = vadd.f32 %v1332_v33, %v1254_v21  ;;  %v8863_v49 = vpop.f32.mrb[1].mxu0  ;;  %v817_v21 = vld [vmem:[#allocation7 + $0x80] sm:$0xff]  ;;  %v830_v33 = vld [vmem:[#allocation7 + $0xe8] sm:$0xff] }
 0x24f   : > { %v8889_v42 = vpack.c.bf16 %v821_v22, %v817_v21  ;;  %v8895_v62 = vpack.c.bf16 %v830_v33, %v826_v32  ;;  %v8905_v32 = vpack.c.bf16 %v831_v10, %v827_v6  ;;  %v837_v33 = vld [vmem:[#allocation7 + $0x120] sm:$0xff] }
 0x250   : > { %1472 = vmatmul.mubr.f32.vlgmr.msra.gmra.mrb[2].mxu0 %v1333_v48  ;;  %1543 = vmatmul.mubr.f32.vlgmr.msra.gmra.mrb[2].mxu1 %v1333_v48  ;;  %v828_v48 = vld [vmem:[#allocation7 + $0xd8] sm:$0xff]  ;;  %v845_v6 = vld [vmem:[#allocation7 + $0x160] sm:$0xff] }
 0x251   : > { %6198 = vmatpush1.bf16.msra.mxu0 %v8859_v37  ;;  %6230 = vmatpush1.bf16.msra.mxu1 %v8861_v38  ;;  %10586 = vst [vmem:[#allocation59_spill] sm:$0xff] %v8889_v42  ;;  %10588 = vst [vmem:[#allocation61_spill] sm:$0xff] %v8895_v62  ;;  %v8897_v3 = vpack.c.bf16 %v832_v12, %v828_v48  ;;  %v833_v12 = vld [vmem:[#allocation7 + $0x100] sm:$0xff] }
 0x252   : > { %6200 = vmatprep.subr.bf16.mxu0 %v8865_v50  ;;  %6232 = vmatprep.subr.bf16.mxu1 %v8867_v53  ;;  %v1403_v21 = vpop.f32.mrb[0].mxu1  ;;  %10591 = vst [vmem:[#allocation64_spill] sm:$0xff] %v8905_v32  ;;  %v8915_v10 = vpack.c.bf16 %v837_v33, %v833_v12  ;;  %v8927_v12 = vpack.c.bf16 %v845_v6, %v841_v61 }
 0x253   : > { %1613 = vmatprep.mubr.f32.mxu0 %v10258_v0  ;;  %1684 = vmatprep.mubr.f32.mxu1 %v10258_v0  ;;  %10589 = vst [vmem:[#allocation62_spill] sm:$0xff] %v8897_v3  ;;  %v838_v0 = vld [vmem:[#allocation7 + $0x128] sm:$0xff]  ;;  %v8899_v22 = vadd.f32 %v1403_v21, %v1262_v41  ;;  %v5584_v26 = vpop.f32.mrb[1].mxu1  ;;  %v835_v41 = vld [vmem:[#allocation7 + $0x110] sm:$0xff]  ;;  %v8929_v33 = vpack.c.bf16 %v847_v60, %v843_v44  ;;  %v857_v44 = vld [vmem:[#allocation7 + $0x1c0] sm:$0xff] }
 0x254   : > { %v8909_v48 = vpack.c.bf16 %v838_v0, %v834_v1  ;;  %v839_v21 = vld [vmem:[#allocation7 + $0x130] sm:$0xff]  ;;  %v842_v26 = vld [vmem:[#allocation7 + $0x148] sm:$0xff]  ;;  %10594 = vst [vmem:[#allocation67_spill] sm:$0xff] %v8915_v10  ;;  %v8923_v1 = vpack.c.bf16 %v848_v30, %v844_v54  ;;  %10598 = vst [vmem:[#allocation71_spill] sm:$0xff] %v8927_v12  ;;  %v8933_v30 = vpack.c.bf16 %v854_v15, %v850_v47  ;;  %v10275_v15 = vsub.s32 1, %v8848_v11 }
 0x255   : > { %6202 = vmatpush1.bf16.msra.mxu0 %v8872_v18  ;;  %6234 = vmatpush1.bf16.msra.mxu1 %v8874_v19  ;;  %v8917_v59 = vpack.c.bf16 %v839_v21, %v835_v41  ;;  %v8921_v0 = vpack.c.bf16 %v846_v31, %v842_v26  ;;  %10599 = vst [vmem:[#allocation72_spill] sm:$0xff] %v8929_v33  ;;  %v849_v41 = vld [vmem:[#allocation7 + $0x180] sm:$0xff]  ;;  %v851_v54 = vld [vmem:[#allocation7 + $0x190] sm:$0xff] }
 0x256   : > { %6204 = vmatprep.subr.bf16.mxu0 %v8878_v24  ;;  %6236 = vmatprep.subr.bf16.mxu1 %v8880_v25  ;;  %10592 = vst [vmem:[#allocation65_spill] sm:$0xff] %v8909_v48  ;;  %10597 = vst [vmem:[#allocation70_spill] sm:$0xff] %v8923_v1  ;;  %v853_v21 = vld [vmem:[#allocation7 + $0x1a0] sm:$0xff]  ;;  %v8935_v31 = vpack.c.bf16 %v856_v14, %v852_v45  ;;  %v855_v26 = vld [vmem:[#allocation7 + $0x1b0] sm:$0xff]  ;;  %v8946_v14 = vpack.c.bf16 %v862_v2, %v858_v36  ;;  %v10608_v2 = vmov 0.0  }
 0x257   : > { %10595 = vst [vmem:[#allocation68_spill] sm:$0xff] %v8917_v59  ;;  %10596 = vst [vmem:[#allocation69_spill] sm:$0xff] %v8921_v0  ;;  %v8939_v61 = vpack.c.bf16 %v853_v21, %v849_v41  ;;  %v8941_v6 = vpack.c.bf16 %v855_v26, %v851_v54  ;;  %v8948_v45 = vpack.c.bf16 %v864_v63, %v860_v35  ;;  %v861_v47 = vld [vmem:[#allocation7 + $0x1e0] sm:$0xff]  ;;  %v859_v60 = vld [vmem:[#allocation7 + $0x1d0] sm:$0xff] }
 0x258   : > { %10600 = vst [vmem:[#allocation73_spill] sm:$0xff] %v8933_v30  ;;  %10601 = vst [vmem:[#allocation74_spill] sm:$0xff] %v8935_v31  ;;  %v8952_v41 = vpack.c.bf16 %v861_v47, %v857_v44  ;;  %v8954_v21 = vpack.c.bf16 %v863_v23, %v859_v60  ;;  %v1258_v54 = vrot.slane %v8854_v13, %v10275_v15  ;;  %v866_v23 = vld [vmem:[#allocation8 + $0x8] sm:$0xff]  ;;  %v868_v36 = vld [vmem:[#allocation8 + $0x18] sm:$0xff] }
 0x259   : > { %6206 = vmatpush1.bf16.msra.mxu0 %v8889_v42  ;;  %6238 = vmatpush1.bf16.msra.mxu1 %v8891_v57  ;;  %10602 = vst [vmem:[#allocation75_spill] sm:$0xff] %v8939_v61  ;;  %10603 = vst [vmem:[#allocation76_spill] sm:$0xff] %v8941_v6  ;;  %v870_v35 = vld [vmem:[#allocation8 + $0x28] sm:$0xff]  ;;  %v872_v13 = vld [vmem:[#allocation8 + $0x38] sm:$0xff] }
 0x25a   : > { %6208 = vmatprep.subr.bf16.mxu0 %v8895_v62  ;;  %6240 = vmatprep.subr.bf16.mxu1 %v8897_v3  ;;  %10604 = vst [vmem:[#allocation77_spill] sm:$0xff] %v8946_v14  ;;  %10605 = vst [vmem:[#allocation78_spill] sm:$0xff] %v8948_v45  ;;  %v1335_v63 = vadd.f32 %v8863_v49, %v1258_v54  ;;  %v865_v49 = vld [vmem:[#allocation8] sm:$0xff]  ;;  %v8996_v44 = vpack.c.bf16 %v870_v35, %v866_v23  ;;  %v867_v60 = vld [vmem:[#allocation8 + $0x10] sm:$0xff] }
 0x25b   : > { %10606 = vst [vmem:[#allocation79_spill] sm:$0xff] %v8952_v41  ;;  %10607 = vst [vmem:[#allocation80_spill] sm:$0xff] %v8954_v21  ;;  %v869_v26 = vld [vmem:[#allocation8 + $0x20] sm:$0xff]  ;;  %v8998_v47 = vpack.c.bf16 %v872_v13, %v868_v36  ;;  %v871_v54 = vld [vmem:[#allocation8 + $0x30] sm:$0xff] }
 0x25c   : > { %10609 = vst [vmem:[#allocation81_spill] sm:$0xff] %v8996_v44  ;;  %v878_v15 = vld [vmem:[#allocation8 + $0x68] sm:$0xff]  ;;  %v875_v36 = vld [vmem:[#allocation8 + $0x50] sm:$0xff] }
 0x25d   : > { %6210 = vmatpush1.bf16.msra.mxu0 %v8903_v29  ;;  %6242 = vmatpush1.bf16.msra.mxu1 %v8905_v32  ;;  %10610 = vst [vmem:[#allocation82_spill] sm:$0xff] %v8998_v47  ;;  %v879_v13 = vld [vmem:[#allocation8 + $0x70] sm:$0xff] }
 0x25e   : > { %6212 = vmatprep.subr.bf16.mxu0 %v8909_v48  ;;  %6244 = vmatprep.subr.bf16.mxu1 %v8911_v56  ;;  %v1151_v11 = vld [vmem:[#allocation10 + $0xf0] sm:$0xff] }
 0x261   : > { %6214 = vmatpush1.bf16.msra.mxu0 %v8915_v10  ;;  %6246 = vmatpush1.bf16.msra.mxu1 %v8917_v59 }
 0x262   : > { %6216 = vmatprep.subr.bf16.mxu0 %v8921_v0  ;;  %6248 = vmatprep.subr.bf16.mxu1 %v8923_v1 }
 0x265   : > { %6218 = vmatpush1.bf16.msra.mxu0 %v8927_v12  ;;  %6250 = vmatpush1.bf16.msra.mxu1 %v8929_v33 }
 0x266   : > { %6220 = vmatprep.subr.bf16.mxu0 %v8933_v30  ;;  %6252 = vmatprep.subr.bf16.mxu1 %v8935_v31 }
 0x269   : > { %6222 = vmatpush1.bf16.msra.mxu0 %v8939_v61  ;;  %6254 = vmatpush1.bf16.msra.mxu1 %v8941_v6 }
 0x26a   : > { %6224 = vmatprep.subr.bf16.mxu0 %v8946_v14  ;;  %6256 = vmatprep.subr.bf16.mxu1 %v8948_v45 }
 0x26d   : > { %6226 = vmatpush1.bf16.msra.mxu0 %v8952_v41  ;;  %6258 = vmatpush1.bf16.msra.mxu1 %v8954_v21 }
 0x26e   : > { %6260 = vmatprep.subr.bf16.mxu0 %v8842_v4  ;;  %6292 = vmatprep.subr.bf16.mxu1 %v8844_v8  ;;  %v1152_v4 = vld [vmem:[#allocation10 + $0xf8] sm:$0xff] }
 0x270   : > { %1614 = vmatmul.mubr.f32.vlgmr.msra.gmra.mrb[4].mxu0 %v1335_v63  ;;  %1685 = vmatmul.mubr.f32.vlgmr.msra.gmra.mrb[4].mxu1 %v1335_v63  ;;  %v874_v63 = vld [vmem:[#allocation8 + $0x48] sm:$0xff] }
 0x271   : > { %6262 = vmatpush1.bf16.msra.mxu0 %v8859_v37  ;;  %6294 = vmatpush1.bf16.msra.mxu1 %v8861_v38  ;;  %v9008_v23 = vpack.c.bf16 %v878_v15, %v874_v63  ;;  %v9018_v15 = vpack.c.bf16 %v879_v13, %v875_v36  ;;  %v890_v63 = vld [vmem:[#allocation8 + $0xc8] sm:$0xff]  ;;  %v889_v36 = vld [vmem:[#allocation8 + $0xc0] sm:$0xff]  ;;  %v1179_v38 = vld [vmem:[#allocation10 + $0x1d0] sm:$0xff] }
 0x272   : > { %6264 = vmatprep.subr.bf16.mxu0 %v8865_v50  ;;  %6296 = vmatprep.subr.bf16.mxu1 %v8867_v53  ;;  %v893_v13 = vld [vmem:[#allocation8 + $0xe0] sm:$0xff]  ;;  %v1147_v53 = vld [vmem:[#allocation10 + $0xd0] sm:$0xff]  ;;  %v1148_v50 = vld [vmem:[#allocation10 + $0xd8] sm:$0xff] }
 0x273   : > { %1755 = vmatprep.mubr.f32.mxu0 %v10608_v2  ;;  %1826 = vmatprep.mubr.f32.mxu1 %v10608_v2  ;;  %10613 = vst [vmem:[#allocation85_spill] sm:$0xff] %v9008_v23  ;;  %10616 = vst [vmem:[#allocation88_spill] sm:$0xff] %v9018_v15  ;;  %v9472_v37 = vpack.c.bf16 %v1148_v50, %v1147_v53  ;;  %v1150_v50 = vld [vmem:[#allocation10 + $0xe8] sm:$0xff]  ;;  %v1181_v53 = vld [vmem:[#allocation10 + $0x1e0] sm:$0xff] }
 0x275   : > { %6266 = vmatpush1.bf16.msra.mxu0 %v8872_v18  ;;  %6298 = vmatpush1.bf16.msra.mxu1 %v8874_v19  ;;  %v1162_v19 = vld [vmem:[#allocation10 + $0x148] sm:$0xff] }
 0x276   : > { %6268 = vmatprep.subr.bf16.mxu0 %v8878_v24  ;;  %6300 = vmatprep.subr.bf16.mxu1 %v8880_v25  ;;  %v1161_v25 = vld [vmem:[#allocation10 + $0x140] sm:$0xff] }
 0x277   : > { %v9468_v18 = vpack.c.bf16 %v1162_v19, %v1161_v25  ;;  %v1149_v25 = vld [vmem:[#allocation10 + $0xe0] sm:$0xff] }
 0x279   : > { %6270 = vmatpush1.bf16.msra.mxu0 %v8889_v42  ;;  %6302 = vmatpush1.bf16.msra.mxu1 %v8891_v57  ;;  %v1129_v57 = vld [vmem:[#allocation10 + $0x40] sm:$0xff]  ;;  %v1130_v42 = vld [vmem:[#allocation10 + $0x48] sm:$0xff] }
 0x27a   : > { %6272 = vmatprep.subr.bf16.mxu0 %v8895_v62  ;;  %6304 = vmatprep.subr.bf16.mxu1 %v8897_v3  ;;  %v1178_v3 = vld [vmem:[#allocation10 + $0x1c8] sm:$0xff]  ;;  %v9466_v24 = vpack.c.bf16 %v1130_v42, %v1129_v57  ;;  %v1163_v42 = vld [vmem:[#allocation10 + $0x150] sm:$0xff]  ;;  %v1164_v57 = vld [vmem:[#allocation10 + $0x158] sm:$0xff] }
 0x27b   : > { %v9479_v19 = vpack.c.bf16 %v1164_v57, %v1163_v42  ;;  %v1165_v42 = vld [vmem:[#allocation10 + $0x160] sm:$0xff]  ;;  %v1166_v57 = vld [vmem:[#allocation10 + $0x168] sm:$0xff] }
 0x27c   : > { %v9491_v8 = vpack.c.bf16 %v1166_v57, %v1165_v42  ;;  %v1168_v42 = vld [vmem:[#allocation10 + $0x178] sm:$0xff] }
 0x27d   : > { %6274 = vmatpush1.bf16.msra.mxu0 %v8903_v29  ;;  %6306 = vmatpush1.bf16.msra.mxu1 %v8905_v32  ;;  %v1146_v32 = vld [vmem:[#allocation10 + $0xc8] sm:$0xff]  ;;  %v1177_v29 = vld [vmem:[#allocation10 + $0x1c0] sm:$0xff] }
 0x27e   : > { %6276 = vmatprep.subr.bf16.mxu0 %v8909_v48  ;;  %6308 = vmatprep.subr.bf16.mxu1 %v8911_v56  ;;  %v1016_v56 = vld [vmem:[#allocation8 + $0x4b8] sm:$0xff]  ;;  %v1145_v48 = vld [vmem:[#allocation10 + $0xc0] sm:$0xff]  ;;  %10740 = vst [vmem:[#allocation212_spill] sm:$0xff] %v9491_v8 }
 0x281   : > { %6278 = vmatpush1.bf16.msra.mxu0 %v8915_v10  ;;  %6310 = vmatpush1.bf16.msra.mxu1 %v8917_v59  ;;  %v1007_v59 = vld [vmem:[#allocation8 + $0x470] sm:$0xff]  ;;  %v1010_v10 = vld [vmem:[#allocation8 + $0x488] sm:$0xff] }
 0x282   : > { %6280 = vmatprep.subr.bf16.mxu0 %v8921_v0  ;;  %6312 = vmatprep.subr.bf16.mxu1 %v8923_v1  ;;  %v1005_v1 = vld [vmem:[#allocation8 + $0x460] sm:$0xff]  ;;  %v1003_v0 = vld [vmem:[#allocation8 + $0x450] sm:$0xff] }
 0x285   : > { %6282 = vmatpush1.bf16.msra.mxu0 %v8927_v12  ;;  %6314 = vmatpush1.bf16.msra.mxu1 %v8929_v33  ;;  %v882_v33 = vld [vmem:[#allocation8 + $0x88] sm:$0xff]  ;;  %v884_v12 = vld [vmem:[#allocation8 + $0x98] sm:$0xff] }
 0x286   : > { %6284 = vmatprep.subr.bf16.mxu0 %v8933_v30  ;;  %6316 = vmatprep.subr.bf16.mxu1 %v8935_v31  ;;  %v876_v31 = vld [vmem:[#allocation8 + $0x58] sm:$0xff] }
 0x287   : > { %v880_v30 = vld [vmem:[#allocation8 + $0x78] sm:$0xff] }
 0x288   : > { %v9010_v35 = vpack.c.bf16 %v880_v30, %v876_v31  ;;  %v881_v30 = vld [vmem:[#allocation8 + $0x80] sm:$0xff] }
 0x289   : > { %6286 = vmatpush1.bf16.msra.mxu0 %v8939_v61  ;;  %6318 = vmatpush1.bf16.msra.mxu1 %v8941_v6  ;;  %v9002_v6 = vpack.c.bf16 %v869_v26, %v865_v49  ;;  %v9004_v61 = vpack.c.bf16 %v871_v54, %v867_v60  ;;  %v885_v31 = vld [vmem:[#allocation8 + $0xa0] sm:$0xff]  ;;  %v883_v54 = vld [vmem:[#allocation8 + $0x90] sm:$0xff] }
 0x28a   : > { %6288 = vmatprep.subr.bf16.mxu0 %v8946_v14  ;;  %6320 = vmatprep.subr.bf16.mxu1 %v8948_v45  ;;  %v873_v14 = vld [vmem:[#allocation8 + $0x40] sm:$0xff]  ;;  %10614 = vst [vmem:[#allocation86_spill] sm:$0xff] %v9010_v35 }
 0x28b   : > { %10611 = vst [vmem:[#allocation83_spill] sm:$0xff] %v9002_v6  ;;  %10612 = vst [vmem:[#allocation84_spill] sm:$0xff] %v9004_v61  ;;  %v877_v45 = vld [vmem:[#allocation8 + $0x60] sm:$0xff] }
 0x28c   : > { %v9016_v49 = vpack.c.bf16 %v877_v45, %v873_v14  ;;  %v9028_v14 = vpack.c.bf16 %v885_v31, %v881_v30  ;;  %v9040_v30 = vpack.c.bf16 %v893_v13, %v889_v36 }
 0x28d   : > { %6290 = vmatpush1.bf16.msra.mxu0 %v8952_v41  ;;  %6322 = vmatpush1.bf16.msra.mxu1 %v8954_v21  ;;  %v886_v41 = vld [vmem:[#allocation8 + $0xa8] sm:$0xff]  ;;  %v888_v21 = vld [vmem:[#allocation8 + $0xb8] sm:$0xff] }
 0x28e   : > { %6324 = vmatprep.subr.bf16.mxu0 %v8996_v44  ;;  %6452 = vmatprep.subr.bf16.mxu1 %v8998_v47  ;;  %10615 = vst [vmem:[#allocation87_spill] sm:$0xff] %v9016_v49  ;;  %v9022_v26 = vpack.c.bf16 %v886_v41, %v882_v33  ;;  %v9024_v60 = vpack.c.bf16 %v888_v21, %v884_v12  ;;  %v892_v47 = vld [vmem:[#allocation8 + $0xd8] sm:$0xff]  ;;  %10619 = vst [vmem:[#allocation91_spill] sm:$0xff] %v9028_v14  ;;  %v891_v41 = vld [vmem:[#allocation8 + $0xd0] sm:$0xff] }
 0x28f   : > { %v895_v21 = vld [vmem:[#allocation8 + $0xf0] sm:$0xff]  ;;  %10623 = vst [vmem:[#allocation95_spill] sm:$0xff] %v9040_v30  ;;  %v1001_v44 = vld [vmem:[#allocation8 + $0x440] sm:$0xff] }
 0x290   : > { %1756 = vmatmul.mubr.f32.vlgmr.msra.gmra.mrb[6].mxu0 %v8899_v22  ;;  %1827 = vmatmul.mubr.f32.vlgmr.msra.gmra.mrb[6].mxu1 %v8899_v22  ;;  %10617 = vst [vmem:[#allocation89_spill] sm:$0xff] %v9022_v26  ;;  %10618 = vst [vmem:[#allocation90_spill] sm:$0xff] %v9024_v60  ;;  %v887_v22 = vld [vmem:[#allocation8 + $0xb0] sm:$0xff]  ;;  %v9042_v31 = vpack.c.bf16 %v895_v21, %v891_v41  ;;  %v905_v41 = vld [vmem:[#allocation8 + $0x140] sm:$0xff] }
 0x291   : > { %6326 = vmatpush1.bf16.msra.mxu0 %v9002_v6  ;;  %6454 = vmatpush1.bf16.msra.mxu1 %v9004_v61  ;;  %v894_v6 = vld [vmem:[#allocation8 + $0xe8] sm:$0xff]  ;;  %v896_v61 = vld [vmem:[#allocation8 + $0xf8] sm:$0xff]  ;;  %v9030_v45 = vpack.c.bf16 %v887_v22, %v883_v54  ;;  %v897_v54 = vld [vmem:[#allocation8 + $0x100] sm:$0xff] }
 0x292   : > { %6328 = vmatprep.subr.bf16.mxu0 %v9008_v23  ;;  %6456 = vmatprep.subr.bf16.mxu1 %v9010_v35  ;;  %v9034_v12 = vpack.c.bf16 %v894_v6, %v890_v63  ;;  %v9036_v33 = vpack.c.bf16 %v896_v61, %v892_v47  ;;  %v898_v35 = vld [vmem:[#allocation8 + $0x108] sm:$0xff]  ;;  %v900_v23 = vld [vmem:[#allocation8 + $0x118] sm:$0xff]  ;;  %10624 = vst [vmem:[#allocation96_spill] sm:$0xff] %v9042_v31  ;;  %v901_v22 = vld [vmem:[#allocation8 + $0x120] sm:$0xff] }
 0x293   : > { %10620 = vst [vmem:[#allocation92_spill] sm:$0xff] %v9030_v45  ;;  %v899_v47 = vld [vmem:[#allocation8 + $0x110] sm:$0xff]  ;;  %v9052_v36 = vpack.c.bf16 %v901_v22, %v897_v54  ;;  %v909_v21 = vld [vmem:[#allocation8 + $0x160] sm:$0xff] }
 0x294   : > { %10621 = vst [vmem:[#allocation93_spill] sm:$0xff] %v9034_v12  ;;  %10622 = vst [vmem:[#allocation94_spill] sm:$0xff] %v9036_v33  ;;  %v903_v63 = vld [vmem:[#allocation8 + $0x130] sm:$0xff]  ;;  %v9064_v54 = vpack.c.bf16 %v909_v21, %v905_v41 }
 0x295   : > { %6330 = vmatpush1.bf16.msra.mxu0 %v9016_v49  ;;  %6458 = vmatpush1.bf16.msra.mxu1 %v9018_v15  ;;  %v902_v49 = vld [vmem:[#allocation8 + $0x128] sm:$0xff]  ;;  %v904_v15 = vld [vmem:[#allocation8 + $0x138] sm:$0xff]  ;;  %10627 = vst [vmem:[#allocation99_spill] sm:$0xff] %v9052_v36  ;;  %v9054_v13 = vpack.c.bf16 %v903_v63, %v899_v47  ;;  %v913_v47 = vld [vmem:[#allocation8 + $0x180] sm:$0xff] }
 0x296   : > { %6332 = vmatprep.subr.bf16.mxu0 %v9022_v26  ;;  %6460 = vmatprep.subr.bf16.mxu1 %v9024_v60  ;;  %v9046_v61 = vpack.c.bf16 %v902_v49, %v898_v35  ;;  %v9048_v6 = vpack.c.bf16 %v904_v15, %v900_v23  ;;  %v906_v60 = vld [vmem:[#allocation8 + $0x148] sm:$0xff]  ;;  %v908_v26 = vld [vmem:[#allocation8 + $0x158] sm:$0xff]  ;;  %v907_v49 = vld [vmem:[#allocation8 + $0x150] sm:$0xff]  ;;  %10631 = vst [vmem:[#allocation103_spill] sm:$0xff] %v9064_v54 }
 0x297   : > { %10628 = vst [vmem:[#allocation100_spill] sm:$0xff] %v9054_v13  ;;  %v911_v15 = vld [vmem:[#allocation8 + $0x170] sm:$0xff]  ;;  %v917_v63 = vld [vmem:[#allocation8 + $0x1a0] sm:$0xff] }
 0x298   : > { %10625 = vst [vmem:[#allocation97_spill] sm:$0xff] %v9046_v61  ;;  %10626 = vst [vmem:[#allocation98_spill] sm:$0xff] %v9048_v6  ;;  %v9066_v22 = vpack.c.bf16 %v911_v15, %v907_v49  ;;  %v9076_v41 = vpack.c.bf16 %v917_v63, %v913_v47  ;;  %v921_v49 = vld [vmem:[#allocation8 + $0x1c0] sm:$0xff] }
 0x299   : > { %6334 = vmatpush1.bf16.msra.mxu0 %v9028_v14  ;;  %6462 = vmatpush1.bf16.msra.mxu1 %v9030_v45  ;;  %v910_v14 = vld [vmem:[#allocation8 + $0x168] sm:$0xff]  ;;  %v912_v45 = vld [vmem:[#allocation8 + $0x178] sm:$0xff]  ;;  %v925_v15 = vld [vmem:[#allocation8 + $0x1e0] sm:$0xff] }
 0x29a   : > { %6336 = vmatprep.subr.bf16.mxu0 %v9034_v12  ;;  %6464 = vmatprep.subr.bf16.mxu1 %v9036_v33  ;;  %v9058_v23 = vpack.c.bf16 %v910_v14, %v906_v60  ;;  %v9060_v35 = vpack.c.bf16 %v912_v45, %v908_v26  ;;  %v914_v33 = vld [vmem:[#allocation8 + $0x188] sm:$0xff]  ;;  %v916_v12 = vld [vmem:[#allocation8 + $0x198] sm:$0xff]  ;;  %10632 = vst [vmem:[#allocation104_spill] sm:$0xff] %v9066_v22  ;;  %v915_v14 = vld [vmem:[#allocation8 + $0x190] sm:$0xff] }
 0x29b   : > { %v919_v45 = vld [vmem:[#allocation8 + $0x1b0] sm:$0xff]  ;;  %10635 = vst [vmem:[#allocation107_spill] sm:$0xff] %v9076_v41  ;;  %v9088_v47 = vpack.c.bf16 %v925_v15, %v921_v49 }
 0x29c   : > { %10629 = vst [vmem:[#allocation101_spill] sm:$0xff] %v9058_v23  ;;  %10630 = vst [vmem:[#allocation102_spill] sm:$0xff] %v9060_v35  ;;  %v9078_v21 = vpack.c.bf16 %v919_v45, %v915_v14  ;;  %v929_v14 = vld [vmem:[#allocation8 + $0x200] sm:$0xff] }
 0x29d   : > { %6338 = vmatpush1.bf16.msra.mxu0 %v9040_v30  ;;  %6466 = vmatpush1.bf16.msra.mxu1 %v9042_v31  ;;  %v918_v30 = vld [vmem:[#allocation8 + $0x1a8] sm:$0xff]  ;;  %v920_v31 = vld [vmem:[#allocation8 + $0x1b8] sm:$0xff]  ;;  %10639 = vst [vmem:[#allocation111_spill] sm:$0xff] %v9088_v47  ;;  %v933_v45 = vld [vmem:[#allocation8 + $0x220] sm:$0xff] }
 0x29e   : > { %6340 = vmatprep.subr.bf16.mxu0 %v9046_v61  ;;  %6468 = vmatprep.subr.bf16.mxu1 %v9048_v6  ;;  %v9070_v26 = vpack.c.bf16 %v918_v30, %v914_v33  ;;  %v9072_v60 = vpack.c.bf16 %v920_v31, %v916_v12  ;;  %v922_v6 = vld [vmem:[#allocation8 + $0x1c8] sm:$0xff]  ;;  %v924_v61 = vld [vmem:[#allocation8 + $0x1d8] sm:$0xff]  ;;  %10636 = vst [vmem:[#allocation108_spill] sm:$0xff] %v9078_v21  ;;  %v923_v30 = vld [vmem:[#allocation8 + $0x1d0] sm:$0xff] }
 0x29f   : > { %v927_v31 = vld [vmem:[#allocation8 + $0x1f0] sm:$0xff]  ;;  %v9100_v49 = vpack.c.bf16 %v933_v45, %v929_v14 }
 0x2a0   : > { %10633 = vst [vmem:[#allocation105_spill] sm:$0xff] %v9070_v26  ;;  %10634 = vst [vmem:[#allocation106_spill] sm:$0xff] %v9072_v60  ;;  %v9090_v63 = vpack.c.bf16 %v927_v31, %v923_v30  ;;  %v937_v30 = vld [vmem:[#allocation8 + $0x240] sm:$0xff] }
 0x2a1   : > { %6342 = vmatpush1.bf16.msra.mxu0 %v9052_v36  ;;  %6470 = vmatpush1.bf16.msra.mxu1 %v9054_v13  ;;  %v926_v36 = vld [vmem:[#allocation8 + $0x1e8] sm:$0xff]  ;;  %v928_v13 = vld [vmem:[#allocation8 + $0x1f8] sm:$0xff]  ;;  %10643 = vst [vmem:[#allocation115_spill] sm:$0xff] %v9100_v49  ;;  %v941_v31 = vld [vmem:[#allocation8 + $0x260] sm:$0xff] }
 0x2a2   : > { %6344 = vmatprep.subr.bf16.mxu0 %v9058_v23  ;;  %6472 = vmatprep.subr.bf16.mxu1 %v9060_v35  ;;  %v9082_v12 = vpack.c.bf16 %v926_v36, %v922_v6  ;;  %v9084_v33 = vpack.c.bf16 %v928_v13, %v924_v61  ;;  %v930_v35 = vld [vmem:[#allocation8 + $0x208] sm:$0xff]  ;;  %v932_v23 = vld [vmem:[#allocation8 + $0x218] sm:$0xff]  ;;  %10640 = vst [vmem:[#allocation112_spill] sm:$0xff] %v9090_v63  ;;  %v931_v36 = vld [vmem:[#allocation8 + $0x210] sm:$0xff] }
 0x2a3   : > { %v935_v13 = vld [vmem:[#allocation8 + $0x230] sm:$0xff]  ;;  %v9112_v14 = vpack.c.bf16 %v941_v31, %v937_v30 }
 0x2a4   : > { %10637 = vst [vmem:[#allocation109_spill] sm:$0xff] %v9082_v12  ;;  %10638 = vst [vmem:[#allocation110_spill] sm:$0xff] %v9084_v33  ;;  %v9102_v15 = vpack.c.bf16 %v935_v13, %v931_v36  ;;  %v945_v36 = vld [vmem:[#allocation8 + $0x280] sm:$0xff] }
 0x2a5   : > { %6346 = vmatpush1.bf16.msra.mxu0 %v9064_v54  ;;  %6474 = vmatpush1.bf16.msra.mxu1 %v9066_v22  ;;  %v934_v54 = vld [vmem:[#allocation8 + $0x228] sm:$0xff]  ;;  %v936_v22 = vld [vmem:[#allocation8 + $0x238] sm:$0xff]  ;;  %10647 = vst [vmem:[#allocation119_spill] sm:$0xff] %v9112_v14  ;;  %v949_v13 = vld [vmem:[#allocation8 + $0x2a0] sm:$0xff] }
 0x2a6   : > { %6348 = vmatprep.subr.bf16.mxu0 %v9070_v26  ;;  %6476 = vmatprep.subr.bf16.mxu1 %v9072_v60  ;;  %v9094_v61 = vpack.c.bf16 %v934_v54, %v930_v35  ;;  %v9096_v6 = vpack.c.bf16 %v936_v22, %v932_v23  ;;  %v938_v60 = vld [vmem:[#allocation8 + $0x248] sm:$0xff]  ;;  %v940_v26 = vld [vmem:[#allocation8 + $0x258] sm:$0xff]  ;;  %10644 = vst [vmem:[#allocation116_spill] sm:$0xff] %v9102_v15  ;;  %v939_v54 = vld [vmem:[#allocation8 + $0x250] sm:$0xff] }
 0x2a7   : > { %v943_v22 = vld [vmem:[#allocation8 + $0x270] sm:$0xff]  ;;  %v9124_v30 = vpack.c.bf16 %v949_v13, %v945_v36 }
 0x2a8   : > { %10641 = vst [vmem:[#allocation113_spill] sm:$0xff] %v9094_v61  ;;  %10642 = vst [vmem:[#allocation114_spill] sm:$0xff] %v9096_v6  ;;  %v9114_v45 = vpack.c.bf16 %v943_v22, %v939_v54  ;;  %v953_v54 = vld [vmem:[#allocation8 + $0x2c0] sm:$0xff] }
 0x2a9   : > { %6350 = vmatpush1.bf16.msra.mxu0 %v9076_v41  ;;  %6478 = vmatpush1.bf16.msra.mxu1 %v9078_v21  ;;  %v942_v41 = vld [vmem:[#allocation8 + $0x268] sm:$0xff]  ;;  %v944_v21 = vld [vmem:[#allocation8 + $0x278] sm:$0xff]  ;;  %10651 = vst [vmem:[#allocation123_spill] sm:$0xff] %v9124_v30  ;;  %v957_v22 = vld [vmem:[#allocation8 + $0x2e0] sm:$0xff] }
 0x2aa   : > { %6352 = vmatprep.subr.bf16.mxu0 %v9082_v12  ;;  %6480 = vmatprep.subr.bf16.mxu1 %v9084_v33  ;;  %v9106_v23 = vpack.c.bf16 %v942_v41, %v938_v60  ;;  %v9108_v35 = vpack.c.bf16 %v944_v21, %v940_v26  ;;  %v946_v33 = vld [vmem:[#allocation8 + $0x288] sm:$0xff]  ;;  %v948_v12 = vld [vmem:[#allocation8 + $0x298] sm:$0xff]  ;;  %10648 = vst [vmem:[#allocation120_spill] sm:$0xff] %v9114_v45  ;;  %v947_v41 = vld [vmem:[#allocation8 + $0x290] sm:$0xff] }
 0x2ab   : > { %v951_v21 = vld [vmem:[#allocation8 + $0x2b0] sm:$0xff]  ;;  %v9136_v36 = vpack.c.bf16 %v957_v22, %v953_v54 }
 0x2ac   : > { %10645 = vst [vmem:[#allocation117_spill] sm:$0xff] %v9106_v23  ;;  %10646 = vst [vmem:[#allocation118_spill] sm:$0xff] %v9108_v35  ;;  %v9126_v31 = vpack.c.bf16 %v951_v21, %v947_v41  ;;  %v961_v41 = vld [vmem:[#allocation8 + $0x300] sm:$0xff] }
 0x2ad   : > { %6354 = vmatpush1.bf16.msra.mxu0 %v9088_v47  ;;  %6482 = vmatpush1.bf16.msra.mxu1 %v9090_v63  ;;  %v950_v47 = vld [vmem:[#allocation8 + $0x2a8] sm:$0xff]  ;;  %v952_v63 = vld [vmem:[#allocation8 + $0x2b8] sm:$0xff]  ;;  %10655 = vst [vmem:[#allocation127_spill] sm:$0xff] %v9136_v36  ;;  %v965_v21 = vld [vmem:[#allocation8 + $0x320] sm:$0xff] }
 0x2ae   : > { %6356 = vmatprep.subr.bf16.mxu0 %v9094_v61  ;;  %6484 = vmatprep.subr.bf16.mxu1 %v9096_v6  ;;  %v9118_v26 = vpack.c.bf16 %v950_v47, %v946_v33  ;;  %v9120_v60 = vpack.c.bf16 %v952_v63, %v948_v12  ;;  %v954_v6 = vld [vmem:[#allocation8 + $0x2c8] sm:$0xff]  ;;  %v956_v61 = vld [vmem:[#allocation8 + $0x2d8] sm:$0xff]  ;;  %10652 = vst [vmem:[#allocation124_spill] sm:$0xff] %v9126_v31  ;;  %v955_v47 = vld [vmem:[#allocation8 + $0x2d0] sm:$0xff] }
 0x2af   : > { %v959_v63 = vld [vmem:[#allocation8 + $0x2f0] sm:$0xff]  ;;  %v9148_v54 = vpack.c.bf16 %v965_v21, %v961_v41 }
 0x2b0   : > { %10649 = vst [vmem:[#allocation121_spill] sm:$0xff] %v9118_v26  ;;  %10650 = vst [vmem:[#allocation122_spill] sm:$0xff] %v9120_v60  ;;  %v9138_v13 = vpack.c.bf16 %v959_v63, %v955_v47  ;;  %v969_v47 = vld [vmem:[#allocation8 + $0x340] sm:$0xff] }
 0x2b1   : > { %6358 = vmatpush1.bf16.msra.mxu0 %v9100_v49  ;;  %6486 = vmatpush1.bf16.msra.mxu1 %v9102_v15  ;;  %v958_v49 = vld [vmem:[#allocation8 + $0x2e8] sm:$0xff]  ;;  %v960_v15 = vld [vmem:[#allocation8 + $0x2f8] sm:$0xff]  ;;  %10659 = vst [vmem:[#allocation131_spill] sm:$0xff] %v9148_v54  ;;  %v973_v63 = vld [vmem:[#allocation8 + $0x360] sm:$0xff] }
 0x2b2   : > { %6360 = vmatprep.subr.bf16.mxu0 %v9106_v23  ;;  %6488 = vmatprep.subr.bf16.mxu1 %v9108_v35  ;;  %v9130_v12 = vpack.c.bf16 %v958_v49, %v954_v6  ;;  %v9132_v33 = vpack.c.bf16 %v960_v15, %v956_v61  ;;  %v962_v35 = vld [vmem:[#allocation8 + $0x308] sm:$0xff]  ;;  %v964_v23 = vld [vmem:[#allocation8 + $0x318] sm:$0xff]  ;;  %10656 = vst [vmem:[#allocation128_spill] sm:$0xff] %v9138_v13  ;;  %v963_v49 = vld [vmem:[#allocation8 + $0x310] sm:$0xff] }
 0x2b3   : > { %v967_v15 = vld [vmem:[#allocation8 + $0x330] sm:$0xff]  ;;  %v9160_v41 = vpack.c.bf16 %v973_v63, %v969_v47 }
 0x2b4   : > { %10653 = vst [vmem:[#allocation125_spill] sm:$0xff] %v9130_v12  ;;  %10654 = vst [vmem:[#allocation126_spill] sm:$0xff] %v9132_v33  ;;  %v9150_v22 = vpack.c.bf16 %v967_v15, %v963_v49  ;;  %v977_v49 = vld [vmem:[#allocation8 + $0x380] sm:$0xff] }
 0x2b5   : > { %6362 = vmatpush1.bf16.msra.mxu0 %v9112_v14  ;;  %6490 = vmatpush1.bf16.msra.mxu1 %v9114_v45  ;;  %v966_v14 = vld [vmem:[#allocation8 + $0x328] sm:$0xff]  ;;  %v968_v45 = vld [vmem:[#allocation8 + $0x338] sm:$0xff]  ;;  %10663 = vst [vmem:[#allocation135_spill] sm:$0xff] %v9160_v41  ;;  %v981_v15 = vld [vmem:[#allocation8 + $0x3a0] sm:$0xff] }
 0x2b6   : > { %6364 = vmatprep.subr.bf16.mxu0 %v9118_v26  ;;  %6492 = vmatprep.subr.bf16.mxu1 %v9120_v60  ;;  %v9142_v61 = vpack.c.bf16 %v966_v14, %v962_v35  ;;  %v9144_v6 = vpack.c.bf16 %v968_v45, %v964_v23  ;;  %v970_v60 = vld [vmem:[#allocation8 + $0x348] sm:$0xff]  ;;  %v972_v26 = vld [vmem:[#allocation8 + $0x358] sm:$0xff]  ;;  %10660 = vst [vmem:[#allocation132_spill] sm:$0xff] %v9150_v22  ;;  %v971_v14 = vld [vmem:[#allocation8 + $0x350] sm:$0xff] }
 0x2b7   : > { %v975_v45 = vld [vmem:[#allocation8 + $0x370] sm:$0xff]  ;;  %v9172_v47 = vpack.c.bf16 %v981_v15, %v977_v49 }
 0x2b8   : > { %10657 = vst [vmem:[#allocation129_spill] sm:$0xff] %v9142_v61  ;;  %10658 = vst [vmem:[#allocation130_spill] sm:$0xff] %v9144_v6  ;;  %v9162_v21 = vpack.c.bf16 %v975_v45, %v971_v14  ;;  %v985_v14 = vld [vmem:[#allocation8 + $0x3c0] sm:$0xff] }
 0x2b9   : > { %6366 = vmatpush1.bf16.msra.mxu0 %v9124_v30  ;;  %6494 = vmatpush1.bf16.msra.mxu1 %v9126_v31  ;;  %v974_v30 = vld [vmem:[#allocation8 + $0x368] sm:$0xff]  ;;  %v976_v31 = vld [vmem:[#allocation8 + $0x378] sm:$0xff]  ;;  %10667 = vst [vmem:[#allocation139_spill] sm:$0xff] %v9172_v47  ;;  %v989_v45 = vld [vmem:[#allocation8 + $0x3e0] sm:$0xff] }
 0x2ba   : > { %6368 = vmatprep.subr.bf16.mxu0 %v9130_v12  ;;  %6496 = vmatprep.subr.bf16.mxu1 %v9132_v33  ;;  %v9154_v23 = vpack.c.bf16 %v974_v30, %v970_v60  ;;  %v9156_v35 = vpack.c.bf16 %v976_v31, %v972_v26  ;;  %v978_v33 = vld [vmem:[#allocation8 + $0x388] sm:$0xff]  ;;  %v980_v12 = vld [vmem:[#allocation8 + $0x398] sm:$0xff]  ;;  %10664 = vst [vmem:[#allocation136_spill] sm:$0xff] %v9162_v21  ;;  %v979_v30 = vld [vmem:[#allocation8 + $0x390] sm:$0xff] }
 0x2bb   : > { %v983_v31 = vld [vmem:[#allocation8 + $0x3b0] sm:$0xff]  ;;  %v9184_v49 = vpack.c.bf16 %v989_v45, %v985_v14  ;;  %v993_v14 = vld [vmem:[#allocation8 + $0x400] sm:$0xff] }
 0x2bc   : > { %10661 = vst [vmem:[#allocation133_spill] sm:$0xff] %v9154_v23  ;;  %10662 = vst [vmem:[#allocation134_spill] sm:$0xff] %v9156_v35  ;;  %v9174_v63 = vpack.c.bf16 %v983_v31, %v979_v30  ;;  %v997_v45 = vld [vmem:[#allocation8 + $0x420] sm:$0xff] }
 0x2bd   : > { %6370 = vmatpush1.bf16.msra.mxu0 %v9136_v36  ;;  %6498 = vmatpush1.bf16.msra.mxu1 %v9138_v13  ;;  %v982_v36 = vld [vmem:[#allocation8 + $0x3a8] sm:$0xff]  ;;  %v984_v13 = vld [vmem:[#allocation8 + $0x3b8] sm:$0xff]  ;;  %10671 = vst [vmem:[#allocation143_spill] sm:$0xff] %v9184_v49 }
 0x2be   : > { %6372 = vmatprep.subr.bf16.mxu0 %v9142_v61  ;;  %6500 = vmatprep.subr.bf16.mxu1 %v9144_v6  ;;  %v9166_v26 = vpack.c.bf16 %v982_v36, %v978_v33  ;;  %v9168_v60 = vpack.c.bf16 %v984_v13, %v980_v12  ;;  %v986_v6 = vld [vmem:[#allocation8 + $0x3c8] sm:$0xff]  ;;  %v988_v61 = vld [vmem:[#allocation8 + $0x3d8] sm:$0xff]  ;;  %10668 = vst [vmem:[#allocation140_spill] sm:$0xff] %v9174_v63  ;;  %v987_v36 = vld [vmem:[#allocation8 + $0x3d0] sm:$0xff] }
 0x2bf   : > { %v991_v13 = vld [vmem:[#allocation8 + $0x3f0] sm:$0xff] }
 0x2c0   : > { %10665 = vst [vmem:[#allocation137_spill] sm:$0xff] %v9166_v26  ;;  %10666 = vst [vmem:[#allocation138_spill] sm:$0xff] %v9168_v60  ;;  %v9186_v15 = vpack.c.bf16 %v991_v13, %v987_v36  ;;  %v995_v36 = vld [vmem:[#allocation8 + $0x410] sm:$0xff] }
 0x2c1   : > { %6374 = vmatpush1.bf16.msra.mxu0 %v9148_v54  ;;  %6502 = vmatpush1.bf16.msra.mxu1 %v9150_v22  ;;  %v990_v54 = vld [vmem:[#allocation8 + $0x3e8] sm:$0xff]  ;;  %v992_v22 = vld [vmem:[#allocation8 + $0x3f8] sm:$0xff]  ;;  %v999_v13 = vld [vmem:[#allocation8 + $0x430] sm:$0xff] }
 0x2c2   : > { %6376 = vmatprep.subr.bf16.mxu0 %v9154_v23  ;;  %6504 = vmatprep.subr.bf16.mxu1 %v9156_v35  ;;  %v9178_v12 = vpack.c.bf16 %v990_v54, %v986_v6  ;;  %v9180_v33 = vpack.c.bf16 %v992_v22, %v988_v61  ;;  %v994_v35 = vld [vmem:[#allocation8 + $0x408] sm:$0xff]  ;;  %v996_v23 = vld [vmem:[#allocation8 + $0x418] sm:$0xff]  ;;  %10672 = vst [vmem:[#allocation144_spill] sm:$0xff] %v9186_v15 }
 0x2c4   : > { %10669 = vst [vmem:[#allocation141_spill] sm:$0xff] %v9178_v12  ;;  %10670 = vst [vmem:[#allocation142_spill] sm:$0xff] %v9180_v33 }
 0x2c5   : > { %6378 = vmatpush1.bf16.msra.mxu0 %v9160_v41  ;;  %6506 = vmatpush1.bf16.msra.mxu1 %v9162_v21  ;;  %v998_v41 = vld [vmem:[#allocation8 + $0x428] sm:$0xff]  ;;  %v1000_v21 = vld [vmem:[#allocation8 + $0x438] sm:$0xff] }
 0x2c6   : > { %6380 = vmatprep.subr.bf16.mxu0 %v9166_v26  ;;  %6508 = vmatprep.subr.bf16.mxu1 %v9168_v60  ;;  %v9190_v61 = vpack.c.bf16 %v998_v41, %v994_v35  ;;  %v9192_v6 = vpack.c.bf16 %v1000_v21, %v996_v23  ;;  %v1002_v23 = vld [vmem:[#allocation8 + $0x448] sm:$0xff]  ;;  %v9200_v60 = vpack.c.bf16 %v997_v45, %v993_v14 }
 0x2c7   : > { %v9202_v26 = vpack.c.bf16 %v999_v13, %v995_v36  ;;  %v1018_v14 = vld [vmem:[#allocation8 + $0x4c8] sm:$0xff]  ;;  %v1019_v13 = vld [vmem:[#allocation8 + $0x4d0] sm:$0xff] }
 0x2c8   : > { %10673 = vst [vmem:[#allocation145_spill] sm:$0xff] %v9190_v61  ;;  %10674 = vst [vmem:[#allocation146_spill] sm:$0xff] %v9192_v6  ;;  %v1022_v45 = vld [vmem:[#allocation8 + $0x4e8] sm:$0xff] }
 0x2c9   : > { %6382 = vmatpush1.bf16.msra.mxu0 %v9172_v47  ;;  %6510 = vmatpush1.bf16.msra.mxu1 %v9174_v63  ;;  %v1008_v63 = vld [vmem:[#allocation8 + $0x478] sm:$0xff]  ;;  %10675 = vst [vmem:[#allocation147_spill] sm:$0xff] %v9200_v60  ;;  %10676 = vst [vmem:[#allocation148_spill] sm:$0xff] %v9202_v26 }
 0x2ca   : > { %6384 = vmatprep.subr.bf16.mxu0 %v9178_v12  ;;  %6512 = vmatprep.subr.bf16.mxu1 %v9180_v33  ;;  %v1006_v12 = vld [vmem:[#allocation8 + $0x468] sm:$0xff] }
 0x2cd   : > { %6386 = vmatpush1.bf16.msra.mxu0 %v9184_v49  ;;  %6514 = vmatpush1.bf16.msra.mxu1 %v9186_v15 }
 0x2ce   : > { %6388 = vmatprep.subr.bf16.mxu0 %v9190_v61  ;;  %6516 = vmatprep.subr.bf16.mxu1 %v9192_v6  ;;  %v1004_v61 = vld [vmem:[#allocation8 + $0x458] sm:$0xff] }
 0x323   : > { %v1473_v54 = vpop.f32.mrb[2].mxu0  ;;  %v1544_v22 = vpop.f32.mrb[2].mxu1 }
 0x324   : > { %v1475_v30 = vpop.f32.mrb[3].mxu0  ;;  %v1546_v31 = vpop.f32.mrb[3].mxu1 }
 0x343   : > { %v1615_v35 = vpop.f32.mrb[4].mxu0  ;;  %v1686_v41 = vpop.f32.mrb[4].mxu1 }
 0x344   : > { %v1833_v21 = vmul.f32 %v1615_v35, %v1473_v54  ;;  %v9198_v33 = vmul.f32 %v1686_v41, %v1544_v22  ;;  %v1617_v49 = vpop.f32.mrb[5].mxu0  ;;  %v1688_v15 = vpop.f32.mrb[5].mxu1  ;;  %v9204_v54 = vpack.c.bf16 %v1006_v12, %v1002_v23  ;;  %v9206_v22 = vpack.c.bf16 %v1008_v63, %v1004_v61  ;;  %v1014_v35 = vld [vmem:[#allocation8 + $0x4a8] sm:$0xff]  ;;  %v1012_v41 = vld [vmem:[#allocation8 + $0x498] sm:$0xff]  ;;  %v1011_v61 = vld [vmem:[#allocation8 + $0x490] sm:$0xff] }
 0x345   : > { %v1834_v6 = vmul.f32 %v1617_v49, %v1475_v30  ;;  %v1836_v47 = vmul.f32 %v1688_v15, %v1546_v31  ;;  %v9210_v49 = vpack.c.bf16 %v1005_v1, %v1001_v44  ;;  %v9212_v15 = vpack.c.bf16 %v1007_v59, %v1003_v0  ;;  %v1009_v30 = vld [vmem:[#allocation8 + $0x480] sm:$0xff]  ;;  %v1020_v1 = vld [vmem:[#allocation8 + $0x4d8] sm:$0xff]  ;;  %v1023_v23 = vld [vmem:[#allocation8 + $0x4f0] sm:$0xff] }
 0x346   : > { %10677 = vst [vmem:[#allocation149_spill] sm:$0xff] %v9204_v54  ;;  %10678 = vst [vmem:[#allocation150_spill] sm:$0xff] %v9206_v22  ;;  %v1013_v31 = vld [vmem:[#allocation8 + $0x4a0] sm:$0xff]  ;;  %v9214_v12 = vpack.c.bf16 %v1014_v35, %v1010_v10  ;;  %v9216_v63 = vpack.c.bf16 %v1016_v56, %v1012_v41  ;;  %v1024_v44 = vld [vmem:[#allocation8 + $0x4f8] sm:$0xff] }
 0x347   : > { %1901 = vmatprep.mubr.f32.mxu0 %v1834_v6  ;;  %2043 = vmatprep.mubr.f32.mxu1 %v1834_v6  ;;  %10679 = vst [vmem:[#allocation151_spill] sm:$0xff] %v9210_v49  ;;  %10680 = vst [vmem:[#allocation152_spill] sm:$0xff] %v9212_v15  ;;  %v1015_v6 = vld [vmem:[#allocation8 + $0x4b0] sm:$0xff]  ;;  %v9222_v59 = vpack.c.bf16 %v1013_v31, %v1009_v30  ;;  %v1017_v56 = vld [vmem:[#allocation8 + $0x4c0] sm:$0xff]  ;;  %v9230_v36 = vpack.c.bf16 %v1024_v44, %v1020_v1 }
 0x348   : > { %1902 = vmatmul.mubr.f32.vlgmr.msra.gmra.mrb[8].mxu0 %v1833_v21  ;;  %2044 = vmatmul.mubr.f32.vlgmr.msra.gmra.mrb[8].mxu1 %v1833_v21  ;;  %10681 = vst [vmem:[#allocation153_spill] sm:$0xff] %v9214_v12  ;;  %10682 = vst [vmem:[#allocation154_spill] sm:$0xff] %v9216_v63  ;;  %v9224_v10 = vpack.c.bf16 %v1015_v6, %v1011_v61  ;;  %v1021_v0 = vld [vmem:[#allocation8 + $0x4e0] sm:$0xff]  ;;  %v1026_v21 = vld [vmem:[#allocation8 + $0x508] sm:$0xff]  ;;  %v9236_v31 = vpack.c.bf16 %v1023_v23, %v1019_v13 }
 0x349   : > { %6390 = vmatpush1.bf16.msra.mxu0 %v9200_v60  ;;  %6518 = vmatpush1.bf16.msra.mxu1 %v9202_v26  ;;  %10683 = vst [vmem:[#allocation155_spill] sm:$0xff] %v9222_v59  ;;  %10686 = vst [vmem:[#allocation158_spill] sm:$0xff] %v9230_v36  ;;  %v1030_v35 = vld [vmem:[#allocation8 + $0x528] sm:$0xff]  ;;  %v1028_v41 = vld [vmem:[#allocation8 + $0x518] sm:$0xff]  ;;  %v9234_v30 = vpack.c.bf16 %v1021_v0, %v1017_v56 }
 0x34a   : > { %1972 = vmatprep.mubr.f32.mxu0 %v1836_v47  ;;  %2114 = vmatprep.mubr.f32.mxu1 %v1836_v47  ;;  %10684 = vst [vmem:[#allocation156_spill] sm:$0xff] %v9224_v10  ;;  %v9228_v47 = vpack.c.bf16 %v1022_v45, %v1018_v14  ;;  %10688 = vst [vmem:[#allocation160_spill] sm:$0xff] %v9236_v31  ;;  %v1025_v61 = vld [vmem:[#allocation8 + $0x500] sm:$0xff]  ;;  %v9240_v14 = vpack.c.bf16 %v1030_v35, %v1026_v21  ;;  %v1027_v1 = vld [vmem:[#allocation8 + $0x510] sm:$0xff] }
 0x34b   : > { %6392 = vmatprep.subr.bf16.mxu0 %v9204_v54  ;;  %6520 = vmatprep.subr.bf16.mxu1 %v9206_v22  ;;  %10687 = vst [vmem:[#allocation159_spill] sm:$0xff] %v9234_v30  ;;  %v1029_v6 = vld [vmem:[#allocation8 + $0x520] sm:$0xff]  ;;  %v1031_v44 = vld [vmem:[#allocation8 + $0x530] sm:$0xff]  ;;  %v1074_v54 = vld [vmem:[#allocation8 + $0x688] sm:$0xff] }
 0x34c   : > { %10685 = vst [vmem:[#allocation157_spill] sm:$0xff] %v9228_v47  ;;  %10689 = vst [vmem:[#allocation161_spill] sm:$0xff] %v9240_v14  ;;  %v9246_v56 = vpack.c.bf16 %v1029_v6, %v1025_v61  ;;  %v9248_v0 = vpack.c.bf16 %v1031_v44, %v1027_v1  ;;  %v1033_v13 = vld [vmem:[#allocation8 + $0x540] sm:$0xff]  ;;  %v1035_v35 = vld [vmem:[#allocation8 + $0x550] sm:$0xff] }
 0x34d   : > { %6394 = vmatpush1.bf16.msra.mxu0 %v9210_v49  ;;  %6522 = vmatpush1.bf16.msra.mxu1 %v9212_v15  ;;  %v1032_v15 = vld [vmem:[#allocation8 + $0x538] sm:$0xff]  ;;  %v1037_v23 = vld [vmem:[#allocation8 + $0x560] sm:$0xff]  ;;  %v1067_v49 = vld [vmem:[#allocation8 + $0x650] sm:$0xff] }
 0x34e   : > { %6396 = vmatprep.subr.bf16.mxu0 %v9214_v12  ;;  %6524 = vmatprep.subr.bf16.mxu1 %v9216_v63  ;;  %v9242_v45 = vpack.c.bf16 %v1032_v15, %v1028_v41  ;;  %v1034_v63 = vld [vmem:[#allocation8 + $0x548] sm:$0xff]  ;;  %v1036_v12 = vld [vmem:[#allocation8 + $0x558] sm:$0xff]  ;;  %10691 = vst [vmem:[#allocation163_spill] sm:$0xff] %v9246_v56  ;;  %10692 = vst [vmem:[#allocation164_spill] sm:$0xff] %v9248_v0  ;;  %v9258_v61 = vpack.c.bf16 %v1037_v23, %v1033_v13 }
 0x34f   : > { %v1039_v41 = vld [vmem:[#allocation8 + $0x570] sm:$0xff]  ;;  %v1041_v1 = vld [vmem:[#allocation8 + $0x580] sm:$0xff]  ;;  %v1076_v26 = vld [vmem:[#allocation8 + $0x698] sm:$0xff] }
 0x350   : > { %10690 = vst [vmem:[#allocation162_spill] sm:$0xff] %v9242_v45  ;;  %10695 = vst [vmem:[#allocation167_spill] sm:$0xff] %v9258_v61  ;;  %v9260_v6 = vpack.c.bf16 %v1039_v41, %v1035_v35  ;;  %v1045_v44 = vld [vmem:[#allocation8 + $0x5a0] sm:$0xff]  ;;  %v1071_v22 = vld [vmem:[#allocation8 + $0x670] sm:$0xff] }
 0x351   : > { %6398 = vmatpush1.bf16.msra.mxu0 %v9222_v59  ;;  %6526 = vmatpush1.bf16.msra.mxu1 %v9224_v10  ;;  %v1038_v59 = vld [vmem:[#allocation8 + $0x568] sm:$0xff]  ;;  %v1040_v10 = vld [vmem:[#allocation8 + $0x578] sm:$0xff]  ;;  %v9270_v13 = vpack.c.bf16 %v1045_v44, %v1041_v1  ;;  %v1049_v35 = vld [vmem:[#allocation8 + $0x5c0] sm:$0xff] }
 0x352   : > { %6400 = vmatprep.subr.bf16.mxu0 %v9228_v47  ;;  %6528 = vmatprep.subr.bf16.mxu1 %v9230_v36  ;;  %v9252_v15 = vpack.c.bf16 %v1038_v59, %v1034_v63  ;;  %v9254_v21 = vpack.c.bf16 %v1040_v10, %v1036_v12  ;;  %v1042_v36 = vld [vmem:[#allocation8 + $0x588] sm:$0xff]  ;;  %v1044_v47 = vld [vmem:[#allocation8 + $0x598] sm:$0xff]  ;;  %10696 = vst [vmem:[#allocation168_spill] sm:$0xff] %v9260_v6  ;;  %v1043_v59 = vld [vmem:[#allocation8 + $0x590] sm:$0xff] }
 0x353   : > { %v1047_v10 = vld [vmem:[#allocation8 + $0x5b0] sm:$0xff]  ;;  %10699 = vst [vmem:[#allocation171_spill] sm:$0xff] %v9270_v13  ;;  %v1053_v41 = vld [vmem:[#allocation8 + $0x5e0] sm:$0xff] }
 0x354   : > { %10693 = vst [vmem:[#allocation165_spill] sm:$0xff] %v9252_v15  ;;  %10694 = vst [vmem:[#allocation166_spill] sm:$0xff] %v9254_v21  ;;  %v9272_v23 = vpack.c.bf16 %v1047_v10, %v1043_v59  ;;  %v9282_v1 = vpack.c.bf16 %v1053_v41, %v1049_v35  ;;  %v1057_v59 = vld [vmem:[#allocation8 + $0x600] sm:$0xff]  ;;  %v1175_v60 = vld [vmem:[#allocation10 + $0x1b0] sm:$0xff] }
 0x355   : > { %6402 = vmatpush1.bf16.msra.mxu0 %v9234_v30  ;;  %6530 = vmatpush1.bf16.msra.mxu1 %v9236_v31  ;;  %v1046_v30 = vld [vmem:[#allocation8 + $0x5a8] sm:$0xff]  ;;  %v1048_v31 = vld [vmem:[#allocation8 + $0x5b8] sm:$0xff]  ;;  %v1061_v10 = vld [vmem:[#allocation8 + $0x620] sm:$0xff] }
 0x356   : > { %6404 = vmatprep.subr.bf16.mxu0 %v9240_v14  ;;  %6532 = vmatprep.subr.bf16.mxu1 %v9242_v45  ;;  %v9264_v12 = vpack.c.bf16 %v1046_v30, %v1042_v36  ;;  %v9266_v63 = vpack.c.bf16 %v1048_v31, %v1044_v47  ;;  %v1050_v45 = vld [vmem:[#allocation8 + $0x5c8] sm:$0xff]  ;;  %v1052_v14 = vld [vmem:[#allocation8 + $0x5d8] sm:$0xff]  ;;  %10700 = vst [vmem:[#allocation172_spill] sm:$0xff] %v9272_v23  ;;  %v1051_v30 = vld [vmem:[#allocation8 + $0x5d0] sm:$0xff] }
 0x357   : > { %v1055_v31 = vld [vmem:[#allocation8 + $0x5f0] sm:$0xff]  ;;  %10703 = vst [vmem:[#allocation175_spill] sm:$0xff] %v9282_v1 }
 0x358   : > { %10697 = vst [vmem:[#allocation169_spill] sm:$0xff] %v9264_v12  ;;  %10698 = vst [vmem:[#allocation170_spill] sm:$0xff] %v9266_v63  ;;  %v9284_v44 = vpack.c.bf16 %v1055_v31, %v1051_v30 }
 0x359   : > { %6406 = vmatpush1.bf16.msra.mxu0 %v9246_v56  ;;  %6534 = vmatpush1.bf16.msra.mxu1 %v9248_v0  ;;  %v1054_v56 = vld [vmem:[#allocation8 + $0x5e8] sm:$0xff]  ;;  %v1056_v0 = vld [vmem:[#allocation8 + $0x5f8] sm:$0xff] }
 0x35a   : > { %6408 = vmatprep.subr.bf16.mxu0 %v9252_v15  ;;  %6536 = vmatprep.subr.bf16.mxu1 %v9254_v21  ;;  %v9276_v47 = vpack.c.bf16 %v1054_v56, %v1050_v45  ;;  %v9278_v36 = vpack.c.bf16 %v1056_v0, %v1052_v14  ;;  %v1058_v21 = vld [vmem:[#allocation8 + $0x608] sm:$0xff]  ;;  %v1060_v15 = vld [vmem:[#allocation8 + $0x618] sm:$0xff]  ;;  %10704 = vst [vmem:[#allocation176_spill] sm:$0xff] %v9284_v44  ;;  %v1059_v56 = vld [vmem:[#allocation8 + $0x610] sm:$0xff] }
 0x35b   : > { %v1063_v0 = vld [vmem:[#allocation8 + $0x630] sm:$0xff] }
 0x35c   : > { %10701 = vst [vmem:[#allocation173_spill] sm:$0xff] %v9276_v47  ;;  %10702 = vst [vmem:[#allocation174_spill] sm:$0xff] %v9278_v36 }
 0x35d   : > { %6410 = vmatpush1.bf16.msra.mxu0 %v9258_v61  ;;  %6538 = vmatpush1.bf16.msra.mxu1 %v9260_v6  ;;  %v1062_v61 = vld [vmem:[#allocation8 + $0x628] sm:$0xff]  ;;  %v1064_v6 = vld [vmem:[#allocation8 + $0x638] sm:$0xff] }
 0x35e   : > { %6412 = vmatprep.subr.bf16.mxu0 %v9264_v12  ;;  %6540 = vmatprep.subr.bf16.mxu1 %v9266_v63  ;;  %v9288_v14 = vpack.c.bf16 %v1062_v61, %v1058_v21  ;;  %v9290_v45 = vpack.c.bf16 %v1064_v6, %v1060_v15  ;;  %v1066_v63 = vld [vmem:[#allocation8 + $0x648] sm:$0xff]  ;;  %v1068_v12 = vld [vmem:[#allocation8 + $0x658] sm:$0xff]  ;;  %v9302_v15 = vpack.c.bf16 %v1061_v10, %v1057_v59  ;;  %v1065_v61 = vld [vmem:[#allocation8 + $0x640] sm:$0xff] }
 0x35f   : > { %v9304_v21 = vpack.c.bf16 %v1063_v0, %v1059_v56  ;;  %v1069_v6 = vld [vmem:[#allocation8 + $0x660] sm:$0xff]  ;;  %v9316_v10 = vpack.c.bf16 %v1071_v22, %v1067_v49 }
 0x360   : > { %10705 = vst [vmem:[#allocation177_spill] sm:$0xff] %v9288_v14  ;;  %10706 = vst [vmem:[#allocation178_spill] sm:$0xff] %v9290_v45  ;;  %v9314_v59 = vpack.c.bf16 %v1069_v6, %v1065_v61  ;;  %v1073_v56 = vld [vmem:[#allocation8 + $0x680] sm:$0xff] }
 0x361   : > { %6414 = vmatpush1.bf16.msra.mxu0 %v9270_v13  ;;  %6542 = vmatpush1.bf16.msra.mxu1 %v9272_v23  ;;  %v1070_v13 = vld [vmem:[#allocation8 + $0x668] sm:$0xff]  ;;  %v1072_v23 = vld [vmem:[#allocation8 + $0x678] sm:$0xff]  ;;  %10707 = vst [vmem:[#allocation179_spill] sm:$0xff] %v9302_v15  ;;  %10708 = vst [vmem:[#allocation180_spill] sm:$0xff] %v9304_v21 }
 0x362   : > { %6416 = vmatprep.subr.bf16.mxu0 %v9276_v47  ;;  %6544 = vmatprep.subr.bf16.mxu1 %v9278_v36  ;;  %v9308_v36 = vpack.c.bf16 %v1070_v13, %v1066_v63  ;;  %v9310_v47 = vpack.c.bf16 %v1072_v23, %v1068_v12  ;;  %10711 = vst [vmem:[#allocation183_spill] sm:$0xff] %v9314_v59  ;;  %10712 = vst [vmem:[#allocation184_spill] sm:$0xff] %v9316_v10  ;;  %v1077_v0 = vld [vmem:[#allocation8 + $0x6a0] sm:$0xff]  ;;  %v1075_v13 = vld [vmem:[#allocation8 + $0x690] sm:$0xff] }
 0x363   : > { %v9292_v35 = vpop.f32.mrb[6].mxu0  ;;  %v9294_v41 = vpop.f32.mrb[6].mxu1  ;;  %v1079_v23 = vld [vmem:[#allocation8 + $0x6b0] sm:$0xff]  ;;  %v9326_v22 = vpack.c.bf16 %v1077_v0, %v1073_v56  ;;  %v1081_v61 = vld [vmem:[#allocation8 + $0x6c0] sm:$0xff] }
 0x364   : > { %v9296_v30 = vpop.f32.mrb[7].mxu0  ;;  %v9298_v31 = vpop.f32.mrb[7].mxu1  ;;  %10709 = vst [vmem:[#allocation181_spill] sm:$0xff] %v9308_v36  ;;  %10710 = vst [vmem:[#allocation182_spill] sm:$0xff] %v9310_v47  ;;  %v9328_v49 = vpack.c.bf16 %v1079_v23, %v1075_v13  ;;  %v1085_v6 = vld [vmem:[#allocation8 + $0x6e0] sm:$0xff] }
 0x365   : > { %6418 = vmatpush1.bf16.msra.mxu0 %v9282_v1  ;;  %6546 = vmatpush1.bf16.msra.mxu1 %v9284_v44  ;;  %v1078_v1 = vld [vmem:[#allocation8 + $0x6a8] sm:$0xff]  ;;  %v1080_v44 = vld [vmem:[#allocation8 + $0x6b8] sm:$0xff]  ;;  %10715 = vst [vmem:[#allocation187_spill] sm:$0xff] %v9326_v22  ;;  %v9338_v56 = vpack.c.bf16 %v1085_v6, %v1081_v61  ;;  %v1089_v13 = vld [vmem:[#allocation8 + $0x700] sm:$0xff] }
 0x366   : > { %6420 = vmatprep.subr.bf16.mxu0 %v9288_v14  ;;  %6548 = vmatprep.subr.bf16.mxu1 %v9290_v45  ;;  %v9320_v12 = vpack.c.bf16 %v1078_v1, %v1074_v54  ;;  %v9322_v63 = vpack.c.bf16 %v1080_v44, %v1076_v26  ;;  %v1082_v45 = vld [vmem:[#allocation8 + $0x6c8] sm:$0xff]  ;;  %v1084_v14 = vld [vmem:[#allocation8 + $0x6d8] sm:$0xff]  ;;  %10716 = vst [vmem:[#allocation188_spill] sm:$0xff] %v9328_v49  ;;  %v1083_v1 = vld [vmem:[#allocation8 + $0x6d0] sm:$0xff] }
 0x367   : > { %v1087_v44 = vld [vmem:[#allocation8 + $0x6f0] sm:$0xff]  ;;  %10719 = vst [vmem:[#allocation191_spill] sm:$0xff] %v9338_v56  ;;  %v1093_v23 = vld [vmem:[#allocation8 + $0x720] sm:$0xff] }
 0x368   : > { %10713 = vst [vmem:[#allocation185_spill] sm:$0xff] %v9320_v12  ;;  %10714 = vst [vmem:[#allocation186_spill] sm:$0xff] %v9322_v63  ;;  %v9340_v0 = vpack.c.bf16 %v1087_v44, %v1083_v1  ;;  %v9350_v61 = vpack.c.bf16 %v1093_v23, %v1089_v13  ;;  %v1097_v1 = vld [vmem:[#allocation8 + $0x740] sm:$0xff] }
 0x369   : > { %6422 = vmatpush1.bf16.msra.mxu0 %v9302_v15  ;;  %6550 = vmatpush1.bf16.msra.mxu1 %v9304_v21  ;;  %v1086_v15 = vld [vmem:[#allocation8 + $0x6e8] sm:$0xff]  ;;  %v1088_v21 = vld [vmem:[#allocation8 + $0x6f8] sm:$0xff]  ;;  %v1101_v44 = vld [vmem:[#allocation8 + $0x760] sm:$0xff] }
 0x36a   : > { %6424 = vmatprep.subr.bf16.mxu0 %v9308_v36  ;;  %6552 = vmatprep.subr.bf16.mxu1 %v9310_v47  ;;  %v9332_v26 = vpack.c.bf16 %v1086_v15, %v1082_v45  ;;  %v9334_v54 = vpack.c.bf16 %v1088_v21, %v1084_v14  ;;  %v1090_v47 = vld [vmem:[#allocation8 + $0x708] sm:$0xff]  ;;  %v1092_v36 = vld [vmem:[#allocation8 + $0x718] sm:$0xff]  ;;  %10720 = vst [vmem:[#allocation192_spill] sm:$0xff] %v9340_v0  ;;  %v1091_v15 = vld [vmem:[#allocation8 + $0x710] sm:$0xff] }
 0x36b   : > { %v1095_v21 = vld [vmem:[#allocation8 + $0x730] sm:$0xff]  ;;  %10723 = vst [vmem:[#allocation195_spill] sm:$0xff] %v9350_v61  ;;  %v9362_v13 = vpack.c.bf16 %v1101_v44, %v1097_v1 }
 0x36c   : > { %10717 = vst [vmem:[#allocation189_spill] sm:$0xff] %v9332_v26  ;;  %10718 = vst [vmem:[#allocation190_spill] sm:$0xff] %v9334_v54  ;;  %v9352_v6 = vpack.c.bf16 %v1095_v21, %v1091_v15  ;;  %v1105_v15 = vld [vmem:[#allocation8 + $0x780] sm:$0xff] }
 0x36d   : > { %6426 = vmatpush1.bf16.msra.mxu0 %v9314_v59  ;;  %6554 = vmatpush1.bf16.msra.mxu1 %v9316_v10  ;;  %v1094_v59 = vld [vmem:[#allocation8 + $0x728] sm:$0xff]  ;;  %v1096_v10 = vld [vmem:[#allocation8 + $0x738] sm:$0xff]  ;;  %10727 = vst [vmem:[#allocation199_spill] sm:$0xff] %v9362_v13  ;;  %v1109_v21 = vld [vmem:[#allocation8 + $0x7a0] sm:$0xff] }
 0x36e   : > { %6428 = vmatprep.subr.bf16.mxu0 %v9320_v12  ;;  %6556 = vmatprep.subr.bf16.mxu1 %v9322_v63  ;;  %v9344_v14 = vpack.c.bf16 %v1094_v59, %v1090_v47  ;;  %v9346_v45 = vpack.c.bf16 %v1096_v10, %v1092_v36  ;;  %v1098_v63 = vld [vmem:[#allocation8 + $0x748] sm:$0xff]  ;;  %v1100_v12 = vld [vmem:[#allocation8 + $0x758] sm:$0xff]  ;;  %10724 = vst [vmem:[#allocation196_spill] sm:$0xff] %v9352_v6  ;;  %v1099_v59 = vld [vmem:[#allocation8 + $0x750] sm:$0xff] }
 0x36f   : > { %v1103_v10 = vld [vmem:[#allocation8 + $0x770] sm:$0xff]  ;;  %v9374_v1 = vpack.c.bf16 %v1109_v21, %v1105_v15 }
 0x370   : > { %10721 = vst [vmem:[#allocation193_spill] sm:$0xff] %v9344_v14  ;;  %10722 = vst [vmem:[#allocation194_spill] sm:$0xff] %v9346_v45  ;;  %v9364_v23 = vpack.c.bf16 %v1103_v10, %v1099_v59  ;;  %v1113_v59 = vld [vmem:[#allocation8 + $0x7c0] sm:$0xff]  ;;  %v1119_v10 = vld [vmem:[#allocation8 + $0x7f0] sm:$0xff] }
 0x371   : > { %6430 = vmatpush1.bf16.msra.mxu0 %v9326_v22  ;;  %6558 = vmatpush1.bf16.msra.mxu1 %v9328_v49  ;;  %v1102_v22 = vld [vmem:[#allocation8 + $0x768] sm:$0xff]  ;;  %v1104_v49 = vld [vmem:[#allocation8 + $0x778] sm:$0xff]  ;;  %10731 = vst [vmem:[#allocation203_spill] sm:$0xff] %v9374_v1 }
 0x372   : > { %6432 = vmatprep.subr.bf16.mxu0 %v9332_v26  ;;  %6560 = vmatprep.subr.bf16.mxu1 %v9334_v54  ;;  %v9356_v47 = vpack.c.bf16 %v1102_v22, %v1098_v63  ;;  %v9358_v36 = vpack.c.bf16 %v1104_v49, %v1100_v12  ;;  %v1106_v54 = vld [vmem:[#allocation8 + $0x788] sm:$0xff]  ;;  %v1108_v26 = vld [vmem:[#allocation8 + $0x798] sm:$0xff]  ;;  %10728 = vst [vmem:[#allocation200_spill] sm:$0xff] %v9364_v23  ;;  %v1107_v22 = vld [vmem:[#allocation8 + $0x790] sm:$0xff] }
 0x373   : > { %v1111_v49 = vld [vmem:[#allocation8 + $0x7b0] sm:$0xff] }
 0x374   : > { %10725 = vst [vmem:[#allocation197_spill] sm:$0xff] %v9356_v47  ;;  %10726 = vst [vmem:[#allocation198_spill] sm:$0xff] %v9358_v36  ;;  %v9376_v44 = vpack.c.bf16 %v1111_v49, %v1107_v22  ;;  %v1170_v22 = vld [vmem:[#allocation10 + $0x188] sm:$0xff]  ;;  %v1121_v49 = vld [vmem:[#allocation10] sm:$0xff] }
 0x375   : > { %6434 = vmatpush1.bf16.msra.mxu0 %v9338_v56  ;;  %6562 = vmatpush1.bf16.msra.mxu1 %v9340_v0  ;;  %v1110_v56 = vld [vmem:[#allocation8 + $0x7a8] sm:$0xff]  ;;  %v1112_v0 = vld [vmem:[#allocation8 + $0x7b8] sm:$0xff] }
 0x376   : > { %6436 = vmatprep.subr.bf16.mxu0 %v9344_v14  ;;  %6564 = vmatprep.subr.bf16.mxu1 %v9346_v45  ;;  %v9368_v12 = vpack.c.bf16 %v1110_v56, %v1106_v54  ;;  %v9370_v63 = vpack.c.bf16 %v1112_v0, %v1108_v26  ;;  %v1114_v45 = vld [vmem:[#allocation8 + $0x7c8] sm:$0xff]  ;;  %v1116_v14 = vld [vmem:[#allocation8 + $0x7d8] sm:$0xff]  ;;  %10732 = vst [vmem:[#allocation204_spill] sm:$0xff] %v9376_v44  ;;  %v1117_v56 = vld [vmem:[#allocation8 + $0x7e0] sm:$0xff] }
 0x377   : > { %v1115_v0 = vld [vmem:[#allocation8 + $0x7d0] sm:$0xff]  ;;  %v9386_v15 = vpack.c.bf16 %v1117_v56, %v1113_v59  ;;  %v1122_v59 = vld [vmem:[#allocation10 + $0x8] sm:$0xff] }
 0x378   : > { %10729 = vst [vmem:[#allocation201_spill] sm:$0xff] %v9368_v12  ;;  %10730 = vst [vmem:[#allocation202_spill] sm:$0xff] %v9370_v63  ;;  %v9388_v21 = vpack.c.bf16 %v1119_v10, %v1115_v0  ;;  %v9400_v0 = vpack.c.bf16 %v1122_v59, %v1121_v49  ;;  %v1153_v10 = vld [vmem:[#allocation10 + $0x100] sm:$0xff]  ;;  %v1155_v49 = vld [vmem:[#allocation10 + $0x110] sm:$0xff] }
 0x379   : > { %6438 = vmatpush1.bf16.msra.mxu0 %v9350_v61  ;;  %6566 = vmatpush1.bf16.msra.mxu1 %v9352_v6  ;;  %v1118_v61 = vld [vmem:[#allocation8 + $0x7e8] sm:$0xff]  ;;  %v1120_v6 = vld [vmem:[#allocation8 + $0x7f8] sm:$0xff]  ;;  %10735 = vst [vmem:[#allocation207_spill] sm:$0xff] %v9386_v15 }
 0x37a   : > { %6440 = vmatprep.subr.bf16.mxu0 %v9356_v47  ;;  %6568 = vmatprep.subr.bf16.mxu1 %v9358_v36  ;;  %v9380_v26 = vpack.c.bf16 %v1118_v61, %v1114_v45  ;;  %v9382_v54 = vpack.c.bf16 %v1120_v6, %v1116_v14  ;;  %10736 = vst [vmem:[#allocation208_spill] sm:$0xff] %v9388_v21  ;;  %v1137_v14 = vld [vmem:[#allocation10 + $0x80] sm:$0xff]  ;;  %v1138_v45 = vld [vmem:[#allocation10 + $0x88] sm:$0xff]  ;;  %v1143_v36 = vld [vmem:[#allocation10 + $0xb0] sm:$0xff] }
 0x37b   : > { %v1169_v61 = vld [vmem:[#allocation10 + $0x180] sm:$0xff]  ;;  %v9396_v6 = vpack.c.bf16 %v1138_v45, %v1137_v14  ;;  %v1144_v47 = vld [vmem:[#allocation10 + $0xb8] sm:$0xff] }
 0x37c   : > { %10733 = vst [vmem:[#allocation205_spill] sm:$0xff] %v9380_v26  ;;  %10734 = vst [vmem:[#allocation206_spill] sm:$0xff] %v9382_v54  ;;  %v9398_v56 = vpack.c.bf16 %v1170_v22, %v1169_v61  ;;  %v1123_v61 = vld [vmem:[#allocation10 + $0x10] sm:$0xff]  ;;  %v1124_v22 = vld [vmem:[#allocation10 + $0x18] sm:$0xff] }
 0x37d   : > { %6442 = vmatpush1.bf16.msra.mxu0 %v9362_v13  ;;  %6570 = vmatpush1.bf16.msra.mxu1 %v9364_v23  ;;  %10737 = vst [vmem:[#allocation209_spill] sm:$0xff] %v9396_v6  ;;  %v9412_v59 = vpack.c.bf16 %v1124_v22, %v1123_v61  ;;  %v1126_v23 = vld [vmem:[#allocation10 + $0x28] sm:$0xff]  ;;  %v1157_v13 = vld [vmem:[#allocation10 + $0x120] sm:$0xff] }
 0x37e   : > { %6444 = vmatprep.subr.bf16.mxu0 %v9368_v12  ;;  %6572 = vmatprep.subr.bf16.mxu1 %v9370_v63  ;;  %10738 = vst [vmem:[#allocation210_spill] sm:$0xff] %v9398_v56  ;;  %v1158_v61 = vld [vmem:[#allocation10 + $0x128] sm:$0xff] }
 0x381   : > { %6446 = vmatpush1.bf16.msra.mxu0 %v9374_v1  ;;  %6574 = vmatpush1.bf16.msra.mxu1 %v9376_v44  ;;  %v1172_v44 = vld [vmem:[#allocation10 + $0x198] sm:$0xff]  ;;  %v1142_v1 = vld [vmem:[#allocation10 + $0xa8] sm:$0xff] }
 0x382   : > { %6448 = vmatprep.subr.bf16.mxu0 %v9380_v26  ;;  %6576 = vmatprep.subr.bf16.mxu1 %v9382_v54  ;;  %v1139_v54 = vld [vmem:[#allocation10 + $0x90] sm:$0xff] }
 0x383   : > { %v1171_v26 = vld [vmem:[#allocation10 + $0x190] sm:$0xff] }
 0x384   : > { %v9409_v45 = vpack.c.bf16 %v1172_v44, %v1171_v26  ;;  %v1173_v44 = vld [vmem:[#allocation10 + $0x1a0] sm:$0xff]  ;;  %v1174_v26 = vld [vmem:[#allocation10 + $0x1a8] sm:$0xff] }
 0x385   : > { %6450 = vmatpush1.bf16.msra.mxu0 %v9386_v15  ;;  %6578 = vmatpush1.bf16.msra.mxu1 %v9388_v21  ;;  %v1154_v15 = vld [vmem:[#allocation10 + $0x108] sm:$0xff]  ;;  %v9420_v12 = vpack.c.bf16 %v1174_v26, %v1173_v44  ;;  %v1128_v44 = vld [vmem:[#allocation10 + $0x38] sm:$0xff] }
 0x386   : > { %6580 = vmatprep.subr.bf16.mxu0 %v9396_v6  ;;  %v9403_v21 = vpack.c.bf16 %v1154_v15, %v1153_v10  ;;  %6612 = vmatprep.subr.bf16.mxu1 %v9398_v56  ;;  %v1156_v15 = vld [vmem:[#allocation10 + $0x118] sm:$0xff]  ;;  %v1141_v10 = vld [vmem:[#allocation10 + $0xa0] sm:$0xff] }
 0x387   : > { %v9416_v63 = vpack.c.bf16 %v1156_v15, %v1155_v49  ;;  %v9429_v49 = vpack.c.bf16 %v1144_v47, %v1143_v36  ;;  %v1176_v15 = vld [vmem:[#allocation10 + $0x1b8] sm:$0xff]  ;;  %v9441_v36 = vpack.c.bf16 %v1146_v32, %v1145_v48 }
 0x388   : > { %1973 = vmatmul.mubr.f32.vlgmr.msra.gmra.mrb[8].mxu0 %v9198_v33  ;;  %2115 = vmatmul.mubr.f32.vlgmr.msra.gmra.mrb[8].mxu1 %v9198_v33  ;;  %v1140_v33 = vld [vmem:[#allocation10 + $0x98] sm:$0xff]  ;;  %v9432_v26 = vpack.c.bf16 %v1176_v15, %v1175_v60  ;;  %v9444_v60 = vpack.c.bf16 %v1178_v3, %v1177_v29 }
 0x389   : > { %6582 = vmatpush3.bf16.msra.mxu0 %v9400_v0  ;;  %v9407_v14 = vpack.c.bf16 %v1140_v33, %v1139_v54  ;;  %6614 = vmatpush3.bf16.msra.mxu1 %v9403_v21  ;;  %v9418_v54 = vpack.c.bf16 %v1142_v1, %v1141_v10  ;;  %v1125_v33 = vld [vmem:[#allocation10 + $0x20] sm:$0xff]  ;;  %v9427_v1 = vpack.c.bf16 %v1158_v61, %v1157_v13  ;;  %v1127_v10 = vld [vmem:[#allocation10 + $0x30] sm:$0xff] }
 0x38a   : > { %6616 = vmatprep.subr.bf16.mxu1 %v9409_v45  ;;  %v9423_v22 = vpack.c.bf16 %v1126_v23, %v1125_v33  ;;  %v1159_v23 = vld [vmem:[#allocation10 + $0x130] sm:$0xff]  ;;  %v1160_v33 = vld [vmem:[#allocation10 + $0x138] sm:$0xff]  ;;  %v9435_v62 = vpack.c.bf16 %v1128_v44, %v1127_v10 }
 0x38b   : > { %6584 = vmatprep.subr.bf16.mxu0 %v9407_v14  ;;  %v9439_v47 = vpack.c.bf16 %v1160_v33, %v1159_v23 }
 0x38d   : > { %6586 = vmatpush3.bf16.msra.mxu0 %v9412_v59  ;;  %6618 = vmatpush3.bf16.msra.mxu1 %v9416_v63 }
 0x38e   : > { %6588 = vmatprep.subr.bf16.mxu0 %v9418_v54  ;;  %6620 = vmatprep.subr.bf16.mxu1 %v9420_v12 }
 0x391   : > { %6590 = vmatpush3.bf16.msra.mxu0 %v9423_v22  ;;  %6622 = vmatpush3.bf16.msra.mxu1 %v9427_v1 }
 0x392   : > { %6592 = vmatprep.subr.bf16.mxu0 %v9429_v49  ;;  %6624 = vmatprep.subr.bf16.mxu1 %v9432_v26 }
 0x395   : > { %6594 = vmatpush3.bf16.msra.mxu0 %v9435_v62  ;;  %6626 = vmatpush3.bf16.msra.mxu1 %v9439_v47 }
 0x396   : > { %6596 = vmatprep.subr.bf16.mxu0 %v9441_v36  ;;  %6628 = vmatprep.subr.bf16.mxu1 %v9444_v60 }
 0x399   : > { %6598 = vmatpush3.bf16.msra.mxu0 %v9466_v24  ;;  %6630 = vmatpush3.bf16.msra.mxu1 %v9468_v18 }
 0x39a   : > { %6600 = vmatprep.subr.bf16.mxu0 %v9472_v37 }
 0x45b   : > { %v9450_v13 = vpop.f32.mrb[8].mxu0  ;;  %v9452_v61 = vpop.f32.mrb[8].mxu1 }
 0x45c   : > { %v2122_v32 = vsel %vm2121_vm1, %v9450_v13, -inf  ;;  %v2124_v3 = vsel %vm2121_vm1, %v9452_v61, -inf  ;;  %v9458_v29 = vpop.f32.mrb[9].mxu0  ;;  %v9460_v48 = vpop.f32.mrb[9].mxu1 }
 0x45d   : > { %v2123_v15 = vsel %vm2121_vm1, %v9458_v29, -inf  ;;  %v2125_v10 = vsel %vm2121_vm1, %v9460_v48, -inf }
 0x45e   : > { %v2126_v44 = vmax.f32 %v2122_v32, %v2123_v15  ;;  %v2127_v23 = vmax.f32 %v2124_v3, %v2125_v10  ;;  %v1180_v32 = vld [vmem:[#allocation10 + $0x1d8] sm:$0xff]  ;;  %v1131_v3 = vld [vmem:[#allocation10 + $0x50] sm:$0xff] }
 0x45f   : > { %v1132_v15 = vld [vmem:[#allocation10 + $0x58] sm:$0xff]  ;;  %v9474_v10 = vpack.c.bf16 %v1180_v32, %v1179_v38  ;;  %v1182_v38 = vld [vmem:[#allocation10 + $0x1e8] sm:$0xff] }
 0x460   : > { %v2128_v33 = vmax.f32 %v2126_v44, %v2127_v23  ;;  %v9476_v44 = vpack.c.bf16 %v1132_v15, %v1131_v3  ;;  %v9484_v23 = vpack.c.bf16 %v1150_v50, %v1149_v25  ;;  %v1134_v32 = vld [vmem:[#allocation10 + $0x68] sm:$0xff]  ;;  %v9486_v3 = vpack.c.bf16 %v1182_v38, %v1181_v53  ;;  %v1135_v53 = vld [vmem:[#allocation10 + $0x70] sm:$0xff]  ;;  %v1136_v38 = vld [vmem:[#allocation10 + $0x78] sm:$0xff] }
 0x461   : > { %6632 = vmatprep.subr.bf16.mxu1 %v9474_v10  ;;  %v9495_v25 = vpack.c.bf16 %v1152_v4, %v1151_v11  ;;  %v9497_v50 = vpack.c.bf16 %v1184_v20, %v1183_v52 }
 0x462   : > { %2129 = vmax.xlane.f32.xlu0 %v2128_v33  ;;  %6602 = vmatpush3.bf16.msra.mxu0 %v9476_v44  ;;  %v1133_v33 = vld [vmem:[#allocation10 + $0x60] sm:$0xff] }
 0x463   : > { %6634 = vmatpush3.bf16.msra.mxu1 %v9479_v19  ;;  %v9488_v15 = vpack.c.bf16 %v1134_v32, %v1133_v33  ;;  %6604 = vmatprep.subr.bf16.mxu0 %v9484_v23  ;;  %10741 = vst [vmem:[#allocation213_spill] sm:$0xff] %v9495_v25  ;;  %10742 = vst [vmem:[#allocation214_spill] sm:$0xff] %v9497_v50  ;;  %v1167_v33 = vld [vmem:[#allocation10 + $0x170] sm:$0xff]  ;;  %v9500_v32 = vpack.c.bf16 %v1136_v38, %v1135_v53 }
 0x464   : > { %6636 = vmatprep.subr.bf16.mxu1 %v9486_v3  ;;  %v9504_v57 = vpack.c.bf16 %v1168_v42, %v1167_v33 }
 0x465   : > { %10739 = vst [vmem:[#allocation211_spill] sm:$0xff] %v9488_v15  ;;  %10743 = vst [vmem:[#allocation215_spill] sm:$0xff] %v9500_v32 }
 0x466   : > { %6606 = vmatpush3.bf16.msra.mxu0 %v9488_v15  ;;  %10744 = vst [vmem:[#allocation216_spill] sm:$0xff] %v9504_v57 }
 0x467   : > { %6638 = vmatpush3.bf16.msra.mxu1 %v9491_v8  ;;  %6608 = vmatprep.subr.bf16.mxu0 %v9495_v25 }
 0x468   : > { %6640 = vmatprep.subr.bf16.mxu1 %v9497_v50 }
 0x46a   : > { %6610 = vmatpush3.bf16.msra.mxu0 %v9500_v32 }
 0x46b   : > { %6642 = vmatpush3.bf16.msra.mxu1 %v9504_v57  ;;  %6644 = vmatprep.subr.bf16.mxu0 %v9396_v6 }
 0x46c   : > { %6676 = vmatprep.subr.bf16.mxu1 %v9398_v56 }
 0x4ef   : > { %v2130_v52 = vpop.xlane.xlu0 %2129 }
 0x4f0   : > { %v2131_v20 = vsub.f32 %v9450_v13, %v2130_v52  ;;  %v2132_v4 = vsub.f32 %v9458_v29, %v2130_v52  ;;  %v2133_v11 = vsub.f32 %v9452_v61, %v2130_v52  ;;  %v2134_v53 = vsub.f32 %v9460_v48, %v2130_v52 }
 0x4f2   : > { %v2135_v38 = vmul.f32 1.442695, %v2131_v20  ;;  %v2137_v33 = vmul.f32 1.442695, %v2132_v4  ;;  %v2139_v42 = vmul.f32 1.442695, %v2133_v11 }
 0x4f3   : > { %v2141_v51 = vmul.f32 1.442695, %v2134_v53  ;;  %v2435_v20 = vld [vmem:[#allocation14 + $0x30] sm:$0xff]  ;;  %v2436_v4 = vld [vmem:[#allocation14 + $0x38] sm:$0xff]  ;;  %v2437_v53 = vld [vmem:[#allocation14 + $0x40] sm:$0xff] }
 0x4f4   : > { %7821 = vpow2.f32 %v2135_v38  ;;  %v6717_v11 = vpack.c.bf16 %v2436_v4, %v2435_v20  ;;  %v2438_v38 = vld [vmem:[#allocation14 + $0x48] sm:$0xff]  ;;  %v1189_v4 = vld [vmem:[#allocation11 + $0x20] sm:$0xff] }
 0x4f5   : > { %7823 = vpow2.f32 %v2137_v33  ;;  %v6720_v33 = vpack.c.bf16 %v2438_v38, %v2437_v53  ;;  %v1191_v38 = vld [vmem:[#allocation11 + $0x30] sm:$0xff] }
 0x4f6   : > { %7825 = vpow2.f32 %v2139_v42  ;;  %v2439_v42 = vld [vmem:[#allocation14 + $0x50] sm:$0xff] }
 0x4f7   : > { %7827 = vpow2.f32 %v2141_v51  ;;  %v2429_v51 = vld [vmem:[#allocation14] sm:$0xff] }
 0x4fe   : > { %v7822_v6 = vpop.eup %7821 }
 0x4ff   : > { %v7824_v9 = vpop.eup %7823  ;;  %v2283_v56 = vmul.f32 %v7822_v6, %v9292_v35  ;;  %v2431_v35 = vld [vmem:[#allocation14 + $0x10] sm:$0xff] }
 0x500   : > { %v7826_v40 = vpop.eup %7825  ;;  %2207 = vmatprep.mubr.f32.mxu0 %v7824_v9  ;;  %v2284_v13 = vmul.f32 %v7824_v9, %v9296_v30  ;;  %v2430_v9 = vld [vmem:[#allocation14 + $0x8] sm:$0xff]  ;;  %v2432_v30 = vld [vmem:[#allocation14 + $0x18] sm:$0xff] }
 0x501   : > { %v7828_v29 = vpop.eup %7827  ;;  %2208 = vmatmul.mubr.f32.vlgmr.msra.gmra.mrb[10].mxu0 %v7822_v6  ;;  %v2285_v61 = vmul.f32 %v7826_v40, %v9294_v41  ;;  %v6708_v41 = vpack.c.bf16 %v2430_v9, %v2429_v51  ;;  %v2433_v6 = vld [vmem:[#allocation14 + $0x20] sm:$0xff]  ;;  %v2443_v9 = vld [vmem:[#allocation14 + $0x70] sm:$0xff] }
 0x502   : > { %2277 = vmatprep.mubr.f32.mxu1 %v7828_v29  ;;  %6646 = vmatpush3.bf16.msra.mxu0 %v9400_v0  ;;  %v2286_v48 = vmul.f32 %v7828_v29, %v9298_v31  ;;  %v6711_v31 = vpack.c.bf16 %v2432_v30, %v2431_v35  ;;  %v2444_v35 = vld [vmem:[#allocation14 + $0x78] sm:$0xff]  ;;  %v1185_v30 = vld [vmem:[#allocation11] sm:$0xff] }
 0x503   : > { %2278 = vmatmul.mubr.f32.vlgmr.msra.gmra.mrb[10].mxu1 %v7826_v40  ;;  %2351 = vmatprep.mubr.f32.mxu0 %v2284_v13  ;;  %v10745_v40 = vmov 0.0|0.0   ;;  %v2440_v13 = vld [vmem:[#allocation14 + $0x58] sm:$0xff] }
 0x504   : > { %6678 = vmatpush3.bf16.msra.mxu1 %v9403_v21  ;;  %2421 = vmatprep.mubr.f32.mxu1 %v2286_v48  ;;  %v6723_v29 = vpack.c.bf16 %v2440_v13, %v2439_v42  ;;  %v2442_v48 = vld [vmem:[#allocation14 + $0x68] sm:$0xff]  ;;  %v1193_v13 = vld [vmem:[#allocation11 + $0x40] sm:$0xff] }
 0x505   : > { %6648 = vmatprep.subr.bf16.mxu0 %v9407_v14  ;;  %6680 = vmatprep.subr.bf16.mxu1 %v9409_v45 }
 0x506   : > { %6650 = vmatpush3.bf16.msra.mxu0 %v9412_v59 }
 0x507   : > { %6652 = vmatprep.subr.bf16.mxu0 %v9418_v54 }
 0x508   : > { %6682 = vmatpush3.bf16.msra.mxu1 %v9416_v63 }
 0x509   : > { %6684 = vmatprep.subr.bf16.mxu1 %v9420_v12 }
 0x50a   : > { %6654 = vmatpush3.bf16.msra.mxu0 %v9423_v22 }
 0x50b   : > { %6656 = vmatprep.subr.bf16.mxu0 %v9429_v49 }
 0x50c   : > { %6686 = vmatpush3.bf16.msra.mxu1 %v9427_v1 }
 0x50d   : > { %6688 = vmatprep.subr.bf16.mxu1 %v9432_v26 }
 0x50e   : > { %6658 = vmatpush3.bf16.msra.mxu0 %v9435_v62 }
 0x50f   : > { %6660 = vmatprep.subr.bf16.mxu0 %v9441_v36 }
 0x510   : > { %6690 = vmatpush3.bf16.msra.mxu1 %v9439_v47 }
 0x511   : > { %6692 = vmatprep.subr.bf16.mxu1 %v9444_v60 }
 0x512   : > { %6662 = vmatpush3.bf16.msra.mxu0 %v9466_v24 }
 0x513   : > { %6664 = vmatprep.subr.bf16.mxu0 %v9472_v37 }
 0x514   : > { %6694 = vmatpush3.bf16.msra.mxu1 %v9468_v18 }
 0x515   : > { %6696 = vmatprep.subr.bf16.mxu1 %v9474_v10 }
 0x516   : > { %6666 = vmatpush3.bf16.msra.mxu0 %v9476_v44 }
 0x517   : > { %6668 = vmatprep.subr.bf16.mxu0 %v9484_v23 }
 0x518   : > { %6698 = vmatpush3.bf16.msra.mxu1 %v9479_v19 }
 0x519   : > { %6700 = vmatprep.subr.bf16.mxu1 %v9486_v3 }
 0x51a   : > { %6670 = vmatpush3.bf16.msra.mxu0 %v9488_v15 }
 0x51b   : > { %6672 = vmatprep.subr.bf16.mxu0 %v9495_v25  ;;  %v10815_v25 = vld [vmem:[#allocation79_spill] sm:$0xff] }
 0x51c   : > { %6702 = vmatpush3.bf16.msra.mxu1 %v9491_v8  ;;  %v10816_v8 = vld [vmem:[#allocation80_spill] sm:$0xff] }
 0x51d   : > { %6704 = vmatprep.subr.bf16.mxu1 %v9497_v50 }
 0x51e   : > { %6674 = vmatpush3.bf16.msra.mxu0 %v9500_v32 }
 0x51f   : > { %6707 = vmatprep.subr.bf16.mxu0 %v10745_v40 }
 0x520   : > { %6706 = vmatpush3.bf16.msra.mxu1 %v9504_v57 }
 0x521   : > { %2352 = vmatmul.mubr.f32.vlgmr.msra.gmra.mrb[12].mxu0 %v2283_v56  ;;  %6731 = vmatprep.subr.bf16.mxu1 %v10745_v40  ;;  %v2434_v56 = vld [vmem:[#allocation14 + $0x28] sm:$0xff] }
 0x522   : > { %5617 = vmatprep.mubr.msk.f32.mxu0 %vm8254_vm0, %v10608_v2  ;;  %6709 = vmatpush3.bf16.msra.mxu0 %v6708_v41  ;;  %v6714_v52 = vpack.c.bf16 %v2434_v56, %v2433_v6  ;;  %v6729_v41 = vpack.c.bf16 %v2444_v35, %v2443_v9  ;;  %v1187_v56 = vld [vmem:[#allocation11 + $0x10] sm:$0xff]  ;;  %v1197_v35 = vld [vmem:[#allocation11 + $0x60] sm:$0xff] }
 0x523   : > { %2422 = vmatmul.mubr.f32.vlgmr.msra.gmra.mrb[12].mxu1 %v2285_v61  ;;  %6710 = vmatprep.subr.bf16.mxu0 %v10745_v40  ;;  %v2441_v61 = vld [vmem:[#allocation14 + $0x60] sm:$0xff] }
 0x524   : > { %5652 = vmatprep.mubr.msk.f32.mxu1 %vm8254_vm0, %v10608_v2  ;;  %v6726_v51 = vpack.c.bf16 %v2442_v48, %v2441_v61  ;;  %v1195_v48 = vld [vmem:[#allocation11 + $0x50] sm:$0xff] }
 0x526   : > { %6712 = vmatpush3.bf16.msra.mxu0 %v6711_v31  ;;  %v1186_v31 = vld [vmem:[#allocation11 + $0x8] sm:$0xff] }
 0x527   : > { %6713 = vmatprep.subr.bf16.mxu0 %v10745_v40  ;;  %v9562_v6 = vpack.c.bf16 %v1186_v31, %v1185_v30 }
 0x529   : > { %10746 = vst [vmem:[#allocation217_spill] sm:$0xff] %v9562_v6  ;;  %6733 = vmatpush3.bf16.msra.mxu1 %v9562_v6 }
 0x52a   : > { %6715 = vmatpush3.bf16.msra.mxu0 %v6714_v52  ;;  %v1188_v52 = vld [vmem:[#allocation11 + $0x18] sm:$0xff]  ;;  %6734 = vmatprep.subr.bf16.mxu1 %v10745_v40 }
 0x52b   : > { %6716 = vmatprep.subr.bf16.mxu0 %v10745_v40  ;;  %v9565_v20 = vpack.c.bf16 %v1188_v52, %v1187_v56 }
 0x52d   : > { %10747 = vst [vmem:[#allocation218_spill] sm:$0xff] %v9565_v20  ;;  %6736 = vmatpush3.bf16.msra.mxu1 %v9565_v20 }
 0x52e   : > { %6718 = vmatpush3.bf16.msra.mxu0 %v6717_v11  ;;  %v1190_v11 = vld [vmem:[#allocation11 + $0x28] sm:$0xff]  ;;  %6737 = vmatprep.subr.bf16.mxu1 %v10745_v40 }
 0x52f   : > { %6719 = vmatprep.subr.bf16.mxu0 %v10745_v40  ;;  %v9569_v53 = vpack.c.bf16 %v1190_v11, %v1189_v4 }
 0x531   : > { %10748 = vst [vmem:[#allocation219_spill] sm:$0xff] %v9569_v53  ;;  %6739 = vmatpush3.bf16.msra.mxu1 %v9569_v53 }
 0x532   : > { %6721 = vmatpush3.bf16.msra.mxu0 %v6720_v33  ;;  %v1192_v33 = vld [vmem:[#allocation11 + $0x38] sm:$0xff]  ;;  %6740 = vmatprep.subr.bf16.mxu1 %v10745_v40 }
 0x533   : > { %6722 = vmatprep.subr.bf16.mxu0 %v10745_v40  ;;  %v9573_v42 = vpack.c.bf16 %v1192_v33, %v1191_v38 }
 0x535   : > { %10749 = vst [vmem:[#allocation220_spill] sm:$0xff] %v9573_v42  ;;  %6742 = vmatpush3.bf16.msra.mxu1 %v9573_v42 }
 0x536   : > { %6724 = vmatpush3.bf16.msra.mxu0 %v6723_v29  ;;  %v1194_v29 = vld [vmem:[#allocation11 + $0x48] sm:$0xff]  ;;  %6743 = vmatprep.subr.bf16.mxu1 %v10745_v40 }
 0x537   : > { %6725 = vmatprep.subr.bf16.mxu0 %v10745_v40  ;;  %v9577_v61 = vpack.c.bf16 %v1194_v29, %v1193_v13 }
 0x539   : > { %10750 = vst [vmem:[#allocation221_spill] sm:$0xff] %v9577_v61  ;;  %6745 = vmatpush3.bf16.msra.mxu1 %v9577_v61 }
 0x53a   : > { %6727 = vmatpush3.bf16.msra.mxu0 %v6726_v51  ;;  %v1196_v51 = vld [vmem:[#allocation11 + $0x58] sm:$0xff]  ;;  %6746 = vmatprep.subr.bf16.mxu1 %v10745_v40 }
 0x53b   : > { %6728 = vmatprep.subr.bf16.mxu0 %v10745_v40  ;;  %v9581_v9 = vpack.c.bf16 %v1196_v51, %v1195_v48 }
 0x53d   : > { %10751 = vst [vmem:[#allocation222_spill] sm:$0xff] %v9581_v9  ;;  %6748 = vmatpush3.bf16.msra.mxu1 %v9581_v9 }
 0x53e   : > { %6730 = vmatpush3.bf16.msra.mxu0 %v6729_v41  ;;  %v1198_v41 = vld [vmem:[#allocation11 + $0x68] sm:$0xff]  ;;  %6749 = vmatprep.subr.bf16.mxu1 %v10745_v40 }
 0x53f   : > { %6755 = vmatprep.subr.bf16.mxu0 %v10745_v40  ;;  %v9585_v30 = vpack.c.bf16 %v1198_v41, %v1197_v35 }
 0x541   : > { %10752 = vst [vmem:[#allocation223_spill] sm:$0xff] %v9585_v30  ;;  %6751 = vmatpush3.bf16.msra.mxu1 %v9585_v30 }
 0x542   : > { %6752 = vmatprep.subr.bf16.mxu1 %v10745_v40 }
 0x5d4   : > { %v5064_v31 = vpop.f32.mrb[10].mxu0 }
 0x5d5   : > { %v5065_v56 = vpop.f32.mrb[11].mxu0 }
 0x5d6   : > { %v5099_v52 = vpop.f32.mrb[10].mxu1  ;;  %v5066_v4 = vadd.f32 %v5065_v56, %v5064_v31  ;;  %v4992_v31 = vld [vmem:[%s10754_s24] ss:$0 sm:$0xff]  ;;  %v2686_v56 = vld [vmem:[#allocation16] sm:$0xff] }
 0x5d7   : > { %v5100_v11 = vpop.f32.mrb[11].mxu1 }
 0x5d8   : > { %v5101_v38 = vadd.f32 %v5100_v11, %v5099_v52  ;;  %v2687_v52 = vld [vmem:[#allocation16 + $0x8] sm:$0xff] }
 0x5da   : > { %v2280_v33 = vadd.f32 %v5101_v38, %v5066_v4 }
 0x5dc   : > { %7829 = vrcp.f32 %v2280_v33  ;;  %v6780_v33 = vpack.c.bf16 %v2687_v52, %v2686_v56  ;;  %v2692_v56 = vld [vmem:[#allocation16 + $0x30] sm:$0xff]  ;;  %v2693_v52 = vld [vmem:[#allocation16 + $0x38] sm:$0xff] }
 0x5e6   : > { %v7830_v32 = vpop.eup %7829 }
 0x5f4   : > { %v5134_v13 = vpop.f32.mrb[12].mxu0 }
 0x5f5   : > { %v5135_v29 = vpop.f32.mrb[13].mxu0 }
 0x5f6   : > { %v5169_v48 = vpop.f32.mrb[12].mxu1  ;;  %v5136_v51 = vadd.f32 %v5135_v29, %v5134_v13  ;;  %v7849_v13 = vld [vmem:[%s8706_s30] sm:$0x3]  ;;  %s8132_s30 = scalar_lea.vmem %s10166_s6, 16 }
 0x5f7   : > { %v5170_v35 = vpop.f32.mrb[13].mxu1  ;;  %p8133_p6 = scmp.ne.s32.totalorder %s10166_s6, %s8132_s30  ;;  %p8140_p4 = scmp.lt.s32.totalorder %s8138_s18, %s8132_s30 }
 0x5f8   : > { %v5171_v41 = vadd.f32 %v5170_v35, %v5169_v48  ;;  %v2688_v48 = vld [vmem:[#allocation16 + $0x10] sm:$0xff] }
 0x5f9   : > { %p8134_p10 = pnand %p8133_p6, %p10966_p5  ;;  %p8141_p9 = por %p8140_p4, %p8139_p2 }
 0x5fa   : > { %v2424_v57 = vadd.f32 %v5171_v41, %v5136_v51  ;;  %v2689_v51 = vld [vmem:[#allocation16 + $0x18] sm:$0xff] }
 0x5fb   : > { %v6783_v41 = vpack.c.bf16 %v2689_v51, %v2688_v48  ;;  %v2697_v48 = vld [vmem:[#allocation16 + $0x58] sm:$0xff]  ;;  %p8135_p1 = pneg %p8134_p10 }
 0x5fc   : > { %v2428_v50 = vmul.f32 %v7830_v32, %v2424_v57  ;;  %v1200_v32 = vld [vmem:[#allocation11 + $0x78] sm:$0xff] }
 0x5fd   : > { %p8142_p8 = pnand %p8141_p9, %p8135_p1 }
 0x5fe   : > { %5618 = vmatmul.mubr.f32.vlgmr.msra.gmra.mrb[14].mxu0 %v2428_v50  ;;  %v1199_v50 = vld [vmem:[#allocation11 + $0x70] sm:$0xff] }
 0x5ff   : > { %6757 = vmatpush3.bf16.msra.mxu0 %v9562_v6  ;;  %5687 = vmatprep.mubr.msk.f32.mxu0 %vm8254_vm0, %v10608_v2  ;;  %v9606_v57 = vpack.c.bf16 %v1200_v32, %v1199_v50  ;;  %v2690_v50 = vld [vmem:[#allocation16 + $0x20] sm:$0xff]  ;;  %v2691_v32 = vld [vmem:[#allocation16 + $0x28] sm:$0xff] }
 0x600   : > { %6758 = vmatprep.subr.bf16.mxu0 %v10745_v40 }
 0x601   : > { %10753 = vst [vmem:[#allocation224_spill] sm:$0xff] %v9606_v57  ;;  %6754 = vmatpush3.bf16.msra.mxu1 %v9606_v57 }
 0x602   : > { %6779 = vmatprep.subr.bf16.mxu1 %v10745_v40 }
 0x603   : > { %6760 = vmatpush3.bf16.msra.mxu0 %v9565_v20 }
 0x604   : > { %6761 = vmatprep.subr.bf16.mxu0 %v10745_v40 }
 0x607   : > { %6763 = vmatpush3.bf16.msra.mxu0 %v9569_v53 }
 0x608   : > { %6764 = vmatprep.subr.bf16.mxu0 %v10745_v40 }
 0x60b   : > { %6766 = vmatpush3.bf16.msra.mxu0 %v9573_v42 }
 0x60c   : > { %6767 = vmatprep.subr.bf16.mxu0 %v10745_v40 }
 0x60f   : > { %6769 = vmatpush3.bf16.msra.mxu0 %v9577_v61 }
 0x610   : > { %6770 = vmatprep.subr.bf16.mxu0 %v10745_v40 }
 0x613   : > { %6772 = vmatpush3.bf16.msra.mxu0 %v9581_v9 }
 0x614   : > { %6773 = vmatprep.subr.bf16.mxu0 %v10745_v40 }
 0x617   : > { %6775 = vmatpush3.bf16.msra.mxu0 %v9585_v30 }
 0x618   : > { %6776 = vmatprep.subr.bf16.mxu0 %v10745_v40 }
 0x61b   : > { %6778 = vmatpush3.bf16.msra.mxu0 %v9606_v57 }
 0x61c   : > { %6803 = vmatprep.subr.bf16.mxu0 %v10745_v40 }
 0x6d1   : > { %v2518_v4 = vpop.f32.mrb[14].mxu0 }
 0x6d2   : > { %v2519_v11 = vadd.f32 %v4992_v31, %v2518_v4  ;;  %v5619_v38 = vpop.f32.mrb[15].mxu0  ;;  %v6786_v31 = vpack.c.bf16 %v2691_v32, %v2690_v50  ;;  %v6789_v4 = vpack.c.bf16 %v2693_v52, %v2692_v56  ;;  %v2700_v32 = vld [vmem:[#allocation16 + $0x70] sm:$0xff] }
 0x6d3   : > { %v2695_v38 = vld [vmem:[#allocation16 + $0x48] sm:$0xff] }
 0x6d4   : > { %v9616_v29 = vadd.f32 %v7849_v13, %v2519_v11  ;;  %v2694_v11 = vld [vmem:[#allocation16 + $0x40] sm:$0xff]  ;;  %v2696_v13 = vld [vmem:[#allocation16 + $0x50] sm:$0xff] }
 0x6d5   : > { %v6795_v51 = vpack.c.bf16 %v2697_v48, %v2696_v13 }
 0x6d6   : > { %v2595_v35 = vmul.f32 %v9616_v29, %v9616_v29  ;;  %5653 = vmatmul.mubr.f32.vlgmr.msra.gmra.mrb[14].mxu1 %v9616_v29 }
 0x6d7   : > { %6781 = vmatpush3.bf16.msra.mxu1 %v6780_v33  ;;  %5722 = vmatprep.mubr.msk.f32.mxu1 %vm8254_vm0, %v10608_v2  ;;  %v6792_v33 = vpack.c.bf16 %v2695_v38, %v2694_v11 }
 0x6d8   : > { %5688 = vmatmul.mubr.f32.vlgmr.msra.gmra.mrb[16].mxu0 %v2595_v35  ;;  %6782 = vmatprep.subr.bf16.mxu1 %v10745_v40  ;;  %v2698_v35 = vld [vmem:[#allocation16 + $0x60] sm:$0xff] }
 0x6d9   : > { %6805 = vmatpush3.bf16.msra.mxu0 %v9562_v6  ;;  %5757 = vmatprep.mubr.msk.f32.mxu0 %vm8254_vm0, %v10608_v2 }
 0x6da   : > { %6806 = vmatprep.subr.bf16.mxu0 %v10745_v40 }
 0x6db   : > { %6784 = vmatpush3.bf16.msra.mxu1 %v6783_v41  ;;  %v2699_v41 = vld [vmem:[#allocation16 + $0x68] sm:$0xff] }
 0x6dc   : > { %6785 = vmatprep.subr.bf16.mxu1 %v10745_v40  ;;  %v6798_v50 = vpack.c.bf16 %v2699_v41, %v2698_v35  ;;  %v4993_v41 = vld [vmem:[%s10755_s9] ss:$0 sm:$0xff] }
 0x6dd   : > { %6808 = vmatpush3.bf16.msra.mxu0 %v9565_v20 }
 0x6de   : > { %6809 = vmatprep.subr.bf16.mxu0 %v10745_v40 }
 0x6df   : > { %6787 = vmatpush3.bf16.msra.mxu1 %v6786_v31  ;;  %v2701_v31 = vld [vmem:[#allocation16 + $0x78] sm:$0xff] }
 0x6e0   : > { %6788 = vmatprep.subr.bf16.mxu1 %v10745_v40  ;;  %v6801_v56 = vpack.c.bf16 %v2701_v31, %v2700_v32  ;;  %v4994_v32 = vld [vmem:[%s10756_s13] ss:$0 sm:$0xff] }
 0x6e1   : > { %6811 = vmatpush3.bf16.msra.mxu0 %v9569_v53 }
 0x6e2   : > { %6812 = vmatprep.subr.bf16.mxu0 %v10745_v40 }
 0x6e3   : > { %6790 = vmatpush3.bf16.msra.mxu1 %v6789_v4 }
 0x6e4   : > { %6791 = vmatprep.subr.bf16.mxu1 %v10745_v40 }
 0x6e5   : > { %6814 = vmatpush3.bf16.msra.mxu0 %v9573_v42 }
 0x6e6   : > { %6815 = vmatprep.subr.bf16.mxu0 %v10745_v40 }
 0x6e7   : > { %6793 = vmatpush3.bf16.msra.mxu1 %v6792_v33 }
 0x6e8   : > { %6794 = vmatprep.subr.bf16.mxu1 %v10745_v40 }
 0x6e9   : > { %6817 = vmatpush3.bf16.msra.mxu0 %v9577_v61 }
 0x6ea   : > { %6818 = vmatprep.subr.bf16.mxu0 %v10745_v40 }
 0x6eb   : > { %6796 = vmatpush3.bf16.msra.mxu1 %v6795_v51 }
 0x6ec   : > { %6797 = vmatprep.subr.bf16.mxu1 %v10745_v40 }
 0x6ed   : > { %6820 = vmatpush3.bf16.msra.mxu0 %v9581_v9 }
 0x6ee   : > { %6821 = vmatprep.subr.bf16.mxu0 %v10745_v40 }
 0x6ef   : > { %6799 = vmatpush3.bf16.msra.mxu1 %v6798_v50 }
 0x6f0   : > { %6800 = vmatprep.subr.bf16.mxu1 %v10745_v40 }
 0x6f1   : > { %6823 = vmatpush3.bf16.msra.mxu0 %v9585_v30 }
 0x6f2   : > { %6824 = vmatprep.subr.bf16.mxu0 %v10745_v40 }
 0x6f3   : > { %6802 = vmatpush3.bf16.msra.mxu1 %v6801_v56 }
 0x6f4   : > { %6827 = vmatprep.subr.bf16.mxu1 %v10745_v40 }
 0x6f5   : > { %6826 = vmatpush3.bf16.msra.mxu0 %v9606_v57 }
 0x7a9   : > { %v2591_v52 = vpop.f32.mrb[14].mxu1 }
 0x7aa   : > { %v2666_v4 = vmul.f32 %v2591_v52, %v2591_v52  ;;  %v5654_v11 = vpop.f32.mrb[15].mxu1  ;;  %v2668_v51 = vsub.f32 %v9616_v29, %v2591_v52  ;;  %v2945_v29 = vld [vmem:[#allocation13 + $0x188] sm:$0xff]  ;;  %v2948_v52 = vld [vmem:[#allocation13 + $0x1a0] sm:$0xff] }
 0x7ab   : > { %v2662_v38 = vpop.f32.mrb[16].mxu0  ;;  %v4995_v11 = vld [vmem:[%s10757_s22] ss:$0 sm:$0xff] }
 0x7ac   : > { %v2667_v33 = vsub.f32 %v2662_v38, %v2666_v4  ;;  %v5689_v13 = vpop.f32.mrb[17].mxu0  ;;  %v6851_v4 = vpack.c.bf16 %v2948_v52, %v2945_v29  ;;  %v2944_v38 = vld [vmem:[#allocation13 + $0x180] sm:$0xff]  ;;  %v2953_v29 = vld [vmem:[#allocation13 + $0x1c8] sm:$0xff] }
 0x7ae   : > { %v2669_v48 = vadd.f32 1e-05, %v2667_v33  ;;  %6852 = vmatprep.subr.bf16.mxu0 %v6851_v4  ;;  %v2947_v33 = vld [vmem:[#allocation13 + $0x198] sm:$0xff] }
 0x7b0   : > { %7831 = vrsqrt.f32 %v2669_v48  ;;  %v2951_v48 = vld [vmem:[#allocation13 + $0x1b8] sm:$0xff] }
 0x7ba   : > { %v7832_v35 = vpop.eup %7831 }
 0x7bb   : > { %v2671_v50 = vmul.f32 %v7832_v35, %v2668_v51  ;;  %v2954_v51 = vld [vmem:[#allocation13 + $0x1d0] sm:$0xff] }
 0x7bd   : > { %v2678_v31 = vmul.f32 %v4993_v41, %v2671_v50  ;;  %v2946_v50 = vld [vmem:[#allocation13 + $0x190] sm:$0xff] }
 0x7bf   : > { %v2685_v56 = vadd.f32 %v4994_v32, %v2678_v31  ;;  %v2949_v32 = vld [vmem:[#allocation13 + $0x1a8] sm:$0xff]  ;;  %v6853_v31 = vpack.c.bf16 %v2947_v33, %v2944_v38  ;;  %v2960_v38 = vld [vmem:[#allocation13 + $0x200] sm:$0xff] }
 0x7c0   : > { %v6884_v52 = vpack.c.bf16 %v2949_v32, %v2946_v50  ;;  %v2962_v50 = vld [vmem:[#allocation13 + $0x210] sm:$0xff]  ;;  %v2964_v32 = vld [vmem:[#allocation13 + $0x220] sm:$0xff] }
 0x7c1   : > { %5723 = vmatmul.mubr.f32.vlgmr.msra.gmra.mrb[16].mxu1 %v2685_v56 }
 0x7c2   : > { %6829 = vmatpush3.bf16.msra.mxu1 %v9562_v6  ;;  %5792 = vmatprep.mubr.msk.f32.mxu1 %vm8254_vm0, %v10608_v2  ;;  %v10813_v6 = vld [vmem:[#allocation77_spill] sm:$0xff] }
 0x7c3   : > { %6830 = vmatprep.subr.bf16.mxu1 %v10745_v40 }
 0x7c6   : > { %6832 = vmatpush3.bf16.msra.mxu1 %v9565_v20 }
 0x7c7   : > { %6833 = vmatprep.subr.bf16.mxu1 %v10745_v40 }
 0x7ca   : > { %6835 = vmatpush3.bf16.msra.mxu1 %v9569_v53 }
 0x7cb   : > { %6836 = vmatprep.subr.bf16.mxu1 %v10745_v40 }
 0x7ce   : > { %6838 = vmatpush3.bf16.msra.mxu1 %v9573_v42  ;;  %v2955_v42 = vld [vmem:[#allocation13 + $0x1d8] sm:$0xff] }
 0x7cf   : > { %6839 = vmatprep.subr.bf16.mxu1 %v10745_v40 }
 0x7d2   : > { %6841 = vmatpush3.bf16.msra.mxu1 %v9577_v61  ;;  %v2952_v61 = vld [vmem:[#allocation13 + $0x1c0] sm:$0xff] }
 0x7d3   : > { %6842 = vmatprep.subr.bf16.mxu1 %v10745_v40 }
 0x7d6   : > { %6844 = vmatpush3.bf16.msra.mxu1 %v9581_v9  ;;  %v2950_v9 = vld [vmem:[#allocation13 + $0x1b0] sm:$0xff] }
 0x7d7   : > { %6845 = vmatprep.subr.bf16.mxu1 %v10745_v40  ;;  %v6857_v53 = vpack.c.bf16 %v2953_v29, %v2950_v9  ;;  %v2959_v9 = vld [vmem:[#allocation13 + $0x1f8] sm:$0xff] }
 0x7d8   : > { %v2967_v29 = vld [vmem:[#allocation13 + $0x238] sm:$0xff] }
 0x7da   : > { %6847 = vmatpush3.bf16.msra.mxu1 %v9585_v30  ;;  %v6855_v30 = vpack.c.bf16 %v2954_v51, %v2951_v48  ;;  %v2958_v48 = vld [vmem:[#allocation13 + $0x1f0] sm:$0xff] }
 0x7db   : > { %6848 = vmatprep.subr.bf16.mxu1 %v10745_v40 }
 0x7de   : > { %6850 = vmatpush3.bf16.msra.mxu1 %v9606_v57 }
 0x7df   : > { %6883 = vmatprep.subr.bf16.mxu1 %v10745_v40 }
 0x894   : > { %v2775_v13 = vpop.f32.mrb[16].mxu1 }
 0x895   : > { %v2776_v35 = vadd.f32 %v4995_v11, %v2775_v13  ;;  %v5724_v41 = vpop.f32.mrb[17].mxu1  ;;  %v2957_v11 = vld [vmem:[#allocation13 + $0x1e8] sm:$0xff]  ;;  %v2956_v13 = vld [vmem:[#allocation13 + $0x1e0] sm:$0xff] }
 0x896   : > { %v6859_v33 = vpack.c.bf16 %v2960_v38, %v2957_v11  ;;  %v6861_v51 = vpack.c.bf16 %v2959_v9, %v2956_v13  ;;  %v2968_v38 = vld [vmem:[#allocation13 + $0x240] sm:$0xff]  ;;  %v2970_v13 = vld [vmem:[#allocation13 + $0x250] sm:$0xff] }
 0x897   : > { %v9676_v57 = vadd.f32 %v2776_v35, %v2685_v56  ;;  %v6887_v56 = vpack.c.bf16 %v2955_v42, %v2952_v61  ;;  %v2961_v35 = vld [vmem:[#allocation13 + $0x208] sm:$0xff]  ;;  %v2963_v42 = vld [vmem:[#allocation13 + $0x218] sm:$0xff]  ;;  %v2966_v61 = vld [vmem:[#allocation13 + $0x230] sm:$0xff] }
 0x898   : > { %v6863_v41 = vpack.c.bf16 %v2966_v61, %v2963_v42  ;;  %v2974_v61 = vld [vmem:[#allocation13 + $0x270] sm:$0xff] }
 0x899   : > { %v2852_v4 = vmul.f32 %v9676_v57, %v9676_v57  ;;  %5758 = vmatmul.mubr.f32.vlgmr.msra.gmra.mrb[18].mxu0 %v9676_v57 }
 0x89a   : > { %6854 = vmatpush1.bf16.msra.mxu0 %v6853_v31  ;;  %3074 = vmatprep.mubr.f32.mxu0 %v10608_v2 }
 0x89b   : > { %5793 = vmatmul.mubr.f32.vlgmr.msra.gmra.mrb[18].mxu1 %v2852_v4  ;;  %6856 = vmatprep.subr.bf16.mxu0 %v6855_v30  ;;  %v6890_v30 = vpack.c.bf16 %v2961_v35, %v2958_v48  ;;  %v2969_v4 = vld [vmem:[#allocation13 + $0x248] sm:$0xff]  ;;  %v2978_v35 = vld [vmem:[#allocation13 + $0x290] sm:$0xff] }
 0x89c   : > { %6885 = vmatpush3.bf16.msra.mxu1 %v6884_v52  ;;  %5827 = vmatprep.mubr.msk.f32.mxu1 %vm8254_vm0, %v10608_v2  ;;  %v6893_v52 = vpack.c.bf16 %v2967_v29, %v2964_v32  ;;  %v2973_v48 = vld [vmem:[#allocation13 + $0x268] sm:$0xff]  ;;  %v2979_v32 = vld [vmem:[#allocation13 + $0x298] sm:$0xff]  ;;  %v2984_v29 = vld [vmem:[#allocation13 + $0x2c0] sm:$0xff] }
 0x89d   : > { %6886 = vmatprep.subr.bf16.mxu1 %v10745_v40 }
 0x89e   : > { %6858 = vmatpush1.bf16.msra.mxu0 %v6857_v53  ;;  %v2965_v53 = vld [vmem:[#allocation13 + $0x228] sm:$0xff] }
 0x89f   : > { %6860 = vmatprep.subr.bf16.mxu0 %v6859_v33  ;;  %v6865_v31 = vpack.c.bf16 %v2965_v53, %v2962_v50  ;;  %v2971_v33 = vld [vmem:[#allocation13 + $0x258] sm:$0xff]  ;;  %v2976_v50 = vld [vmem:[#allocation13 + $0x280] sm:$0xff] }
 0x8a0   : > { %6888 = vmatpush3.bf16.msra.mxu1 %v6887_v56  ;;  %v2972_v56 = vld [vmem:[#allocation13 + $0x260] sm:$0xff]  ;;  %v6869_v9 = vpack.c.bf16 %v2971_v33, %v2968_v38  ;;  %v2983_v38 = vld [vmem:[#allocation13 + $0x2b8] sm:$0xff]  ;;  %v2982_v33 = vld [vmem:[#allocation13 + $0x2b0] sm:$0xff] }
 0x8a1   : > { %6889 = vmatprep.subr.bf16.mxu1 %v10745_v40  ;;  %v6867_v11 = vpack.c.bf16 %v2972_v56, %v2969_v4  ;;  %v2980_v56 = vld [vmem:[#allocation13 + $0x2a0] sm:$0xff] }
 0x8a2   : > { %6862 = vmatpush1.bf16.msra.mxu0 %v6861_v51  ;;  %v2975_v51 = vld [vmem:[#allocation13 + $0x278] sm:$0xff] }
 0x8a3   : > { %6864 = vmatprep.subr.bf16.mxu0 %v6863_v41  ;;  %v6871_v42 = vpack.c.bf16 %v2978_v35, %v2975_v51  ;;  %v2977_v41 = vld [vmem:[#allocation13 + $0x288] sm:$0xff]  ;;  %v6877_v51 = vpack.c.bf16 %v2983_v38, %v2980_v56 }
 0x8a4   : > { %6891 = vmatpush3.bf16.msra.mxu1 %v6890_v30  ;;  %v6896_v30 = vpack.c.bf16 %v2973_v48, %v2970_v13  ;;  %v6873_v53 = vpack.c.bf16 %v2977_v41, %v2974_v61  ;;  %v2987_v13 = vld [vmem:[#allocation13 + $0x2d8] sm:$0xff]  ;;  %v2990_v48 = vld [vmem:[#allocation13 + $0x2f0] sm:$0xff]  ;;  %v2989_v41 = vld [vmem:[#allocation13 + $0x2e8] sm:$0xff] }
 0x8a5   : > { %6892 = vmatprep.subr.bf16.mxu1 %v10745_v40  ;;  %v6879_v35 = vpack.c.bf16 %v2990_v48, %v2987_v13  ;;  %v2986_v61 = vld [vmem:[#allocation13 + $0x2d0] sm:$0xff] }
 0x8a6   : > { %6866 = vmatpush1.bf16.msra.mxu0 %v6865_v31  ;;  %v2981_v31 = vld [vmem:[#allocation13 + $0x2a8] sm:$0xff]  ;;  %v4996_v13 = vld [vmem:[%s10758_s21] ss:$0 sm:$0xff] }
 0x8a7   : > { %6868 = vmatprep.subr.bf16.mxu0 %v6867_v11  ;;  %v6875_v4 = vpack.c.bf16 %v2984_v29, %v2981_v31  ;;  %v2985_v11 = vld [vmem:[#allocation13 + $0x2c8] sm:$0xff] }
 0x8a8   : > { %6894 = vmatpush3.bf16.msra.mxu1 %v6893_v52  ;;  %v6899_v52 = vpack.c.bf16 %v2979_v32, %v2976_v50  ;;  %v6881_v50 = vpack.c.bf16 %v2989_v41, %v2986_v61  ;;  %v10774_v61 = vld [vmem:[#allocation44_spill] sm:$0xff]  ;;  %v10775_v41 = vld [vmem:[#allocation38_spill] sm:$0xff] }
 0x8a9   : > { %6895 = vmatprep.subr.bf16.mxu1 %v10745_v40 }
 0x8aa   : > { %6870 = vmatpush1.bf16.msra.mxu0 %v6869_v9  ;;  %v6902_v9 = vpack.c.bf16 %v2985_v11, %v2982_v33 }
 0x8ab   : > { %6872 = vmatprep.subr.bf16.mxu0 %v6871_v42  ;;  %v2991_v42 = vld [vmem:[#allocation13 + $0x2f8] sm:$0xff] }
 0x8ac   : > { %6897 = vmatpush3.bf16.msra.mxu1 %v6896_v30  ;;  %v2988_v30 = vld [vmem:[#allocation13 + $0x2e0] sm:$0xff] }
 0x8ad   : > { %6898 = vmatprep.subr.bf16.mxu1 %v10745_v40  ;;  %v6905_v32 = vpack.c.bf16 %v2991_v42, %v2988_v30  ;;  %v10776_v30 = vld [vmem:[#allocation45_spill] sm:$0xff]  ;;  %v10777_v42 = vld [vmem:[#allocation39_spill] sm:$0xff] }
 0x8ae   : > { %6874 = vmatpush1.bf16.msra.mxu0 %v6873_v53 }
 0x8af   : > { %6876 = vmatprep.subr.bf16.mxu0 %v6875_v4 }
 0x8b0   : > { %6900 = vmatpush3.bf16.msra.mxu1 %v6899_v52 }
 0x8b1   : > { %6901 = vmatprep.subr.bf16.mxu1 %v10745_v40 }
 0x8b2   : > { %6878 = vmatpush1.bf16.msra.mxu0 %v6877_v51 }
 0x8b3   : > { %6880 = vmatprep.subr.bf16.mxu0 %v6879_v35  ;;  %v10773_v35 = vld [vmem:[#allocation35_spill] sm:$0xff] }
 0x8b4   : > { %6903 = vmatpush3.bf16.msra.mxu1 %v6902_v9  ;;  %v10772_v9 = vld [vmem:[#allocation43_spill] sm:$0xff] }
 0x8b5   : > { %6904 = vmatprep.subr.bf16.mxu1 %v10745_v40  ;;  %v10814_v40 = vld [vmem:[#allocation78_spill] sm:$0xff] }
 0x8b6   : > { %6882 = vmatpush1.bf16.msra.mxu0 %v6881_v50  ;;  %v10778_v50 = vld [vmem:[#allocation46_spill] sm:$0xff] }
 0x8b7   : > { %6908 = vmatprep.subr.bf16.mxu0 %v8740_v7  ;;  %v4997_v7 = vld [vmem:[%s10759_s15] ss:$0 sm:$0xff] }
 0x8b8   : > { %6906 = vmatpush3.bf16.msra.mxu1 %v6905_v32  ;;  %v10779_v32 = vld [vmem:[#allocation42_spill] sm:$0xff] }
 0x8b9   : > { %6940 = vmatprep.subr.bf16.mxu1 %v8758_v34 }
 0x96c   : > { %v2848_v53 = vpop.f32.mrb[18].mxu0 }
 0x96d   : > { %v2923_v31 = vmul.f32 %v2848_v53, %v2848_v53  ;;  %v5759_v29 = vpop.f32.mrb[19].mxu0  ;;  %v2925_v33 = vsub.f32 %v9676_v57, %v2848_v53  ;;  %v10765_v57 = vld [vmem:[#allocation30_spill] sm:$0xff]  ;;  %v10780_v53 = vld [vmem:[#allocation47_spill] sm:$0xff] }
 0x96e   : > { %v2919_v52 = vpop.f32.mrb[18].mxu1  ;;  %v10782_v29 = vld [vmem:[#allocation49_spill] sm:$0xff] }
 0x96f   : > { %v2924_v4 = vsub.f32 %v2919_v52, %v2923_v31  ;;  %v5794_v56 = vpop.f32.mrb[19].mxu1  ;;  %v10781_v31 = vld [vmem:[#allocation48_spill] sm:$0xff]  ;;  %v4998_v52 = vld [vmem:[%s10577_s7 + $0x3] sm:$0x7]  ;;  %s10965_s7 = sld [smem:[#allocation242_spill]] }
 0x971   : > { %v2926_v38 = vadd.f32 1e-05, %v2924_v4  ;;  %v10783_v4 = vld [vmem:[#allocation50_spill] sm:$0xff] }
 0x972   : > { %v10784_v56 = vsub.s32 0, %v10783_v4 }
 0x973   : > { %7833 = vrsqrt.f32 %v2926_v38 }
 0x974   : > { %v2998_v38 = vrot.slane %v4998_v52, %v10784_v56  ;;  %v10804_v56 = vld [vmem:[#allocation69_spill] sm:$0xff] }
 0x97d   : > { %v7834_v11 = vpop.eup %7833 }
 0x97e   : > { %v2928_v48 = vmul.f32 %v7834_v11, %v2925_v33  ;;  %v10785_v33 = vsub.s32 2, %v10783_v4 }
 0x980   : > { %v2935_v34 = vmul.f32 %v4996_v13, %v2928_v48  ;;  %v3006_v11 = vrot.slane %v4998_v52, %v10785_v33  ;;  %v10806_v33 = vld [vmem:[#allocation71_spill] sm:$0xff] }
 0x982   : > { %v9700_v51 = vadd.f32 %v4997_v7, %v2935_v34 }
 0x984   : > { %10760 = vst [vmem:[#allocation225_spill] sm:$0xff] %v9700_v51  ;;  %3075 = vmatmul.mubr.f32.vlgmr.msra.gmra.mrb[20].mxu0 %v9700_v51  ;;  %5828 = vmatmul.mubr.f32.vlgmr.msra.gmra.mrb[20].mxu1 %v9700_v51  ;;  %v10812_v51 = vsub.s32 1, %v10783_v4  ;;  %v10827_v4 = vld [vmem:[#allocation91_spill] sm:$0xff] }
 0x985   : > { %6910 = vmatpush1.bf16.msra.mxu0 %v8744_v16  ;;  %6942 = vmatpush1.bf16.msra.mxu1 %v8766_v43  ;;  %v10761_v16 = vld [vmem:[#allocation28_spill] sm:$0xff]  ;;  %v10763_v43 = vld [vmem:[#allocation29_spill] sm:$0xff] }
 0x986   : > { %6912 = vmatprep.subr.bf16.mxu0 %v8747_v17  ;;  %6944 = vmatprep.subr.bf16.mxu1 %v8769_v46  ;;  %v10762_v17 = vld [vmem:[#allocation33_spill] sm:$0xff]  ;;  %v10764_v46 = vld [vmem:[#allocation36_spill] sm:$0xff]  ;;  %v3002_v20 = vrot.slane %v4998_v52, %v10812_v51  ;;  %v10819_v51 = vld [vmem:[#allocation83_spill] sm:$0xff] }
 0x987   : > { %3215 = vmatprep.mubr.f32.mxu0 %v10608_v2  ;;  %3286 = vmatprep.mubr.f32.mxu1 %v10608_v2  ;;  %v10826_v52 = vld [vmem:[#allocation90_spill] sm:$0xff] }
 0x989   : > { %6914 = vmatpush1.bf16.msra.mxu0 %v8751_v27  ;;  %6946 = vmatpush1.bf16.msra.mxu1 %v8778_v55  ;;  %v10766_v27 = vld [vmem:[#allocation37_spill] sm:$0xff]  ;;  %v10767_v55 = vld [vmem:[#allocation31_spill] sm:$0xff] }
 0x98a   : > { %6916 = vmatprep.subr.bf16.mxu0 %v8755_v28  ;;  %6948 = vmatprep.subr.bf16.mxu1 %v8782_v58  ;;  %v10768_v28 = vld [vmem:[#allocation40_spill] sm:$0xff] }
 0x98b   : > { %v10769_v58 = vld [vmem:[#allocation32_spill] sm:$0xff] }
 0x98d   : > { %6918 = vmatpush1.bf16.msra.mxu0 %v8761_v39  ;;  %6950 = vmatpush1.bf16.msra.mxu1 %v8791_v5  ;;  %v10770_v39 = vld [vmem:[#allocation41_spill] sm:$0xff]  ;;  %v10771_v5 = vld [vmem:[#allocation34_spill] sm:$0xff] }
 0x98e   : > { %6920 = vmatprep.subr.bf16.mxu0 %v10761_v16  ;;  %6952 = vmatprep.subr.bf16.mxu1 %v10762_v17 }
 0x991   : > { %6922 = vmatpush1.bf16.msra.mxu0 %v10763_v43  ;;  %6954 = vmatpush1.bf16.msra.mxu1 %v10764_v46  ;;  %v10786_v43 = vld [vmem:[#allocation51_spill] sm:$0xff]  ;;  %v10787_v46 = vld [vmem:[#allocation52_spill] sm:$0xff] }
 0x992   : > { %6924 = vmatprep.subr.bf16.mxu0 %v10765_v57  ;;  %6956 = vmatprep.subr.bf16.mxu1 %v10766_v27  ;;  %v10788_v57 = vld [vmem:[#allocation53_spill] sm:$0xff]  ;;  %v10789_v27 = vld [vmem:[#allocation54_spill] sm:$0xff] }
 0x995   : > { %6926 = vmatpush1.bf16.msra.mxu0 %v10767_v55  ;;  %6958 = vmatpush1.bf16.msra.mxu1 %v10768_v28  ;;  %v10790_v55 = vld [vmem:[#allocation55_spill] sm:$0xff]  ;;  %v10791_v28 = vld [vmem:[#allocation56_spill] sm:$0xff] }
 0x996   : > { %6928 = vmatprep.subr.bf16.mxu0 %v10769_v58  ;;  %6960 = vmatprep.subr.bf16.mxu1 %v10770_v39  ;;  %v10792_v58 = vld [vmem:[#allocation57_spill] sm:$0xff]  ;;  %v10793_v39 = vld [vmem:[#allocation58_spill] sm:$0xff] }
 0x999   : > { %6930 = vmatpush1.bf16.msra.mxu0 %v10771_v5  ;;  %6962 = vmatpush1.bf16.msra.mxu1 %v10772_v9  ;;  %v10794_v5 = vld [vmem:[#allocation59_spill] sm:$0xff]  ;;  %v10795_v9 = vld [vmem:[#allocation60_spill] sm:$0xff] }
 0x99a   : > { %6932 = vmatprep.subr.bf16.mxu0 %v10773_v35  ;;  %6964 = vmatprep.subr.bf16.mxu1 %v10774_v61  ;;  %v10796_v35 = vld [vmem:[#allocation61_spill] sm:$0xff]  ;;  %v10797_v61 = vld [vmem:[#allocation62_spill] sm:$0xff] }
 0x99d   : > { %6934 = vmatpush1.bf16.msra.mxu0 %v10775_v41  ;;  %6966 = vmatpush1.bf16.msra.mxu1 %v10776_v30  ;;  %v10798_v41 = vld [vmem:[#allocation63_spill] sm:$0xff]  ;;  %v10799_v30 = vld [vmem:[#allocation64_spill] sm:$0xff] }
 0x99e   : > { %6936 = vmatprep.subr.bf16.mxu0 %v10777_v42  ;;  %6968 = vmatprep.subr.bf16.mxu1 %v10778_v50  ;;  %v10800_v42 = vld [vmem:[#allocation65_spill] sm:$0xff]  ;;  %v10801_v50 = vld [vmem:[#allocation66_spill] sm:$0xff] }
 0x9a1   : > { %6938 = vmatpush1.bf16.msra.mxu0 %v10779_v32  ;;  %6970 = vmatpush1.bf16.msra.mxu1 %v10780_v53  ;;  %v10802_v32 = vld [vmem:[#allocation67_spill] sm:$0xff]  ;;  %v10803_v53 = vld [vmem:[#allocation68_spill] sm:$0xff] }
 0x9a2   : > { %6972 = vmatprep.subr.bf16.mxu0 %v10781_v31  ;;  %7004 = vmatprep.subr.bf16.mxu1 %v10782_v29 }
 0xa57   : > { %v3076_v13 = vpop.f32.mrb[20].mxu0  ;;  %v3147_v48 = vpop.f32.mrb[20].mxu1 }
 0xa58   : > { %v3077_v7 = vadd.f32 %v3076_v13, %v2998_v38  ;;  %v9745_v34 = vadd.f32 %v3147_v48, %v3006_v11  ;;  %v3078_v16 = vpop.f32.mrb[21].mxu0  ;;  %v5829_v17 = vpop.f32.mrb[21].mxu1  ;;  %v10805_v38 = vld [vmem:[#allocation70_spill] sm:$0xff]  ;;  %v10807_v11 = vld [vmem:[#allocation72_spill] sm:$0xff]  ;;  %v10808_v13 = vld [vmem:[#allocation73_spill] sm:$0xff] }
 0xa59   : > { %v10809_v48 = vld [vmem:[#allocation74_spill] sm:$0xff]  ;;  %v10811_v17 = vld [vmem:[#allocation76_spill] sm:$0xff]  ;;  %v3079_v15 = vadd.f32 %v3078_v16, %v3002_v20 }
 0xa5a   : > { %3216 = vmatmul.mubr.f32.vlgmr.msra.gmra.mrb[22].mxu0 %v3077_v7  ;;  %3287 = vmatmul.mubr.f32.vlgmr.msra.gmra.mrb[22].mxu1 %v3077_v7  ;;  %v10810_v7 = vld [vmem:[#allocation75_spill] sm:$0xff]  ;;  %v10818_v20 = vld [vmem:[#allocation82_spill] sm:$0xff]  ;;  %v10828_v16 = vld [vmem:[#allocation92_spill] sm:$0xff] }
 0xa5b   : > { %6974 = vmatpush1.bf16.msra.mxu0 %v10786_v43  ;;  %7006 = vmatpush1.bf16.msra.mxu1 %v10787_v46 }
 0xa5c   : > { %6976 = vmatprep.subr.bf16.mxu0 %v10788_v57  ;;  %7008 = vmatprep.subr.bf16.mxu1 %v10789_v27 }
 0xa5d   : > { %3357 = vmatprep.mubr.f32.mxu0 %v10608_v2  ;;  %3428 = vmatprep.mubr.f32.mxu1 %v10608_v2 }
 0xa5f   : > { %6978 = vmatpush1.bf16.msra.mxu0 %v10790_v55  ;;  %7010 = vmatpush1.bf16.msra.mxu1 %v10791_v28 }
 0xa60   : > { %6980 = vmatprep.subr.bf16.mxu0 %v10792_v58  ;;  %7012 = vmatprep.subr.bf16.mxu1 %v10793_v39 }
 0xa63   : > { %6982 = vmatpush1.bf16.msra.mxu0 %v10794_v5  ;;  %7014 = vmatpush1.bf16.msra.mxu1 %v10795_v9 }
 0xa64   : > { %6984 = vmatprep.subr.bf16.mxu0 %v10796_v35  ;;  %7016 = vmatprep.subr.bf16.mxu1 %v10797_v61 }
 0xa67   : > { %6986 = vmatpush1.bf16.msra.mxu0 %v10798_v41  ;;  %7018 = vmatpush1.bf16.msra.mxu1 %v10799_v30 }
 0xa68   : > { %6988 = vmatprep.subr.bf16.mxu0 %v10800_v42  ;;  %7020 = vmatprep.subr.bf16.mxu1 %v10801_v50 }
 0xa6b   : > { %6990 = vmatpush1.bf16.msra.mxu0 %v10802_v32  ;;  %7022 = vmatpush1.bf16.msra.mxu1 %v10803_v53 }
 0xa6c   : > { %6992 = vmatprep.subr.bf16.mxu0 %v10804_v56  ;;  %7024 = vmatprep.subr.bf16.mxu1 %v10805_v38 }
 0xa6f   : > { %6994 = vmatpush1.bf16.msra.mxu0 %v10806_v33  ;;  %7026 = vmatpush1.bf16.msra.mxu1 %v10807_v11 }
 0xa70   : > { %6996 = vmatprep.subr.bf16.mxu0 %v10808_v13  ;;  %7028 = vmatprep.subr.bf16.mxu1 %v10809_v48 }
 0xa73   : > { %6998 = vmatpush1.bf16.msra.mxu0 %v10810_v7  ;;  %7030 = vmatpush1.bf16.msra.mxu1 %v10811_v17 }
 0xa74   : > { %7000 = vmatprep.subr.bf16.mxu0 %v10813_v6  ;;  %7032 = vmatprep.subr.bf16.mxu1 %v10814_v40 }
 0xa77   : > { %7002 = vmatpush1.bf16.msra.mxu0 %v10815_v25  ;;  %7034 = vmatpush1.bf16.msra.mxu1 %v10816_v8 }
 0xa78   : > { %7036 = vmatprep.subr.bf16.mxu0 %v10781_v31  ;;  %7068 = vmatprep.subr.bf16.mxu1 %v10782_v29  ;;  %v10820_v31 = vld [vmem:[#allocation84_spill] sm:$0xff]  ;;  %v10821_v29 = vld [vmem:[#allocation85_spill] sm:$0xff] }
 0xa7a   : > { %3358 = vmatmul.mubr.f32.vlgmr.msra.gmra.mrb[24].mxu0 %v3079_v15  ;;  %3429 = vmatmul.mubr.f32.vlgmr.msra.gmra.mrb[24].mxu1 %v3079_v15  ;;  %v10817_v15 = vld [vmem:[#allocation81_spill] sm:$0xff] }
 0xa7b   : > { %7038 = vmatpush1.bf16.msra.mxu0 %v10786_v43  ;;  %7070 = vmatpush1.bf16.msra.mxu1 %v10787_v46  ;;  %v10830_v43 = vld [vmem:[#allocation94_spill] sm:$0xff]  ;;  %v10831_v46 = vld [vmem:[#allocation95_spill] sm:$0xff] }
 0xa7c   : > { %7040 = vmatprep.subr.bf16.mxu0 %v10788_v57  ;;  %7072 = vmatprep.subr.bf16.mxu1 %v10789_v27  ;;  %v10832_v57 = vld [vmem:[#allocation96_spill] sm:$0xff]  ;;  %v10833_v27 = vld [vmem:[#allocation97_spill] sm:$0xff] }
 0xa7d   : > { %3499 = vmatprep.mubr.f32.mxu0 %v10608_v2  ;;  %3570 = vmatprep.mubr.f32.mxu1 %v10608_v2 }
 0xa7f   : > { %7042 = vmatpush1.bf16.msra.mxu0 %v10790_v55  ;;  %7074 = vmatpush1.bf16.msra.mxu1 %v10791_v28  ;;  %v10834_v55 = vld [vmem:[#allocation98_spill] sm:$0xff]  ;;  %v10835_v28 = vld [vmem:[#allocation99_spill] sm:$0xff] }
 0xa80   : > { %7044 = vmatprep.subr.bf16.mxu0 %v10792_v58  ;;  %7076 = vmatprep.subr.bf16.mxu1 %v10793_v39  ;;  %v10836_v58 = vld [vmem:[#allocation100_spill] sm:$0xff]  ;;  %v10837_v39 = vld [vmem:[#allocation101_spill] sm:$0xff] }
 0xa83   : > { %7046 = vmatpush1.bf16.msra.mxu0 %v10794_v5  ;;  %7078 = vmatpush1.bf16.msra.mxu1 %v10795_v9  ;;  %v10838_v5 = vld [vmem:[#allocation102_spill] sm:$0xff]  ;;  %v10839_v9 = vld [vmem:[#allocation103_spill] sm:$0xff] }
 0xa84   : > { %7048 = vmatprep.subr.bf16.mxu0 %v10796_v35  ;;  %7080 = vmatprep.subr.bf16.mxu1 %v10797_v61  ;;  %v10840_v35 = vld [vmem:[#allocation104_spill] sm:$0xff]  ;;  %v10841_v61 = vld [vmem:[#allocation105_spill] sm:$0xff] }
 0xa87   : > { %7050 = vmatpush1.bf16.msra.mxu0 %v10798_v41  ;;  %7082 = vmatpush1.bf16.msra.mxu1 %v10799_v30  ;;  %v10842_v41 = vld [vmem:[#allocation106_spill] sm:$0xff]  ;;  %v10843_v30 = vld [vmem:[#allocation107_spill] sm:$0xff] }
 0xa88   : > { %7052 = vmatprep.subr.bf16.mxu0 %v10800_v42  ;;  %7084 = vmatprep.subr.bf16.mxu1 %v10801_v50  ;;  %v10844_v42 = vld [vmem:[#allocation108_spill] sm:$0xff]  ;;  %v10845_v50 = vld [vmem:[#allocation109_spill] sm:$0xff] }
 0xa8b   : > { %7054 = vmatpush1.bf16.msra.mxu0 %v10802_v32  ;;  %7086 = vmatpush1.bf16.msra.mxu1 %v10803_v53  ;;  %v10846_v32 = vld [vmem:[#allocation110_spill] sm:$0xff]  ;;  %v10847_v53 = vld [vmem:[#allocation111_spill] sm:$0xff] }
 0xa8c   : > { %7056 = vmatprep.subr.bf16.mxu0 %v10804_v56  ;;  %7088 = vmatprep.subr.bf16.mxu1 %v10805_v38  ;;  %v10848_v56 = vld [vmem:[#allocation112_spill] sm:$0xff]  ;;  %v10849_v38 = vld [vmem:[#allocation113_spill] sm:$0xff] }
 0xa8f   : > { %7058 = vmatpush1.bf16.msra.mxu0 %v10806_v33  ;;  %7090 = vmatpush1.bf16.msra.mxu1 %v10807_v11  ;;  %v10850_v33 = vld [vmem:[#allocation114_spill] sm:$0xff]  ;;  %v10851_v11 = vld [vmem:[#allocation115_spill] sm:$0xff] }
 0xa90   : > { %7060 = vmatprep.subr.bf16.mxu0 %v10808_v13  ;;  %7092 = vmatprep.subr.bf16.mxu1 %v10809_v48  ;;  %v10852_v13 = vld [vmem:[#allocation116_spill] sm:$0xff]  ;;  %v10853_v48 = vld [vmem:[#allocation117_spill] sm:$0xff] }
 0xa93   : > { %7062 = vmatpush1.bf16.msra.mxu0 %v10810_v7  ;;  %7094 = vmatpush1.bf16.msra.mxu1 %v10811_v17  ;;  %v10854_v7 = vld [vmem:[#allocation118_spill] sm:$0xff]  ;;  %v10855_v17 = vld [vmem:[#allocation119_spill] sm:$0xff] }
 0xa94   : > { %7064 = vmatprep.subr.bf16.mxu0 %v10813_v6  ;;  %7096 = vmatprep.subr.bf16.mxu1 %v10814_v40  ;;  %v10822_v6 = vld [vmem:[#allocation86_spill] sm:$0xff]  ;;  %v10823_v40 = vld [vmem:[#allocation87_spill] sm:$0xff] }
 0xa97   : > { %7066 = vmatpush1.bf16.msra.mxu0 %v10815_v25  ;;  %7098 = vmatpush1.bf16.msra.mxu1 %v10816_v8  ;;  %v10824_v25 = vld [vmem:[#allocation88_spill] sm:$0xff]  ;;  %v10825_v8 = vld [vmem:[#allocation89_spill] sm:$0xff] }
 0xa98   : > { %7100 = vmatprep.subr.bf16.mxu0 %v10817_v15  ;;  %7228 = vmatprep.subr.bf16.mxu1 %v10818_v20  ;;  %v10856_v15 = vld [vmem:[#allocation120_spill] sm:$0xff]  ;;  %v10857_v20 = vld [vmem:[#allocation121_spill] sm:$0xff] }
 0xa9a   : > { %3500 = vmatmul.mubr.f32.vlgmr.msra.gmra.mrb[26].mxu0 %v9745_v34  ;;  %3571 = vmatmul.mubr.f32.vlgmr.msra.gmra.mrb[26].mxu1 %v9745_v34  ;;  %v10829_v34 = vld [vmem:[#allocation93_spill] sm:$0xff] }
 0xa9b   : > { %7102 = vmatpush1.bf16.msra.mxu0 %v10819_v51  ;;  %7230 = vmatpush1.bf16.msra.mxu1 %v10820_v31  ;;  %v10858_v51 = vld [vmem:[#allocation122_spill] sm:$0xff]  ;;  %v10859_v31 = vld [vmem:[#allocation123_spill] sm:$0xff] }
 0xa9c   : > { %7104 = vmatprep.subr.bf16.mxu0 %v10821_v29  ;;  %7232 = vmatprep.subr.bf16.mxu1 %v10822_v6  ;;  %v10860_v29 = vld [vmem:[#allocation124_spill] sm:$0xff]  ;;  %v10861_v6 = vld [vmem:[#allocation125_spill] sm:$0xff] }
 0xa9f   : > { %7106 = vmatpush1.bf16.msra.mxu0 %v10823_v40  ;;  %7234 = vmatpush1.bf16.msra.mxu1 %v10824_v25  ;;  %v10862_v40 = vld [vmem:[#allocation126_spill] sm:$0xff]  ;;  %v10863_v25 = vld [vmem:[#allocation127_spill] sm:$0xff] }
 0xaa0   : > { %7108 = vmatprep.subr.bf16.mxu0 %v10825_v8  ;;  %7236 = vmatprep.subr.bf16.mxu1 %v10826_v52  ;;  %v10864_v8 = vld [vmem:[#allocation128_spill] sm:$0xff]  ;;  %v10865_v52 = vld [vmem:[#allocation129_spill] sm:$0xff] }
 0xaa3   : > { %7110 = vmatpush1.bf16.msra.mxu0 %v10827_v4  ;;  %7238 = vmatpush1.bf16.msra.mxu1 %v10828_v16  ;;  %v10866_v4 = vld [vmem:[#allocation130_spill] sm:$0xff]  ;;  %v10867_v16 = vld [vmem:[#allocation131_spill] sm:$0xff] }
 0xaa4   : > { %7112 = vmatprep.subr.bf16.mxu0 %v10829_v34  ;;  %7240 = vmatprep.subr.bf16.mxu1 %v10830_v43  ;;  %v10868_v34 = vld [vmem:[#allocation132_spill] sm:$0xff]  ;;  %v10869_v43 = vld [vmem:[#allocation133_spill] sm:$0xff] }
 0xaa7   : > { %7114 = vmatpush1.bf16.msra.mxu0 %v10831_v46  ;;  %7242 = vmatpush1.bf16.msra.mxu1 %v10832_v57  ;;  %v10870_v46 = vld [vmem:[#allocation134_spill] sm:$0xff]  ;;  %v10871_v57 = vld [vmem:[#allocation135_spill] sm:$0xff] }
 0xaa8   : > { %7116 = vmatprep.subr.bf16.mxu0 %v10833_v27  ;;  %7244 = vmatprep.subr.bf16.mxu1 %v10834_v55  ;;  %v10872_v27 = vld [vmem:[#allocation136_spill] sm:$0xff]  ;;  %v10873_v55 = vld [vmem:[#allocation137_spill] sm:$0xff] }
 0xaab   : > { %7118 = vmatpush1.bf16.msra.mxu0 %v10835_v28  ;;  %7246 = vmatpush1.bf16.msra.mxu1 %v10836_v58  ;;  %v10874_v28 = vld [vmem:[#allocation138_spill] sm:$0xff]  ;;  %v10875_v58 = vld [vmem:[#allocation139_spill] sm:$0xff] }
 0xaac   : > { %7120 = vmatprep.subr.bf16.mxu0 %v10837_v39  ;;  %7248 = vmatprep.subr.bf16.mxu1 %v10838_v5  ;;  %v10876_v39 = vld [vmem:[#allocation140_spill] sm:$0xff]  ;;  %v10877_v5 = vld [vmem:[#allocation141_spill] sm:$0xff] }
 0xaaf   : > { %7122 = vmatpush1.bf16.msra.mxu0 %v10839_v9  ;;  %7250 = vmatpush1.bf16.msra.mxu1 %v10840_v35  ;;  %v10878_v9 = vld [vmem:[#allocation142_spill] sm:$0xff]  ;;  %v10879_v35 = vld [vmem:[#allocation143_spill] sm:$0xff] }
 0xab0   : > { %7124 = vmatprep.subr.bf16.mxu0 %v10841_v61  ;;  %7252 = vmatprep.subr.bf16.mxu1 %v10842_v41  ;;  %v10880_v61 = vld [vmem:[#allocation144_spill] sm:$0xff]  ;;  %v10881_v41 = vld [vmem:[#allocation145_spill] sm:$0xff] }
 0xab3   : > { %7126 = vmatpush1.bf16.msra.mxu0 %v10843_v30  ;;  %7254 = vmatpush1.bf16.msra.mxu1 %v10844_v42  ;;  %v10882_v30 = vld [vmem:[#allocation146_spill] sm:$0xff] }
 0xab4   : > { %7128 = vmatprep.subr.bf16.mxu0 %v10845_v50  ;;  %7256 = vmatprep.subr.bf16.mxu1 %v10846_v32 }
 0xab7   : > { %7130 = vmatpush1.bf16.msra.mxu0 %v10847_v53  ;;  %7258 = vmatpush1.bf16.msra.mxu1 %v10848_v56 }
 0xab8   : > { %7132 = vmatprep.subr.bf16.mxu0 %v10849_v38  ;;  %7260 = vmatprep.subr.bf16.mxu1 %v10850_v33 }
 0xabb   : > { %7134 = vmatpush1.bf16.msra.mxu0 %v10851_v11  ;;  %7262 = vmatpush1.bf16.msra.mxu1 %v10852_v13 }
 0xabc   : > { %7136 = vmatprep.subr.bf16.mxu0 %v10853_v48  ;;  %7264 = vmatprep.subr.bf16.mxu1 %v10854_v7 }
 0xabf   : > { %7138 = vmatpush1.bf16.msra.mxu0 %v10855_v17  ;;  %7266 = vmatpush1.bf16.msra.mxu1 %v10856_v15  ;;  %v10883_v15 = vld [vmem:[#allocation147_spill] sm:$0xff] }
 0xac0   : > { %7140 = vmatprep.subr.bf16.mxu0 %v10857_v20  ;;  %7268 = vmatprep.subr.bf16.mxu1 %v10858_v51  ;;  %v10884_v20 = vld [vmem:[#allocation148_spill] sm:$0xff]  ;;  %v10885_v51 = vld [vmem:[#allocation149_spill] sm:$0xff] }
 0xac3   : > { %7142 = vmatpush1.bf16.msra.mxu0 %v10859_v31  ;;  %7270 = vmatpush1.bf16.msra.mxu1 %v10860_v29  ;;  %v10886_v31 = vld [vmem:[#allocation150_spill] sm:$0xff]  ;;  %v10887_v29 = vld [vmem:[#allocation151_spill] sm:$0xff] }
 0xac4   : > { %7144 = vmatprep.subr.bf16.mxu0 %v10861_v6  ;;  %7272 = vmatprep.subr.bf16.mxu1 %v10862_v40  ;;  %v10888_v6 = vld [vmem:[#allocation152_spill] sm:$0xff]  ;;  %v10889_v40 = vld [vmem:[#allocation153_spill] sm:$0xff] }
 0xac7   : > { %7146 = vmatpush1.bf16.msra.mxu0 %v10863_v25  ;;  %7274 = vmatpush1.bf16.msra.mxu1 %v10864_v8  ;;  %v10890_v25 = vld [vmem:[#allocation154_spill] sm:$0xff]  ;;  %v10891_v8 = vld [vmem:[#allocation155_spill] sm:$0xff] }
 0xac8   : > { %7148 = vmatprep.subr.bf16.mxu0 %v10865_v52  ;;  %7276 = vmatprep.subr.bf16.mxu1 %v10866_v4  ;;  %v10892_v52 = vld [vmem:[#allocation156_spill] sm:$0xff]  ;;  %v10893_v4 = vld [vmem:[#allocation157_spill] sm:$0xff] }
 0xacb   : > { %7150 = vmatpush1.bf16.msra.mxu0 %v10867_v16  ;;  %7278 = vmatpush1.bf16.msra.mxu1 %v10868_v34  ;;  %v10894_v16 = vld [vmem:[#allocation158_spill] sm:$0xff]  ;;  %v10895_v34 = vld [vmem:[#allocation159_spill] sm:$0xff] }
 0xacc   : > { %7152 = vmatprep.subr.bf16.mxu0 %v10869_v43  ;;  %7280 = vmatprep.subr.bf16.mxu1 %v10870_v46  ;;  %v10896_v43 = vld [vmem:[#allocation160_spill] sm:$0xff]  ;;  %v10897_v46 = vld [vmem:[#allocation161_spill] sm:$0xff] }
 0xacf   : > { %7154 = vmatpush1.bf16.msra.mxu0 %v10871_v57  ;;  %7282 = vmatpush1.bf16.msra.mxu1 %v10872_v27  ;;  %v10898_v57 = vld [vmem:[#allocation162_spill] sm:$0xff]  ;;  %v10899_v27 = vld [vmem:[#allocation163_spill] sm:$0xff] }
 0xad0   : > { %7156 = vmatprep.subr.bf16.mxu0 %v10873_v55  ;;  %7284 = vmatprep.subr.bf16.mxu1 %v10874_v28  ;;  %v10900_v55 = vld [vmem:[#allocation164_spill] sm:$0xff]  ;;  %v10901_v28 = vld [vmem:[#allocation165_spill] sm:$0xff] }
 0xad3   : > { %7158 = vmatpush1.bf16.msra.mxu0 %v10875_v58  ;;  %7286 = vmatpush1.bf16.msra.mxu1 %v10876_v39  ;;  %v10902_v58 = vld [vmem:[#allocation166_spill] sm:$0xff]  ;;  %v10903_v39 = vld [vmem:[#allocation167_spill] sm:$0xff] }
 0xad4   : > { %7160 = vmatprep.subr.bf16.mxu0 %v10877_v5  ;;  %7288 = vmatprep.subr.bf16.mxu1 %v10878_v9  ;;  %v10904_v5 = vld [vmem:[#allocation168_spill] sm:$0xff]  ;;  %v10905_v9 = vld [vmem:[#allocation169_spill] sm:$0xff] }
 0xad7   : > { %7162 = vmatpush1.bf16.msra.mxu0 %v10879_v35  ;;  %7290 = vmatpush1.bf16.msra.mxu1 %v10880_v61  ;;  %v10906_v35 = vld [vmem:[#allocation170_spill] sm:$0xff]  ;;  %v10907_v61 = vld [vmem:[#allocation171_spill] sm:$0xff] }
 0xad8   : > { %7164 = vmatprep.subr.bf16.mxu0 %v10881_v41  ;;  %7292 = vmatprep.subr.bf16.mxu1 %v10882_v30  ;;  %v10908_v41 = vld [vmem:[#allocation172_spill] sm:$0xff]  ;;  %v10909_v30 = vld [vmem:[#allocation173_spill] sm:$0xff] }
 0xb2d   : > { %v3217_v42 = vpop.f32.mrb[22].mxu0  ;;  %v3288_v50 = vpop.f32.mrb[22].mxu1 }
 0xb2e   : > { %v3219_v32 = vpop.f32.mrb[23].mxu0  ;;  %v3290_v53 = vpop.f32.mrb[23].mxu1 }
 0xb4d   : > { %v3359_v56 = vpop.f32.mrb[24].mxu0  ;;  %v3430_v38 = vpop.f32.mrb[24].mxu1 }
 0xb4e   : > { %v3577_v33 = vmul.f32 %v3359_v56, %v3217_v42  ;;  %v9883_v11 = vmul.f32 %v3430_v38, %v3288_v50  ;;  %v3361_v13 = vpop.f32.mrb[25].mxu0  ;;  %v3432_v48 = vpop.f32.mrb[25].mxu1  ;;  %v10910_v42 = vld [vmem:[#allocation174_spill] sm:$0xff]  ;;  %v10911_v38 = vld [vmem:[#allocation175_spill] sm:$0xff] }
 0xb4f   : > { %v3578_v7 = vmul.f32 %v3361_v13, %v3219_v32  ;;  %v3580_v17 = vmul.f32 %v3432_v48, %v3290_v53  ;;  %v10913_v13 = vld [vmem:[#allocation177_spill] sm:$0xff]  ;;  %v10914_v48 = vld [vmem:[#allocation178_spill] sm:$0xff] }
 0xb51   : > { %3645 = vmatprep.mubr.f32.mxu0 %v3578_v7  ;;  %3787 = vmatprep.mubr.f32.mxu1 %v3578_v7  ;;  %v10915_v7 = vld [vmem:[#allocation179_spill] sm:$0xff] }
 0xb52   : > { %3646 = vmatmul.mubr.f32.vlgmr.msra.gmra.mrb[28].mxu0 %v3577_v33  ;;  %3788 = vmatmul.mubr.f32.vlgmr.msra.gmra.mrb[28].mxu1 %v3577_v33  ;;  %v10912_v33 = vld [vmem:[#allocation176_spill] sm:$0xff] }
 0xb53   : > { %7166 = vmatpush1.bf16.msra.mxu0 %v10883_v15  ;;  %7294 = vmatpush1.bf16.msra.mxu1 %v10884_v20  ;;  %v10917_v15 = vld [vmem:[#allocation181_spill] sm:$0xff]  ;;  %v10918_v20 = vld [vmem:[#allocation182_spill] sm:$0xff] }
 0xb54   : > { %3716 = vmatprep.mubr.f32.mxu0 %v3580_v17  ;;  %3858 = vmatprep.mubr.f32.mxu1 %v3580_v17  ;;  %v10916_v17 = vld [vmem:[#allocation180_spill] sm:$0xff] }
 0xb55   : > { %7168 = vmatprep.subr.bf16.mxu0 %v10885_v51  ;;  %7296 = vmatprep.subr.bf16.mxu1 %v10886_v31  ;;  %v10919_v51 = vld [vmem:[#allocation183_spill] sm:$0xff]  ;;  %v10920_v31 = vld [vmem:[#allocation184_spill] sm:$0xff] }
 0xb57   : > { %7170 = vmatpush1.bf16.msra.mxu0 %v10887_v29  ;;  %7298 = vmatpush1.bf16.msra.mxu1 %v10888_v6  ;;  %v10921_v29 = vld [vmem:[#allocation185_spill] sm:$0xff]  ;;  %v10922_v6 = vld [vmem:[#allocation186_spill] sm:$0xff] }
 0xb58   : > { %7172 = vmatprep.subr.bf16.mxu0 %v10889_v40  ;;  %7300 = vmatprep.subr.bf16.mxu1 %v10890_v25  ;;  %v10923_v40 = vld [vmem:[#allocation187_spill] sm:$0xff]  ;;  %v10924_v25 = vld [vmem:[#allocation188_spill] sm:$0xff] }
 0xb5b   : > { %7174 = vmatpush1.bf16.msra.mxu0 %v10891_v8  ;;  %7302 = vmatpush1.bf16.msra.mxu1 %v10892_v52  ;;  %v10925_v8 = vld [vmem:[#allocation189_spill] sm:$0xff]  ;;  %v10926_v52 = vld [vmem:[#allocation190_spill] sm:$0xff] }
 0xb5c   : > { %7176 = vmatprep.subr.bf16.mxu0 %v10893_v4  ;;  %7304 = vmatprep.subr.bf16.mxu1 %v10894_v16  ;;  %v10927_v4 = vld [vmem:[#allocation191_spill] sm:$0xff]  ;;  %v10928_v16 = vld [vmem:[#allocation192_spill] sm:$0xff] }
 0xb5f   : > { %7178 = vmatpush1.bf16.msra.mxu0 %v10895_v34  ;;  %7306 = vmatpush1.bf16.msra.mxu1 %v10896_v43  ;;  %v10929_v34 = vld [vmem:[#allocation193_spill] sm:$0xff]  ;;  %v10930_v43 = vld [vmem:[#allocation194_spill] sm:$0xff] }
 0xb60   : > { %7180 = vmatprep.subr.bf16.mxu0 %v10897_v46  ;;  %7308 = vmatprep.subr.bf16.mxu1 %v10898_v57  ;;  %v10931_v46 = vld [vmem:[#allocation195_spill] sm:$0xff]  ;;  %v10932_v57 = vld [vmem:[#allocation196_spill] sm:$0xff] }
 0xb63   : > { %7182 = vmatpush1.bf16.msra.mxu0 %v10899_v27  ;;  %7310 = vmatpush1.bf16.msra.mxu1 %v10900_v55  ;;  %v10933_v27 = vld [vmem:[#allocation197_spill] sm:$0xff]  ;;  %v10934_v55 = vld [vmem:[#allocation198_spill] sm:$0xff] }
 0xb64   : > { %7184 = vmatprep.subr.bf16.mxu0 %v10901_v28  ;;  %7312 = vmatprep.subr.bf16.mxu1 %v10902_v58  ;;  %v10935_v28 = vld [vmem:[#allocation199_spill] sm:$0xff]  ;;  %v10936_v58 = vld [vmem:[#allocation200_spill] sm:$0xff] }
 0xb67   : > { %7186 = vmatpush1.bf16.msra.mxu0 %v10903_v39  ;;  %7314 = vmatpush1.bf16.msra.mxu1 %v10904_v5  ;;  %v10937_v39 = vld [vmem:[#allocation201_spill] sm:$0xff]  ;;  %v10938_v5 = vld [vmem:[#allocation202_spill] sm:$0xff] }
 0xb68   : > { %7188 = vmatprep.subr.bf16.mxu0 %v10905_v9  ;;  %7316 = vmatprep.subr.bf16.mxu1 %v10906_v35  ;;  %v10939_v9 = vld [vmem:[#allocation203_spill] sm:$0xff]  ;;  %v10940_v35 = vld [vmem:[#allocation204_spill] sm:$0xff] }
 0xb6b   : > { %7190 = vmatpush1.bf16.msra.mxu0 %v10907_v61  ;;  %7318 = vmatpush1.bf16.msra.mxu1 %v10908_v41  ;;  %v10941_v61 = vld [vmem:[#allocation205_spill] sm:$0xff]  ;;  %v10942_v41 = vld [vmem:[#allocation206_spill] sm:$0xff] }
 0xb6c   : > { %7192 = vmatprep.subr.bf16.mxu0 %v10909_v30  ;;  %7320 = vmatprep.subr.bf16.mxu1 %v10910_v42  ;;  %v10943_v30 = vld [vmem:[#allocation207_spill] sm:$0xff]  ;;  %v10944_v42 = vld [vmem:[#allocation208_spill] sm:$0xff] }
 0xb6d   : > { %v9913_v50 = vpop.f32.mrb[26].mxu0  ;;  %v9915_v32 = vpop.f32.mrb[26].mxu1 }
 0xb6e   : > { %v9917_v53 = vpop.f32.mrb[27].mxu0  ;;  %v9919_v56 = vpop.f32.mrb[27].mxu1 }
 0xb6f   : > { %7194 = vmatpush1.bf16.msra.mxu0 %v10911_v38  ;;  %7322 = vmatpush1.bf16.msra.mxu1 %v10912_v33  ;;  %v10945_v38 = vld [vmem:[#allocation209_spill] sm:$0xff]  ;;  %v10946_v33 = vld [vmem:[#allocation210_spill] sm:$0xff] }
 0xb70   : > { %7196 = vmatprep.subr.bf16.mxu0 %v10913_v13  ;;  %7324 = vmatprep.subr.bf16.mxu1 %v10914_v48  ;;  %v10948_v13 = vld [vmem:[#allocation212_spill] sm:$0xff]  ;;  %v10949_v48 = vld [vmem:[#allocation213_spill] sm:$0xff] }
 0xb73   : > { %7198 = vmatpush1.bf16.msra.mxu0 %v10915_v7  ;;  %7326 = vmatpush1.bf16.msra.mxu1 %v10916_v17  ;;  %v10950_v7 = vld [vmem:[#allocation214_spill] sm:$0xff]  ;;  %v10951_v17 = vld [vmem:[#allocation215_spill] sm:$0xff] }
 0xb74   : > { %7200 = vmatprep.subr.bf16.mxu0 %v10917_v15  ;;  %7328 = vmatprep.subr.bf16.mxu1 %v10918_v20  ;;  %v10952_v15 = vld [vmem:[#allocation216_spill] sm:$0xff] }
 0xb77   : > { %7202 = vmatpush1.bf16.msra.mxu0 %v10919_v51  ;;  %7330 = vmatpush1.bf16.msra.mxu1 %v10920_v31 }
 0xb78   : > { %7204 = vmatprep.subr.bf16.mxu0 %v10921_v29  ;;  %7332 = vmatprep.subr.bf16.mxu1 %v10922_v6 }
 0xb7b   : > { %7206 = vmatpush1.bf16.msra.mxu0 %v10923_v40  ;;  %7334 = vmatpush1.bf16.msra.mxu1 %v10924_v25 }
 0xb7c   : > { %7208 = vmatprep.subr.bf16.mxu0 %v10925_v8  ;;  %7336 = vmatprep.subr.bf16.mxu1 %v10926_v52 }
 0xb7f   : > { %7210 = vmatpush1.bf16.msra.mxu0 %v10927_v4  ;;  %7338 = vmatpush1.bf16.msra.mxu1 %v10928_v16 }
 0xb80   : > { %7212 = vmatprep.subr.bf16.mxu0 %v10929_v34  ;;  %7340 = vmatprep.subr.bf16.mxu1 %v10930_v43 }
 0xb83   : > { %7214 = vmatpush1.bf16.msra.mxu0 %v10931_v46  ;;  %7342 = vmatpush1.bf16.msra.mxu1 %v10932_v57 }
 0xb84   : > { %7216 = vmatprep.subr.bf16.mxu0 %v10933_v27  ;;  %7344 = vmatprep.subr.bf16.mxu1 %v10934_v55 }
 0xb87   : > { %7218 = vmatpush1.bf16.msra.mxu0 %v10935_v28  ;;  %7346 = vmatpush1.bf16.msra.mxu1 %v10936_v58 }
 0xb88   : > { %7220 = vmatprep.subr.bf16.mxu0 %v10937_v39  ;;  %7348 = vmatprep.subr.bf16.mxu1 %v10938_v5 }
 0xb8b   : > { %7222 = vmatpush1.bf16.msra.mxu0 %v10939_v9  ;;  %7350 = vmatpush1.bf16.msra.mxu1 %v10940_v35 }
 0xb8c   : > { %7224 = vmatprep.subr.bf16.mxu0 %v10941_v61  ;;  %7352 = vmatprep.subr.bf16.mxu1 %v10942_v41 }
 0xb8f   : > { %7226 = vmatpush1.bf16.msra.mxu0 %v10943_v30  ;;  %7354 = vmatpush1.bf16.msra.mxu1 %v10944_v42 }
 0xb90   : > { %7356 = vmatprep.subr.bf16.mxu0 %v10945_v38  ;;  %7388 = vmatprep.subr.bf16.mxu1 %v10946_v33 }
 0xb92   : > { %3717 = vmatmul.mubr.f32.vlgmr.msra.gmra.mrb[28].mxu0 %v9883_v11  ;;  %3859 = vmatmul.mubr.f32.vlgmr.msra.gmra.mrb[28].mxu1 %v9883_v11  ;;  %v10947_v11 = vld [vmem:[#allocation211_spill] sm:$0xff] }
 0xb93   : > { %7358 = vmatpush3.bf16.msra.mxu0 %v9400_v0  ;;  %7390 = vmatpush3.bf16.msra.mxu1 %v9403_v21 }
 0xb94   : > { %7360 = vmatprep.subr.bf16.mxu0 %v9407_v14  ;;  %7392 = vmatprep.subr.bf16.mxu1 %v9409_v45 }
 0xb97   : > { %7362 = vmatpush3.bf16.msra.mxu0 %v9412_v59  ;;  %7394 = vmatpush3.bf16.msra.mxu1 %v9416_v63 }
 0xb98   : > { %7364 = vmatprep.subr.bf16.mxu0 %v9418_v54  ;;  %7396 = vmatprep.subr.bf16.mxu1 %v9420_v12 }
 0xb9b   : > { %7366 = vmatpush3.bf16.msra.mxu0 %v9423_v22  ;;  %7398 = vmatpush3.bf16.msra.mxu1 %v9427_v1 }
 0xb9c   : > { %7368 = vmatprep.subr.bf16.mxu0 %v9429_v49  ;;  %7400 = vmatprep.subr.bf16.mxu1 %v9432_v26 }
 0xb9f   : > { %7370 = vmatpush3.bf16.msra.mxu0 %v9435_v62  ;;  %7402 = vmatpush3.bf16.msra.mxu1 %v9439_v47 }
 0xba0   : > { %7372 = vmatprep.subr.bf16.mxu0 %v9441_v36  ;;  %7404 = vmatprep.subr.bf16.mxu1 %v9444_v60 }
 0xba3   : > { %7374 = vmatpush3.bf16.msra.mxu0 %v9466_v24  ;;  %7406 = vmatpush3.bf16.msra.mxu1 %v9468_v18 }
 0xba4   : > { %7376 = vmatprep.subr.bf16.mxu0 %v9472_v37  ;;  %7408 = vmatprep.subr.bf16.mxu1 %v9474_v10 }
 0xba7   : > { %7378 = vmatpush3.bf16.msra.mxu0 %v9476_v44  ;;  %7410 = vmatpush3.bf16.msra.mxu1 %v9479_v19 }
 0xba8   : > { %7380 = vmatprep.subr.bf16.mxu0 %v9484_v23  ;;  %7412 = vmatprep.subr.bf16.mxu1 %v9486_v3 }
 0xbab   : > { %7382 = vmatpush3.bf16.msra.mxu0 %v10947_v11  ;;  %7414 = vmatpush3.bf16.msra.mxu1 %v10948_v13 }
 0xbac   : > { %7384 = vmatprep.subr.bf16.mxu0 %v10949_v48  ;;  %7416 = vmatprep.subr.bf16.mxu1 %v10950_v7 }
 0xbaf   : > { %7386 = vmatpush3.bf16.msra.mxu0 %v10951_v17  ;;  %7418 = vmatpush3.bf16.msra.mxu1 %v10952_v15 }
 0xbb0   : > { %7420 = vmatprep.subr.bf16.mxu0 %v10945_v38  ;;  %7452 = vmatprep.subr.bf16.mxu1 %v10946_v33  ;;  %v4186_v33 = vld [vmem:[#allocation14 + $0xe8] sm:$0xff] }
 0xc65   : > { %v3718_v20 = vpop.f32.mrb[28].mxu0  ;;  %v3860_v51 = vpop.f32.mrb[28].mxu1 }
 0xc66   : > { %v3865_v31 = vsel %vm2121_vm1, %v3718_v20, -inf  ;;  %v3867_v29 = vsel %vm2121_vm1, %v3860_v51, -inf  ;;  %v3720_v6 = vpop.f32.mrb[29].mxu0  ;;  %v3862_v40 = vpop.f32.mrb[29].mxu1 }
 0xc67   : > { %v3866_v25 = vsel %vm2121_vm1, %v3720_v6, -inf  ;;  %v3868_v8 = vsel %vm2121_vm1, %v3862_v40, -inf }
 0xc68   : > { %v3869_v52 = vmax.f32 %v3865_v31, %v3866_v25  ;;  %v3870_v4 = vmax.f32 %v3867_v29, %v3868_v8 }
 0xc6a   : > { %v3871_v16 = vmax.f32 %v3869_v52, %v3870_v4 }
 0xc6c   : > { %3872 = vmax.xlane.f32.xlu0 %v3871_v16 }
 0xcf9   : > { %v3873_v34 = vpop.xlane.xlu0 %3872 }
 0xcfa   : > { %v3874_v43 = vsub.f32 %v3718_v20, %v3873_v34  ;;  %v3875_v46 = vsub.f32 %v3720_v6, %v3873_v34  ;;  %v3876_v57 = vsub.f32 %v3860_v51, %v3873_v34  ;;  %v3877_v27 = vsub.f32 %v3862_v40, %v3873_v34 }
 0xcfc   : > { %v3878_v55 = vmul.f32 1.442695, %v3874_v43  ;;  %v3880_v28 = vmul.f32 1.442695, %v3875_v46  ;;  %v3882_v58 = vmul.f32 1.442695, %v3876_v57 }
 0xcfd   : > { %v3884_v39 = vmul.f32 1.442695, %v3877_v27  ;;  %v5000_v57 = vld [vmem:[%s10754_s24 + $0x1] ss:$0 sm:$0xff]  ;;  %v4434_v27 = vld [vmem:[#allocation16 + $0x80] sm:$0xff] }
 0xcfe   : > { %7835 = vpow2.f32 %v3878_v55  ;;  %v4435_v55 = vld [vmem:[#allocation16 + $0x88] sm:$0xff] }
 0xcff   : > { %7837 = vpow2.f32 %v3880_v28 }
 0xd00   : > { %7839 = vpow2.f32 %v3882_v58 }
 0xd01   : > { %7841 = vpow2.f32 %v3884_v39 }
 0xd08   : > { %v7836_v5 = vpop.eup %7835 }
 0xd09   : > { %v7838_v9 = vpop.eup %7837  ;;  %v4026_v35 = vmul.f32 %v7836_v5, %v9913_v50  ;;  %v4183_v50 = vld [vmem:[#allocation14 + $0xd0] sm:$0xff] }
 0xd0a   : > { %v7840_v61 = vpop.eup %7839  ;;  %3950 = vmatprep.mubr.f32.mxu0 %v7838_v9  ;;  %v4027_v41 = vmul.f32 %v7838_v9, %v9917_v53  ;;  %v10962_v9 = vld [vmem:[#allocation225_spill] sm:$0xff] }
 0xd0b   : > { %v7842_v30 = vpop.eup %7841  ;;  %3951 = vmatmul.mubr.f32.vlgmr.msra.gmra.mrb[30].mxu0 %v7836_v5  ;;  %v4028_v42 = vmul.f32 %v7840_v61, %v9915_v32  ;;  %v4184_v32 = vld [vmem:[#allocation14 + $0xd8] sm:$0xff]  ;;  %v7556_v5 = vpack.c.bf16 %v4435_v55, %v4434_v27  ;;  %v4706_v27 = vld [vmem:[#allocation17 + $0x40] sm:$0xff] }
 0xd0c   : > { %4020 = vmatprep.mubr.f32.mxu1 %v7842_v30  ;;  %7422 = vmatpush3.bf16.msra.mxu0 %v9400_v0  ;;  %v4029_v38 = vmul.f32 %v7842_v30, %v9919_v56  ;;  %v10960_v0 = vld [vmem:[#allocation223_spill] sm:$0xff]  ;;  %v7499_v53 = vpack.c.bf16 %v4184_v32, %v4183_v50 }
 0xd0d   : > { %4021 = vmatmul.mubr.f32.vlgmr.msra.gmra.mrb[30].mxu1 %v7840_v61  ;;  %4094 = vmatprep.mubr.f32.mxu0 %v4027_v41  ;;  %v4185_v56 = vld [vmem:[#allocation14 + $0xe0] sm:$0xff]  ;;  %v4436_v61 = vld [vmem:[#allocation16 + $0x90] sm:$0xff]  ;;  %v4437_v41 = vld [vmem:[#allocation16 + $0x98] sm:$0xff] }
 0xd0e   : > { %7454 = vmatpush3.bf16.msra.mxu1 %v9403_v21  ;;  %4164 = vmatprep.mubr.f32.mxu1 %v4029_v38  ;;  %v10959_v21 = vld [vmem:[#allocation222_spill] sm:$0xff]  ;;  %v4438_v38 = vld [vmem:[#allocation16 + $0xa0] sm:$0xff] }
 0xd0f   : > { %7424 = vmatprep.subr.bf16.mxu0 %v9407_v14  ;;  %7456 = vmatprep.subr.bf16.mxu1 %v9409_v45  ;;  %v10961_v14 = vld [vmem:[#allocation224_spill] sm:$0xff]  ;;  %v4449_v50 = vld [vmem:[#allocation16 + $0xf8] sm:$0xff] }
 0xd10   : > { %7426 = vmatpush3.bf16.msra.mxu0 %v9412_v59  ;;  %v4173_v45 = vld [vmem:[#allocation14 + $0x80] sm:$0xff]  ;;  %v4174_v59 = vld [vmem:[#allocation14 + $0x88] sm:$0xff] }
 0xd11   : > { %7428 = vmatprep.subr.bf16.mxu0 %v9418_v54  ;;  %v4175_v54 = vld [vmem:[#allocation14 + $0x90] sm:$0xff] }
 0xd12   : > { %7458 = vmatpush3.bf16.msra.mxu1 %v9416_v63  ;;  %v10958_v63 = vld [vmem:[#allocation221_spill] sm:$0xff] }
 0xd13   : > { %7460 = vmatprep.subr.bf16.mxu1 %v9420_v12  ;;  %v10957_v12 = vld [vmem:[#allocation220_spill] sm:$0xff] }
 0xd14   : > { %7430 = vmatpush3.bf16.msra.mxu0 %v9423_v22  ;;  %v7484_v22 = vpack.c.bf16 %v4174_v59, %v4173_v45  ;;  %v4439_v45 = vld [vmem:[#allocation16 + $0xa8] sm:$0xff] }
 0xd15   : > { %7432 = vmatprep.subr.bf16.mxu0 %v9429_v49  ;;  %v7562_v59 = vpack.c.bf16 %v4439_v45, %v4438_v38 }
 0xd16   : > { %7462 = vmatpush3.bf16.msra.mxu1 %v9427_v1  ;;  %v4176_v1 = vld [vmem:[#allocation14 + $0x98] sm:$0xff] }
 0xd17   : > { %7464 = vmatprep.subr.bf16.mxu1 %v9432_v26  ;;  %v7487_v49 = vpack.c.bf16 %v4176_v1, %v4175_v54  ;;  %v4177_v26 = vld [vmem:[#allocation14 + $0xa0] sm:$0xff]  ;;  %v4440_v54 = vld [vmem:[#allocation16 + $0xb0] sm:$0xff] }
 0xd18   : > { %7434 = vmatpush3.bf16.msra.mxu0 %v9435_v62  ;;  %v10956_v62 = vld [vmem:[#allocation219_spill] sm:$0xff] }
 0xd19   : > { %7436 = vmatprep.subr.bf16.mxu0 %v9441_v36 }
 0xd1a   : > { %7466 = vmatpush3.bf16.msra.mxu1 %v9439_v47  ;;  %v4178_v47 = vld [vmem:[#allocation14 + $0xa8] sm:$0xff] }
 0xd1b   : > { %7468 = vmatprep.subr.bf16.mxu1 %v9444_v60  ;;  %v7490_v36 = vpack.c.bf16 %v4178_v47, %v4177_v26  ;;  %v4179_v60 = vld [vmem:[#allocation14 + $0xb0] sm:$0xff]  ;;  %v4443_v26 = vld [vmem:[#allocation16 + $0xc8] sm:$0xff] }
 0xd1c   : > { %7438 = vmatpush3.bf16.msra.mxu0 %v9466_v24  ;;  %v10955_v24 = vld [vmem:[#allocation218_spill] sm:$0xff] }
 0xd1d   : > { %7440 = vmatprep.subr.bf16.mxu0 %v9472_v37  ;;  %v10953_v37 = vmov 0.0|0.0  }
 0xd1e   : > { %7470 = vmatpush3.bf16.msra.mxu1 %v9468_v18  ;;  %v10954_v18 = vld [vmem:[#allocation217_spill] sm:$0xff] }
 0xd1f   : > { %7472 = vmatprep.subr.bf16.mxu1 %v9474_v10  ;;  %v4180_v10 = vld [vmem:[#allocation14 + $0xb8] sm:$0xff] }
 0xd20   : > { %7442 = vmatpush3.bf16.msra.mxu0 %v9476_v44  ;;  %v7493_v44 = vpack.c.bf16 %v4180_v10, %v4179_v60  ;;  %v4445_v60 = vld [vmem:[#allocation16 + $0xd8] sm:$0xff] }
 0xd21   : > { %7444 = vmatprep.subr.bf16.mxu0 %v9484_v23  ;;  %v4182_v23 = vld [vmem:[#allocation14 + $0xc8] sm:$0xff] }
 0xd22   : > { %7474 = vmatpush3.bf16.msra.mxu1 %v9479_v19  ;;  %v4181_v19 = vld [vmem:[#allocation14 + $0xc0] sm:$0xff] }
 0xd23   : > { %7476 = vmatprep.subr.bf16.mxu1 %v9486_v3  ;;  %v7496_v3 = vpack.c.bf16 %v4182_v23, %v4181_v19  ;;  %v4447_v19 = vld [vmem:[#allocation16 + $0xe8] sm:$0xff] }
 0xd24   : > { %7446 = vmatpush3.bf16.msra.mxu0 %v10947_v11  ;;  %v7502_v11 = vpack.c.bf16 %v4186_v33, %v4185_v56 }
 0xd25   : > { %7448 = vmatprep.subr.bf16.mxu0 %v10949_v48  ;;  %v4188_v48 = vld [vmem:[#allocation14 + $0xf8] sm:$0xff] }
 0xd26   : > { %7478 = vmatpush3.bf16.msra.mxu1 %v10948_v13  ;;  %v4187_v13 = vld [vmem:[#allocation14 + $0xf0] sm:$0xff] }
 0xd27   : > { %7480 = vmatprep.subr.bf16.mxu1 %v10950_v7  ;;  %v7505_v7 = vpack.c.bf16 %v4188_v48, %v4187_v13 }
 0xd28   : > { %7450 = vmatpush3.bf16.msra.mxu0 %v10951_v17 }
 0xd29   : > { %7483 = vmatprep.subr.bf16.mxu0 %v10953_v37 }
 0xd2a   : > { %7482 = vmatpush3.bf16.msra.mxu1 %v10952_v15 }
 0xd2b   : > { %4095 = vmatmul.mubr.f32.vlgmr.msra.gmra.mrb[32].mxu0 %v4026_v35  ;;  %7507 = vmatprep.subr.bf16.mxu1 %v10953_v37 }
 0xd2c   : > { %5862 = vmatprep.mubr.msk.f32.mxu0 %vm8254_vm0, %v10608_v2  ;;  %7485 = vmatpush3.bf16.msra.mxu0 %v7484_v22  ;;  %v4441_v22 = vld [vmem:[#allocation16 + $0xb8] sm:$0xff] }
 0xd2d   : > { %4165 = vmatmul.mubr.f32.vlgmr.msra.gmra.mrb[32].mxu1 %v4028_v42  ;;  %7486 = vmatprep.subr.bf16.mxu0 %v10953_v37  ;;  %v7559_v42 = vpack.c.bf16 %v4437_v41, %v4436_v61  ;;  %v7565_v1 = vpack.c.bf16 %v4441_v22, %v4440_v54  ;;  %v4712_v61 = vld [vmem:[#allocation17 + $0x70] sm:$0xff]  ;;  %v4713_v41 = vld [vmem:[#allocation17 + $0x78] sm:$0xff] }
 0xd2e   : > { %7509 = vmatpush3.bf16.msra.mxu1 %v10954_v18  ;;  %5897 = vmatprep.mubr.msk.f32.mxu1 %vm8254_vm0, %v10608_v2 }
 0xd2f   : > { %7510 = vmatprep.subr.bf16.mxu1 %v10953_v37 }
 0xd30   : > { %7488 = vmatpush3.bf16.msra.mxu0 %v7487_v49  ;;  %v4442_v49 = vld [vmem:[#allocation16 + $0xc0] sm:$0xff] }
 0xd31   : > { %7489 = vmatprep.subr.bf16.mxu0 %v10953_v37  ;;  %v7568_v47 = vpack.c.bf16 %v4443_v26, %v4442_v49 }
 0xd32   : > { %7512 = vmatpush3.bf16.msra.mxu1 %v10955_v24 }
 0xd33   : > { %7513 = vmatprep.subr.bf16.mxu1 %v10953_v37 }
 0xd34   : > { %7491 = vmatpush3.bf16.msra.mxu0 %v7490_v36  ;;  %v4444_v36 = vld [vmem:[#allocation16 + $0xd0] sm:$0xff] }
 0xd35   : > { %7492 = vmatprep.subr.bf16.mxu0 %v10953_v37  ;;  %v7571_v10 = vpack.c.bf16 %v4445_v60, %v4444_v36 }
 0xd36   : > { %7515 = vmatpush3.bf16.msra.mxu1 %v10956_v62 }
 0xd37   : > { %7516 = vmatprep.subr.bf16.mxu1 %v10953_v37 }
 0xd38   : > { %7494 = vmatpush3.bf16.msra.mxu0 %v7493_v44  ;;  %v4446_v44 = vld [vmem:[#allocation16 + $0xe0] sm:$0xff] }
 0xd39   : > { %7495 = vmatprep.subr.bf16.mxu0 %v10953_v37  ;;  %v7574_v23 = vpack.c.bf16 %v4447_v19, %v4446_v44  ;;  %v5011_v44 = vld [vmem:[%s10964_s17] ss:$0 sm:$0xff] }
 0xd3a   : > { %7518 = vmatpush3.bf16.msra.mxu1 %v10957_v12 }
 0xd3b   : > { %7519 = vmatprep.subr.bf16.mxu1 %v10953_v37 }
 0xd3c   : > { %7497 = vmatpush3.bf16.msra.mxu0 %v7496_v3  ;;  %v4448_v3 = vld [vmem:[#allocation16 + $0xf0] sm:$0xff] }
 0xd3d   : > { %7498 = vmatprep.subr.bf16.mxu0 %v10953_v37  ;;  %v7577_v32 = vpack.c.bf16 %v4449_v50, %v4448_v3 }
 0xd3e   : > { %7521 = vmatpush3.bf16.msra.mxu1 %v10958_v63 }
 0xd3f   : > { %7522 = vmatprep.subr.bf16.mxu1 %v10953_v37 }
 0xd40   : > { %7500 = vmatpush3.bf16.msra.mxu0 %v7499_v53 }
 0xd41   : > { %7501 = vmatprep.subr.bf16.mxu0 %v10953_v37 }
 0xd42   : > { %7524 = vmatpush3.bf16.msra.mxu1 %v10959_v21 }
 0xd43   : > { %7525 = vmatprep.subr.bf16.mxu1 %v10953_v37 }
 0xd44   : > { %7503 = vmatpush3.bf16.msra.mxu0 %v7502_v11 }
 0xd45   : > { %7504 = vmatprep.subr.bf16.mxu0 %v10953_v37 }
 0xd46   : > { %7527 = vmatpush3.bf16.msra.mxu1 %v10960_v0 }
 0xd47   : > { %7528 = vmatprep.subr.bf16.mxu1 %v10953_v37 }
 0xd48   : > { %7506 = vmatpush3.bf16.msra.mxu0 %v7505_v7 }
 0xd49   : > { %7531 = vmatprep.subr.bf16.mxu0 %v10953_v37 }
 0xd4a   : > { %7530 = vmatpush3.bf16.msra.mxu1 %v10961_v14 }
 0xd4b   : > { %7555 = vmatprep.subr.bf16.mxu1 %v10953_v37 }
 0xdde   : > { %v5323_v17 = vpop.f32.mrb[30].mxu0 }
 0xddf   : > { %v5324_v15 = vpop.f32.mrb[31].mxu0 }
 0xde0   : > { %v5358_v20 = vpop.f32.mrb[30].mxu1  ;;  %v5325_v51 = vadd.f32 %v5324_v15, %v5323_v17 }
 0xde1   : > { %v5359_v31 = vpop.f32.mrb[31].mxu1 }
 0xde2   : > { %v5360_v29 = vadd.f32 %v5359_v31, %v5358_v20  ;;  %v5003_v20 = vld [vmem:[%s10755_s9 + $0x1] ss:$0 sm:$0xff]  ;;  %s10164_s9 = scalar_lea.hbm %s10965_s7, %s5012_s2 }
 0xde3   : > { %v5004_v31 = vld [vmem:[%s10756_s13 + $0x1] ss:$0 sm:$0xff] }
 0xde4   : > { %v4023_v6 = vadd.f32 %v5360_v29, %v5325_v51 }
 0xde6   : > { %7843 = vrcp.f32 %v4023_v6 }
 0xdf0   : > { %v7844_v43 = vpop.eup %7843 }
 0xdfe   : > { %v5393_v40 = vpop.f32.mrb[32].mxu0 }
 0xdff   : > { %v5394_v25 = vpop.f32.mrb[33].mxu0 }
 0xe00   : > { %v5428_v8 = vpop.f32.mrb[32].mxu1  ;;  %v5395_v52 = vadd.f32 %v5394_v25, %v5393_v40 }
 0xe01   : > { %v5429_v4 = vpop.f32.mrb[33].mxu1 }
 0xe02   : > { %v5430_v16 = vadd.f32 %v5429_v4, %v5428_v8 }
 0xe04   : > { %v4167_v34 = vadd.f32 %v5430_v16, %v5395_v52  ;;  %v4701_v52 = vld [vmem:[#allocation17 + $0x18] sm:$0xff]  ;;  %v4703_v16 = vld [vmem:[#allocation17 + $0x28] sm:$0xff] }
 0xe06   : > { %v4171_v46 = vmul.f32 %v7844_v43, %v4167_v34  ;;  %v4704_v43 = vld [vmem:[#allocation17 + $0x30] sm:$0xff] }
 0xe08   : > { %5863 = vmatmul.mubr.f32.vlgmr.msra.gmra.mrb[34].mxu0 %v4171_v46  ;;  %v4705_v46 = vld [vmem:[#allocation17 + $0x38] sm:$0xff] }
 0xe09   : > { %7533 = vmatpush3.bf16.msra.mxu0 %v10954_v18  ;;  %5932 = vmatprep.mubr.msk.f32.mxu0 %vm8254_vm0, %v10608_v2 }
 0xe0a   : > { %7534 = vmatprep.subr.bf16.mxu0 %v10953_v37 }
 0xe0d   : > { %7536 = vmatpush3.bf16.msra.mxu0 %v10955_v24 }
 0xe0e   : > { %7537 = vmatprep.subr.bf16.mxu0 %v10953_v37 }
 0xe11   : > { %7539 = vmatpush3.bf16.msra.mxu0 %v10956_v62 }
 0xe12   : > { %7540 = vmatprep.subr.bf16.mxu0 %v10953_v37 }
 0xe15   : > { %7542 = vmatpush3.bf16.msra.mxu0 %v10957_v12 }
 0xe16   : > { %7543 = vmatprep.subr.bf16.mxu0 %v10953_v37 }
 0xe19   : > { %7545 = vmatpush3.bf16.msra.mxu0 %v10958_v63 }
 0xe1a   : > { %7546 = vmatprep.subr.bf16.mxu0 %v10953_v37 }
 0xe1d   : > { %7548 = vmatpush3.bf16.msra.mxu0 %v10959_v21 }
 0xe1e   : > { %7549 = vmatprep.subr.bf16.mxu0 %v10953_v37 }
 0xe21   : > { %7551 = vmatpush3.bf16.msra.mxu0 %v10960_v0 }
 0xe22   : > { %7552 = vmatprep.subr.bf16.mxu0 %v10953_v37 }
 0xe25   : > { %7554 = vmatpush3.bf16.msra.mxu0 %v10961_v14 }
 0xe26   : > { %7579 = vmatprep.subr.bf16.mxu0 %v10953_v37 }
 0xedb   : > { %v4263_v28 = vpop.f32.mrb[34].mxu0 }
 0xedc   : > { %v4264_v58 = vadd.f32 %v5000_v57, %v4263_v28  ;;  %v5864_v39 = vpop.f32.mrb[35].mxu0  ;;  %v7637_v57 = vpack.c.bf16 %v4705_v46, %v4704_v43  ;;  %v4708_v28 = vld [vmem:[#allocation17 + $0x50] sm:$0xff] }
 0xede   : > { %v10081_v35 = vadd.f32 %v4264_v58, %v10962_v9  ;;  %v4709_v58 = vld [vmem:[#allocation17 + $0x58] sm:$0xff]  ;;  %v4711_v9 = vld [vmem:[#allocation17 + $0x68] sm:$0xff] }
 0xedf   : > { %v7643_v39 = vpack.c.bf16 %v4709_v58, %v4708_v28 }
 0xee0   : > { %v4342_v30 = vmul.f32 %v10081_v35, %v10081_v35  ;;  %5898 = vmatmul.mubr.f32.vlgmr.msra.gmra.mrb[34].mxu1 %v10081_v35 }
 0xee1   : > { %7557 = vmatpush3.bf16.msra.mxu1 %v7556_v5  ;;  %5967 = vmatprep.mubr.msk.f32.mxu1 %vm8254_vm0, %v10608_v2  ;;  %v4710_v5 = vld [vmem:[#allocation17 + $0x60] sm:$0xff] }
 0xee2   : > { %5933 = vmatmul.mubr.f32.vlgmr.msra.gmra.mrb[36].mxu0 %v4342_v30  ;;  %7558 = vmatprep.subr.bf16.mxu1 %v10953_v37  ;;  %v7649_v30 = vpack.c.bf16 %v4713_v41, %v4712_v61 }
 0xee3   : > { %7581 = vmatpush3.bf16.msra.mxu0 %v10954_v18  ;;  %6002 = vmatprep.mubr.msk.f32.mxu0 %vm8254_vm0, %v10608_v2 }
 0xee4   : > { %7582 = vmatprep.subr.bf16.mxu0 %v10953_v37 }
 0xee5   : > { %7560 = vmatpush3.bf16.msra.mxu1 %v7559_v42 }
 0xee6   : > { %7561 = vmatprep.subr.bf16.mxu1 %v10953_v37 }
 0xee7   : > { %7584 = vmatpush3.bf16.msra.mxu0 %v10955_v24 }
 0xee8   : > { %7585 = vmatprep.subr.bf16.mxu0 %v10953_v37 }
 0xee9   : > { %7563 = vmatpush3.bf16.msra.mxu1 %v7562_v59 }
 0xeea   : > { %7564 = vmatprep.subr.bf16.mxu1 %v10953_v37 }
 0xeeb   : > { %7587 = vmatpush3.bf16.msra.mxu0 %v10956_v62 }
 0xeec   : > { %7588 = vmatprep.subr.bf16.mxu0 %v10953_v37 }
 0xeed   : > { %7566 = vmatpush3.bf16.msra.mxu1 %v7565_v1 }
 0xeee   : > { %7567 = vmatprep.subr.bf16.mxu1 %v10953_v37 }
 0xeef   : > { %7590 = vmatpush3.bf16.msra.mxu0 %v10957_v12 }
 0xef0   : > { %7591 = vmatprep.subr.bf16.mxu0 %v10953_v37 }
 0xef1   : > { %7569 = vmatpush3.bf16.msra.mxu1 %v7568_v47  ;;  %v5009_v47 = vld [vmem:[%s10758_s21 + $0x1] ss:$0 sm:$0xff] }
 0xef2   : > { %7570 = vmatprep.subr.bf16.mxu1 %v10953_v37 }
 0xef3   : > { %7593 = vmatpush3.bf16.msra.mxu0 %v10958_v63 }
 0xef4   : > { %7594 = vmatprep.subr.bf16.mxu0 %v10953_v37 }
 0xef5   : > { %7572 = vmatpush3.bf16.msra.mxu1 %v7571_v10 }
 0xef6   : > { %7573 = vmatprep.subr.bf16.mxu1 %v10953_v37 }
 0xef7   : > { %7596 = vmatpush3.bf16.msra.mxu0 %v10959_v21 }
 0xef8   : > { %7597 = vmatprep.subr.bf16.mxu0 %v10953_v37 }
 0xef9   : > { %7575 = vmatpush3.bf16.msra.mxu1 %v7574_v23 }
 0xefa   : > { %7576 = vmatprep.subr.bf16.mxu1 %v10953_v37 }
 0xefb   : > { %7599 = vmatpush3.bf16.msra.mxu0 %v10960_v0 }
 0xefc   : > { %7600 = vmatprep.subr.bf16.mxu0 %v10953_v37 }
 0xefd   : > { %7578 = vmatpush3.bf16.msra.mxu1 %v7577_v32 }
 0xefe   : > { %7603 = vmatprep.subr.bf16.mxu1 %v10953_v37 }
 0xeff   : > { %7602 = vmatpush3.bf16.msra.mxu0 %v10961_v14 }
 0xf00   : > { %7627 = vmatprep.subr.bf16.mxu0 %v10953_v37 }
 0xfb3   : > { %v4338_v53 = vpop.f32.mrb[34].mxu1 }
 0xfb4   : > { %v4413_v56 = vmul.f32 %v4338_v53, %v4338_v53  ;;  %v5899_v33 = vpop.f32.mrb[35].mxu1  ;;  %v4415_v17 = vsub.f32 %v10081_v35, %v4338_v53  ;;  %v7646_v35 = vpack.c.bf16 %v4711_v9, %v4710_v5 }
 0xfb5   : > { %v4409_v11 = vpop.f32.mrb[36].mxu0 }
 0xfb6   : > { %v4414_v13 = vsub.f32 %v4409_v11, %v4413_v56  ;;  %v5934_v48 = vpop.f32.mrb[37].mxu0 }
 0xfb8   : > { %v4416_v7 = vadd.f32 1e-05, %v4414_v13 }
 0xfba   : > { %7845 = vrsqrt.f32 %v4416_v7 }
 0xfc4   : > { %v7846_v15 = vpop.eup %7845 }
 0xfc5   : > { %v4418_v51 = vmul.f32 %v7846_v15, %v4415_v17 }
 0xfc7   : > { %v4425_v29 = vmul.f32 %v5003_v20, %v4418_v51 }
 0xfc9   : > { %v4432_v6 = vadd.f32 %v5004_v31, %v4425_v29 }
 0xfcb   : > { %5968 = vmatmul.mubr.f32.vlgmr.msra.gmra.mrb[36].mxu1 %v4432_v6 }
 0xfcc   : > { %7605 = vmatpush3.bf16.msra.mxu1 %v10954_v18  ;;  %6037 = vmatprep.mubr.msk.f32.mxu1 %vm8254_vm0, %v10608_v2  ;;  %v5006_v18 = vld [vmem:[%s10757_s22 + $0x1] ss:$0 sm:$0xff] }
 0xfcd   : > { %7606 = vmatprep.subr.bf16.mxu1 %v10953_v37 }
 0xfd0   : > { %7608 = vmatpush3.bf16.msra.mxu1 %v10955_v24  ;;  %v4698_v24 = vld [vmem:[#allocation17] sm:$0xff] }
 0xfd1   : > { %7609 = vmatprep.subr.bf16.mxu1 %v10953_v37 }
 0xfd4   : > { %7611 = vmatpush3.bf16.msra.mxu1 %v10956_v62  ;;  %v4699_v62 = vld [vmem:[#allocation17 + $0x8] sm:$0xff] }
 0xfd5   : > { %7612 = vmatprep.subr.bf16.mxu1 %v10953_v37  ;;  %v7628_v25 = vpack.c.bf16 %v4699_v62, %v4698_v24 }
 0xfd8   : > { %7614 = vmatpush3.bf16.msra.mxu1 %v10957_v12 }
 0xfd9   : > { %7615 = vmatprep.subr.bf16.mxu1 %v10953_v37 }
 0xfdc   : > { %7617 = vmatpush3.bf16.msra.mxu1 %v10958_v63 }
 0xfdd   : > { %7618 = vmatprep.subr.bf16.mxu1 %v10953_v37 }
 0xfe0   : > { %7620 = vmatpush3.bf16.msra.mxu1 %v10959_v21  ;;  %v4700_v21 = vld [vmem:[#allocation17 + $0x10] sm:$0xff] }
 0xfe1   : > { %7621 = vmatprep.subr.bf16.mxu1 %v10953_v37 }
 0xfe4   : > { %7623 = vmatpush3.bf16.msra.mxu1 %v10960_v0  ;;  %v7631_v0 = vpack.c.bf16 %v4701_v52, %v4700_v21 }
 0xfe5   : > { %7624 = vmatprep.subr.bf16.mxu1 %v10953_v37 }
 0xfe8   : > { %7626 = vmatpush3.bf16.msra.mxu1 %v10961_v14  ;;  %v4702_v14 = vld [vmem:[#allocation17 + $0x20] sm:$0xff] }
 0xfe9   : > { %v7634_v34 = vpack.c.bf16 %v4703_v16, %v4702_v14 }
0x109e   : > { %v4524_v12 = vpop.f32.mrb[36].mxu1 }
0x109f   : > { %v4525_v63 = vadd.f32 %v5006_v18, %v4524_v12  ;;  %v5969_v40 = vpop.f32.mrb[37].mxu1 }
0x10a1   : > { %v4528_v8 = vadd.f32 %v4525_v63, %v4432_v6 }
0x10a3   : > { %v4603_v4 = vmul.f32 %v4528_v8, %v4528_v8  ;;  %6003 = vmatmul.mubr.f32.vlgmr.msra.gmra.mrb[38].mxu0 %v4528_v8 }
0x10a4   : > { %7629 = vmatpush3.bf16.msra.mxu0 %v7628_v25  ;;  %6072 = vmatprep.mubr.msk.f32.mxu0 %vm8254_vm0, %v10608_v2  ;;  %v4707_v2 = vld [vmem:[#allocation17 + $0x48] sm:$0xff] }
0x10a5   : > { %6038 = vmatmul.mubr.f32.vlgmr.msra.gmra.mrb[38].mxu1 %v4603_v4  ;;  %7630 = vmatprep.subr.bf16.mxu0 %v10953_v37  ;;  %v7640_v55 = vpack.c.bf16 %v4707_v2, %v4706_v27 }
0x10a8   : > { %7632 = vmatpush3.bf16.msra.mxu0 %v7631_v0 }
0x10a9   : > { %7633 = vmatprep.subr.bf16.mxu0 %v10953_v37 }
0x10ac   : > { %7635 = vmatpush3.bf16.msra.mxu0 %v7634_v34 }
0x10ad   : > { %7636 = vmatprep.subr.bf16.mxu0 %v10953_v37 }
0x10b0   : > { %7638 = vmatpush3.bf16.msra.mxu0 %v7637_v57 }
0x10b1   : > { %7639 = vmatprep.subr.bf16.mxu0 %v10953_v37 }
0x10b4   : > { %7641 = vmatpush3.bf16.msra.mxu0 %v7640_v55 }
0x10b5   : > { %7642 = vmatprep.subr.bf16.mxu0 %v10953_v37 }
0x10b8   : > { %7644 = vmatpush3.bf16.msra.mxu0 %v7643_v39 }
0x10b9   : > { %7645 = vmatprep.subr.bf16.mxu0 %v10953_v37 }
0x10bc   : > { %7647 = vmatpush3.bf16.msra.mxu0 %v7646_v35 }
0x10bd   : > { %7648 = vmatprep.subr.bf16.mxu0 %v10953_v37  ;;  %v5010_v37 = vld [vmem:[%s10759_s15 + $0x1] ss:$0 sm:$0xff] }
0x10c0   : > { %7650 = vmatpush3.bf16.msra.mxu0 %v7649_v30 }
0x1176   : > { %v4599_v42 = vpop.f32.mrb[38].mxu0 }
0x1177   : > { %v4674_v38 = vmul.f32 %v4599_v42, %v4599_v42  ;;  %v6004_v45 = vpop.f32.mrb[39].mxu0  ;;  %v4676_v49 = vsub.f32 %v4528_v8, %v4599_v42 }
0x1178   : > { %v4670_v59 = vpop.f32.mrb[38].mxu1 }
0x1179   : > { %v4675_v54 = vsub.f32 %v4670_v59, %v4674_v38  ;;  %v6039_v22 = vpop.f32.mrb[39].mxu1 }
0x117b   : > { %v4677_v1 = vadd.f32 1e-05, %v4675_v54 }
0x117d   : > { %7847 = vrsqrt.f32 %v4677_v1 }
0x1187   : > { %v7848_v26 = vpop.eup %7847 }
0x1188   : > { %v4679_v36 = vmul.f32 %v7848_v26, %v4676_v49 }
0x118a   : > { %v4686_v60 = vmul.f32 %v5009_v47, %v4679_v36 }
0x118c   : > { %v4693_v10 = vadd.f32 %v5010_v37, %v4686_v60 }
0x118e   : > { %6073 = vmatmul.mubr.f32.vlgmr.msra.gmra.mrb[40].mxu0 %v4693_v10 }
0x1261   : > { %v4787_v19 = vpop.f32.mrb[40].mxu0 }
0x1262   : > { %v4788_v23 = vadd.f32 %v5011_v44, %v4787_v19  ;;  %v6074_v3 = vpop.f32.mrb[41].mxu0 }
0x1264   : > { %4791 = vst [vmem:[%s735_s1] sm:$0x1] %v4788_v23 }
0x1265   : > { %8145 = shalt.err (!%p8142_p8)
}
0x1266   : > { %s8146_s1 = scalar_lea.hbm %s10164_s9, 16  ;;  %s8150_s2 = scalar_lea.hbm %s10965_s7, 32 }
0x1267   : > { %p8147_p3 = scmp.ne.s32.totalorder %s10164_s9, %s8146_s1  ;;  %p8151_p0 = scmp.lt.u32.totalorder %s10164_s9, %s10965_s7 }
0x1268   : > { %p8152_p11 = scmp.lt.u32.totalorder %s8150_s2, %s8146_s1  ;;  %p8154_p6 = scmp.lt.u32.totalorder %s8146_s1, %s10164_s9 }
0x1269   : > { %p8148_p12 = pnand %p8147_p3, %p10966_p5 }
0x126a   : > { %p8153_p7 = por %p8152_p11, %p8151_p0 }
0x126b   : > { %p8149_p13 = pneg %p8148_p12 }
0x126c   : > { %p8155_p10 = por %p8154_p6, %p8153_p7 }
0x126e   : > { %p8156_p1 = pnand %p8155_p10, %p8149_p13 }
0x1270   : > { %8159 = shalt.err (!%p8156_p1)
}
0x1271   : > { %7697 = dma.vmem_to_hbm [thread:$0]  (%p10966_p5), %s10166_s6, 16, %s10164_s9, %s4793_s14  }
0x1272 PF: > { %s4817_s30 = sand.u32 1, %s8214_s27   ;;  %p10967_p2 = scmp.ne.s32.totalorder %s10549_s11, 0 }
0x1273   : > { %p10968_p4 = scmp.ge.s32.totalorder %s8234_s19, 2  ;;  %s4818_s3 = scalar_lea.sflag [#allocation4], %s4817_s30 }
0x1275   : > { %p7732_p9 = pnand %p10968_p4, %p10967_p2 }
0x1277   : > { %8209 = dma.done.wait (!%p7732_p9), %s4818_s3, 16  }
0x1278   : > { %8211 = vsyncadd (!%p7732_p9), %s4818_s3, 4294967280  ;;  %s39_s19 = sadd.s32 1, %s8234_s19   ;;  %s10969_s27 = smov %s8218_s28 }
0x1279   : > { %p36_p8 = scmp.ge.s32.totalorder %s39_s19, 4   ;;  %s10970_s28 = smov %s8222_s29 }
0x127a   : > { %s10971_s29 = smov %s8653_s8  ;;  %s10972_s30 = smov %s8230_s0 }
0x127b   : > { %s10973_s0 = smov %s10975_s23  ;;  %38 = sbr.rel (!%p36_p8) target bundleno = 29 (0x1d), region = 187 }
0x1282   :  { %4822 = vsyncpa [#allocation3], 1 }
0x1283   :  { %4824 = vsyncpa [#allocation3 + $0x1], 1 }
0x1284   :  { %4825 = vsyncpa [#allocation6], 1 }
0x1285   :  { %4826 = vsyncpa [#allocation9], 1 }
0x1286   :  { %4827 = vsyncpa [#allocation12], 1 }
0x1287   :  { %4828 = vsyncpa [#allocation15], 1 }
0x1288   :  { %4829 = vsyncpa [#allocation18], 1 }
0x1289   :  { %4830 = vsyncpa [#allocation4], 1 }
0x128a   :  { %4832 = vsyncpa [#allocation4 + $0x1], 1 }

</bundles_post_ra>
